<compile_context>
chip_gen: v5e
topology: v5e:2x2
jax: 0.10.0
libtpu: 0.0.40
codegen_flags: <defaults>
</compile_context>

<pallas_src>
import functools

import jax
import jax.numpy as jnp
from jax.experimental import pallas as pl
from jax.experimental.pallas import tpu as pltpu


def _pool_kernel(verts_ref, f1_ref, f2_ref, f3_ref, out_ref, *,
                 dims, chans, camera_c, camera_f, image_size, ctot_pad):
    """Fused camera projection + rank-1 bilinear feature pooling (one tile)."""
    verts = verts_ref[...]                       # [TN, 3] f32
    tn = verts.shape[0]

    # NOTE(perf, minor): verts is a lane-sparse [TN, 3] block; X/Y/Z column
    # slices cost a lane broadcast each.  Negligible next to the matmuls.
    X = verts[:, 0:1]
    Y = verts[:, 1:2]
    Z = verts[:, 2:3]
    fx, fy = camera_f
    cx, cy = camera_c

    # image_project:  P = K @ [I | t], t = (0, 0, 0.8)
    #   pixel = [fx*X + cx*(Z+0.8), fy*Y + cy*(Z+0.8)] / (Z + 0.8 + 1e-12)
    s = Z + 0.8
    s_eps = s + 1e-12
    # Approximate reciprocal runs on the (otherwise idle) EUP; two Newton
    # steps bring it back to ~f32 accuracy so results match exact division.
    inv = pl.reciprocal(s_eps, approx=True)
    inv = inv * (2.0 - s_eps * inv)
    inv = inv * (2.0 - s_eps * inv)
    px = (fx * X + cx * s) * inv                 # [TN, 1]
    py = (fy * Y + cy * s) * inv                 # [TN, 1]

    feat_refs = (f1_ref, f2_ref, f3_ref)
    off = 0
    for idx in range(3):
        D = dims[idx]
        C = chans[idx]
        f = feat_refs[idx][...]                  # [D*D, C]  (row = x*D + y)

        # bilinear_interpolation: rescale to feature-map resolution, clamp.
        scale = float(D) / image_size
        x = jnp.clip(px * scale, 0.0, float(D - 1))
        y = jnp.clip(py * scale, 0.0, float(D - 1))
        x1 = jnp.floor(x)
        x2 = jnp.ceil(x)
        y1 = jnp.floor(y)
        y2 = jnp.ceil(y)
        # NOTE: integer coordinates (e.g. after border clamping) give all-zero
        # weights -- identical to the reference floor/ceil semantics.
        ax1 = x2 - x
        ax2 = x - x1
        by1 = y2 - y
        by2 = y - y1

        # Rank-1 full bilinear weight W[n, x*D + y] = wx[n,x] * wy[n,y],
        # built directly in 2-D (no 3-D reshape, no integer vector div/mod:
        # the +0.5 float trick recovers k//D exactly for D <= 1024).
        k = jax.lax.broadcasted_iota(
            jnp.int32, (tn, D * D), 1).astype(jnp.float32)
        kx = jnp.floor((k + 0.5) * (1.0 / float(D)))   # exact row index (k // D)
        ky = k - kx * float(D)                         # exact col index (k %  D)
        wx = jnp.where(kx == x1, ax1, 0.0) + jnp.where(kx == x2, ax2, 0.0)
        wy = jnp.where(ky == y1, by1, 0.0) + jnp.where(ky == y2, by2, 0.0)
        # Build W in f32, cast once -> both axes see a single rounding.
        W = (wx * wy).astype(f.dtype)                  # [TN, D*D]

        # One MXU matmul per level: [TN, D*D] x [D*D, C] -> [TN, C], f32 acc.
        pooled = jnp.dot(W, f, preferred_element_type=jnp.float32)

        # Store the chunk straight into its output columns (real VGG channel
        # offsets 0/256/768 are 128-multiples -> unmasked lane-dense stores).
        out_ref[:, off:off + C] = pooled
        off += C

    if ctot_pad > off:   # zero-fill lane padding only when ctot % 128 != 0
        out_ref[:, off:ctot_pad] = jnp.zeros((tn, ctot_pad - off), jnp.float32)


def _device_kind():
    try:
        return jax.devices()[0].device_kind.lower()
    except Exception:  # pragma: no cover - defensive
        return ""


def _pick_tile_n(n_verts):
    """Per-generation M tile: 128 fills v5e's 128-wide MXU, 256 fills v6e/v7x."""
    kind = _device_kind()
    old_gen = any(tag in kind for tag in ("v2", "v3", "v4", "v5"))
    tile = 128 if old_gen else 256
    # Keep at least 2 grid steps when possible so both v7x TensorCores get
    # work; small meshes fall back to the smaller tile.
    while tile > 128 and n_verts < 2 * tile:
        tile //= 2
    return tile


def _dimension_semantics():
    # v7x has two TensorCores per chip; only core-parallel semantics actually
    # shard a 1-D grid across them.  Plain "parallel" elsewhere.
    core_parallel = getattr(pltpu, "CORE_PARALLEL", None)
    if "v7" in _device_kind() and core_parallel is not None:
        return (core_parallel,)
    return ("parallel",)


def _vmem_limit_bytes():
    # v7x: 64 MiB physical VMEM per TensorCore -> stay well under it.
    # v5e/v6e: 128 MiB physical -> 96 MiB scoped is safe and gives headroom
    # for the resident feature maps + W intermediates + output buffers.
    if "v7" in _device_kind():
        return 48 * 1024 * 1024
    return 96 * 1024 * 1024


def pool_perception_feature(verts, features, camera_c, camera_f, image_size,
                            tile_n=None, mxu_dtype=jnp.bfloat16):
    """Pallas equivalent of P2M.pool_perception_feature for one mesh.

    verts:    [N, 3] float32
    features: list of 3 arrays, each [C_i, D_i, D_i] float32 (NCHW, batch dropped)
    returns:  [N, sum(C_i)] float32 concatenated pooled perception features
    """
    n = verts.shape[0]
    dims = tuple(int(f.shape[1]) for f in features)
    chans = tuple(int(f.shape[0]) for f in features)
    ctot = sum(chans)
    ctot_pad = ((ctot + 127) // 128) * 128       # lane-dense padded output

    if tile_n is None:
        tile_n = _pick_tile_n(n)
    n_pad = ((n + tile_n - 1) // tile_n) * tile_n
    verts_p = verts
    if n_pad != n:
        verts_p = jnp.concatenate(
            [verts, jnp.zeros((n_pad - n, 3), verts.dtype)], axis=0)

    # Glue: (C, D, D) -> [D*D, C]  (row = x*D + y, channels on lanes) so the
    # per-vertex bilinear gather becomes one [TN, D*D] x [D*D, C] MXU matmul.
    # Cast to bf16 (or caller-chosen dtype) for native-rate MXU; accumulation
    # stays f32 via preferred_element_type.
    flats = [jnp.transpose(f, (1, 2, 0)).reshape(d * d, c).astype(mxu_dtype)
             for f, d, c in zip(features, dims, chans)]

    kernel = functools.partial(
        _pool_kernel,
        dims=dims, chans=chans,
        camera_c=tuple(float(v) for v in camera_c),
        camera_f=tuple(float(v) for v in camera_f),
        image_size=float(image_size),
        ctot_pad=ctot_pad,
    )

    in_specs = [pl.BlockSpec((tile_n, 3), lambda i: (i, 0))]
    for _ in range(3):
        # Whole-array VMEM residents: the maps are constant across the vertex
        # grid, so they are placed in VMEM once, with no per-step DMA and no
        # second pipeline buffer (important for v7x's 64 MiB VMEM).
        in_specs.append(pl.BlockSpec(memory_space=pltpu.MemorySpace.VMEM))

    out = pl.pallas_call(
        kernel,
        out_shape=jax.ShapeDtypeStruct((n_pad, ctot_pad), jnp.float32),
        grid=(n_pad // tile_n,),
        in_specs=in_specs,
        out_specs=pl.BlockSpec((tile_n, ctot_pad), lambda i: (i, 0)),
        compiler_params=pltpu.CompilerParams(
            dimension_semantics=_dimension_semantics(),
            vmem_limit_bytes=_vmem_limit_bytes()),
    )(verts_p, *flats)
    return out[:n, :ctot]


def _reference_pool(verts, features, camera_c, camera_f, image_size):
    """Pure-JAX reference mirroring the PyTorch semantics (for validation)."""
    fx, fy = camera_f
    cx, cy = camera_c
    X, Y, Z = verts[:, 0:1], verts[:, 1:2], verts[:, 2:3]
    s = Z + 0.8
    px = (fx * X + cx * s) / (s + 1e-12)
    py = (fy * Y + cy * s) / (s + 1e-12)
    outs = []
    for f in features:
        _, D, _ = f.shape
        x = jnp.clip(px * D / image_size, 0.0, float(D - 1))
        y = jnp.clip(py * D / image_size, 0.0, float(D - 1))
        x1, x2 = jnp.floor(x), jnp.ceil(x)
        y1, y2 = jnp.floor(y), jnp.ceil(y)

        def g(xi, yi):
            return f[:, xi.astype(jnp.int32)[:, 0], yi.astype(jnp.int32)[:, 0]].T

        w11 = (x2 - x) * (y2 - y)
        w12 = (x2 - x) * (y - y1)
        w21 = (x - x1) * (y2 - y)
        w22 = (x - x1) * (y - y1)
        outs.append(w11 * g(x1, y1) + w12 * g(x1, y2)
                    + w21 * g(x2, y1) + w22 * g(x2, y2))
    return jnp.concatenate(outs, axis=1)


if __name__ == "__main__":
    key = jax.random.PRNGKey(0)
    k_v, k_f3, k_f4, k_f5 = jax.random.split(key, 4)

    # Small synthetic stand-ins (real P2M: ellipsoid verts + VGG16 conv3_3/4_3/5_3).
    N = 150                       # mesh vertex count (exercises tile padding)
    image_size = 32               # image is conceptually [1, 3, 32, 32] NCHW
    camera_c = (16.0, 16.0)
    camera_f = (24.0, 24.0)

    verts = jax.random.uniform(k_v, (N, 3), jnp.float32, -0.5, 0.5)
    # TODO(synk): real conv3_3/conv4_3/conv5_3 come from a pretrained VGG16;
    # deterministic random feature maps stand in for those activations.
    conv3_3 = jax.random.normal(k_f3, (8, 16, 16), jnp.float32)
    conv4_3 = jax.random.normal(k_f4, (16, 8, 8), jnp.float32)
    conv5_3 = jax.random.normal(k_f5, (16, 4, 4), jnp.float32)
    vgg16_features = [conv3_3, conv4_3, conv5_3]

    ref = _reference_pool(verts, vgg16_features, camera_c, camera_f, image_size)

    # f32 MXU path: tight validation of the rank-1 bilinear formulation.
    perception_f32 = pool_perception_feature(
        verts, vgg16_features, camera_c, camera_f, image_size,
        mxu_dtype=jnp.float32)
    perception_f32 = jax.block_until_ready(perception_f32)
    assert perception_f32.shape == ref.shape
    assert jnp.allclose(perception_f32, ref, atol=1e-3, rtol=1e-3), \
        "f32 kernel mismatch vs reference"

    # bf16 MXU fast path (default): looser tolerance covers bf16 quantization
    # of the feature maps and bilinear weights (accumulation is still f32).
    perception = pool_perception_feature(
        verts, vgg16_features, camera_c, camera_f, image_size)
    perception = jax.block_until_ready(perception)
    assert perception.shape == ref.shape
    assert jnp.allclose(perception, ref, atol=5e-2, rtol=5e-2), \
        "bf16 kernel mismatch vs reference"

    # deform_mesh glue: concat perception features with shape features
    # (analogous to the 1280+3 = 1283-dim GResNet input in the reference).
    shape_features = verts
    features = jnp.concatenate([perception, shape_features], axis=1)
    # TODO(synk): GResNet / SubdivideMeshes / p2m losses are external modules
    # not defined in P2M and are not reimplemented here.
    jax.block_until_ready(features)

    print("KERNEL_OK")
</pallas_src>

<mosaic_0001>
module attributes {stable_mosaic.version = 11 : i64} {
  func.func @_pool_kernel(%arg0: i32, %arg1: memref<128x3xf32, #tpu.memory_space<vmem>>, %arg2: memref<256x8xf32, #tpu.memory_space<vmem>>, %arg3: memref<64x16xf32, #tpu.memory_space<vmem>>, %arg4: memref<16x16xf32, #tpu.memory_space<vmem>>, %arg5: memref<128x128xf32, #tpu.memory_space<vmem>>) attributes {dimension_semantics = [#tpu.dimension_semantics<parallel>], iteration_bounds = array<i64: 2>, scalar_prefetch = 0 : i64, scratch_operands = 0 : i64, tpu.core_type = #tpu.core_type<tc>, window_params = [{transform_indices = @transform_0, window_bounds = array<i64: 128, 3>}, {pipeline_mode = #tpu.pipeline_mode<synchronous>, transform_indices = @transform_1, window_bounds = array<i64: 256, 8>}, {pipeline_mode = #tpu.pipeline_mode<synchronous>, transform_indices = @transform_2, window_bounds = array<i64: 64, 16>}, {pipeline_mode = #tpu.pipeline_mode<synchronous>, transform_indices = @transform_3, window_bounds = array<i64: 16, 16>}, {transform_indices = @transform_4, window_bounds = array<i64: 128, 128>}]} {
    %c0 = arith.constant 0 : index
    %c0_0 = arith.constant 0 : index
    %0 = vector.load %arg1[%c0, %c0_0] : memref<128x3xf32, #tpu.memory_space<vmem>>, vector<128x3xf32>
    %1 = vector.extract_strided_slice %0 {offsets = [0, 0], sizes = [128, 1], strides = [1, 1]} : vector<128x3xf32> to vector<128x1xf32>
    %2 = vector.extract_strided_slice %0 {offsets = [0, 1], sizes = [128, 1], strides = [1, 1]} : vector<128x3xf32> to vector<128x1xf32>
    %3 = vector.extract_strided_slice %0 {offsets = [0, 2], sizes = [128, 1], strides = [1, 1]} : vector<128x3xf32> to vector<128x1xf32>
    %cst = arith.constant 8.000000e-01 : f32
    %4 = vector.broadcast %cst : f32 to vector<128x1xf32>
    %5 = arith.addf %3, %4 : vector<128x1xf32>
    %cst_1 = arith.constant 9.99999996E-13 : f32
    %6 = vector.broadcast %cst_1 : f32 to vector<128x1xf32>
    %7 = arith.addf %5, %6 : vector<128x1xf32>
    %8 = tpu.reciprocal %7 {approx = true} : vector<128x1xf32> -> vector<128x1xf32>
    %9 = arith.mulf %7, %8 : vector<128x1xf32>
    %cst_2 = arith.constant 2.000000e+00 : f32
    %10 = vector.broadcast %cst_2 : f32 to vector<128x1xf32>
    %11 = arith.subf %10, %9 : vector<128x1xf32>
    %12 = arith.mulf %8, %11 : vector<128x1xf32>
    %13 = arith.mulf %7, %12 : vector<128x1xf32>
    %cst_3 = arith.constant 2.000000e+00 : f32
    %14 = vector.broadcast %cst_3 : f32 to vector<128x1xf32>
    %15 = arith.subf %14, %13 : vector<128x1xf32>
    %16 = arith.mulf %12, %15 : vector<128x1xf32>
    %cst_4 = arith.constant 2.400000e+01 : f32
    %17 = vector.broadcast %cst_4 : f32 to vector<128x1xf32>
    %18 = arith.mulf %17, %1 : vector<128x1xf32>
    %cst_5 = arith.constant 1.600000e+01 : f32
    %19 = vector.broadcast %cst_5 : f32 to vector<128x1xf32>
    %20 = arith.mulf %19, %5 : vector<128x1xf32>
    %21 = arith.addf %18, %20 : vector<128x1xf32>
    %22 = arith.mulf %21, %16 : vector<128x1xf32>
    %cst_6 = arith.constant 2.400000e+01 : f32
    %23 = vector.broadcast %cst_6 : f32 to vector<128x1xf32>
    %24 = arith.mulf %23, %2 : vector<128x1xf32>
    %cst_7 = arith.constant 1.600000e+01 : f32
    %25 = vector.broadcast %cst_7 : f32 to vector<128x1xf32>
    %26 = arith.mulf %25, %5 : vector<128x1xf32>
    %27 = arith.addf %24, %26 : vector<128x1xf32>
    %28 = arith.mulf %27, %16 : vector<128x1xf32>
    %c0_8 = arith.constant 0 : index
    %c0_9 = arith.constant 0 : index
    %29 = vector.load %arg2[%c0_8, %c0_9] : memref<256x8xf32, #tpu.memory_space<vmem>>, vector<256x8xf32>
    %cst_10 = arith.constant 5.000000e-01 : f32
    %30 = vector.broadcast %cst_10 : f32 to vector<128x1xf32>
    %31 = arith.mulf %22, %30 : vector<128x1xf32>
    %cst_11 = arith.constant 0.000000e+00 : f32
    %cst_12 = arith.constant 1.500000e+01 : f32
    %32 = vector.broadcast %cst_11 : f32 to vector<128x1xf32>
    %33 = arith.maximumf %32, %31 : vector<128x1xf32>
    %34 = vector.broadcast %cst_12 : f32 to vector<128x1xf32>
    %35 = arith.minimumf %34, %33 : vector<128x1xf32>
    %cst_13 = arith.constant 5.000000e-01 : f32
    %36 = vector.broadcast %cst_13 : f32 to vector<128x1xf32>
    %37 = arith.mulf %28, %36 : vector<128x1xf32>
    %cst_14 = arith.constant 0.000000e+00 : f32
    %cst_15 = arith.constant 1.500000e+01 : f32
    %38 = vector.broadcast %cst_14 : f32 to vector<128x1xf32>
    %39 = arith.maximumf %38, %37 : vector<128x1xf32>
    %40 = vector.broadcast %cst_15 : f32 to vector<128x1xf32>
    %41 = arith.minimumf %40, %39 : vector<128x1xf32>
    %42 = math.floor %35 : vector<128x1xf32>
    %43 = math.ceil %35 : vector<128x1xf32>
    %44 = math.floor %41 : vector<128x1xf32>
    %45 = math.ceil %41 : vector<128x1xf32>
    %46 = arith.subf %43, %35 : vector<128x1xf32>
    %47 = arith.subf %35, %42 : vector<128x1xf32>
    %48 = arith.subf %45, %41 : vector<128x1xf32>
    %49 = arith.subf %41, %44 : vector<128x1xf32>
    %50 = tpu.iota {dimensions = array<i32: 1>} : vector<128x256xi32>
    %51 = arith.sitofp %50 : vector<128x256xi32> to vector<128x256xf32>
    %cst_16 = arith.constant 5.000000e-01 : f32
    %52 = vector.broadcast %cst_16 : f32 to vector<128x256xf32>
    %53 = arith.addf %51, %52 : vector<128x256xf32>
    %cst_17 = arith.constant 6.250000e-02 : f32
    %54 = vector.broadcast %cst_17 : f32 to vector<128x256xf32>
    %55 = arith.mulf %53, %54 : vector<128x256xf32>
    %56 = math.floor %55 : vector<128x256xf32>
    %cst_18 = arith.constant 1.600000e+01 : f32
    %57 = vector.broadcast %cst_18 : f32 to vector<128x256xf32>
    %58 = arith.mulf %56, %57 : vector<128x256xf32>
    %59 = arith.subf %51, %58 : vector<128x256xf32>
    %60 = vector.broadcast %42 : vector<128x1xf32> to vector<128x256xf32>
    %61 = arith.cmpf oeq, %56, %60 : vector<128x256xf32>
    %cst_19 = arith.constant 0.000000e+00 : f32
    %62 = vector.shape_cast %46 : vector<128x1xf32> to vector<128x1xf32>
    %63 = vector.broadcast %62 : vector<128x1xf32> to vector<128x256xf32>
    %64 = vector.broadcast %cst_19 : f32 to vector<128x256xf32>
    %65 = arith.select %61, %63, %64 : vector<128x256xi1>, vector<128x256xf32>
    %66 = vector.broadcast %43 : vector<128x1xf32> to vector<128x256xf32>
    %67 = arith.cmpf oeq, %56, %66 : vector<128x256xf32>
    %cst_20 = arith.constant 0.000000e+00 : f32
    %68 = vector.shape_cast %47 : vector<128x1xf32> to vector<128x1xf32>
    %69 = vector.broadcast %68 : vector<128x1xf32> to vector<128x256xf32>
    %70 = vector.broadcast %cst_20 : f32 to vector<128x256xf32>
    %71 = arith.select %67, %69, %70 : vector<128x256xi1>, vector<128x256xf32>
    %72 = arith.addf %65, %71 : vector<128x256xf32>
    %73 = vector.broadcast %44 : vector<128x1xf32> to vector<128x256xf32>
    %74 = arith.cmpf oeq, %59, %73 : vector<128x256xf32>
    %cst_21 = arith.constant 0.000000e+00 : f32
    %75 = vector.shape_cast %48 : vector<128x1xf32> to vector<128x1xf32>
    %76 = vector.broadcast %75 : vector<128x1xf32> to vector<128x256xf32>
    %77 = vector.broadcast %cst_21 : f32 to vector<128x256xf32>
    %78 = arith.select %74, %76, %77 : vector<128x256xi1>, vector<128x256xf32>
    %79 = vector.broadcast %45 : vector<128x1xf32> to vector<128x256xf32>
    %80 = arith.cmpf oeq, %59, %79 : vector<128x256xf32>
    %cst_22 = arith.constant 0.000000e+00 : f32
    %81 = vector.shape_cast %49 : vector<128x1xf32> to vector<128x1xf32>
    %82 = vector.broadcast %81 : vector<128x1xf32> to vector<128x256xf32>
    %83 = vector.broadcast %cst_22 : f32 to vector<128x256xf32>
    %84 = arith.select %80, %82, %83 : vector<128x256xi1>, vector<128x256xf32>
    %85 = arith.addf %78, %84 : vector<128x256xf32>
    %86 = arith.mulf %72, %85 : vector<128x256xf32>
    %cst_23 = arith.constant dense<0.000000e+00> : vector<128x8xf32>
    %87 = tpu.matmul %86, %29, %cst_23 {dimension_numbers = #tpu.dot_dimension_numbers<[1], [0], [0], [1], [0, 0, 1, 1], [], []>} : vector<128x256xf32>, vector<256x8xf32>, vector<128x8xf32> -> vector<128x8xf32>
    %c0_24 = arith.constant 0 : index
    %c0_25 = arith.constant 0 : index
    %88 = vector.load %arg5[%c0_24, %c0_25] : memref<128x128xf32, #tpu.memory_space<vmem>>, vector<128x8xf32>
    tpu.vector_store %arg5[%c0_24, %c0_25], %87 {strides = array<i32>} : memref<128x128xf32, #tpu.memory_space<vmem>>, vector<128x8xf32>,
    %c0_26 = arith.constant 0 : index
    %c0_27 = arith.constant 0 : index
    %89 = vector.load %arg3[%c0_26, %c0_27] : memref<64x16xf32, #tpu.memory_space<vmem>>, vector<64x16xf32>
    %cst_28 = arith.constant 2.500000e-01 : f32
    %90 = vector.broadcast %cst_28 : f32 to vector<128x1xf32>
    %91 = arith.mulf %22, %90 : vector<128x1xf32>
    %cst_29 = arith.constant 0.000000e+00 : f32
    %cst_30 = arith.constant 7.000000e+00 : f32
    %92 = vector.broadcast %cst_29 : f32 to vector<128x1xf32>
    %93 = arith.maximumf %92, %91 : vector<128x1xf32>
    %94 = vector.broadcast %cst_30 : f32 to vector<128x1xf32>
    %95 = arith.minimumf %94, %93 : vector<128x1xf32>
    %cst_31 = arith.constant 2.500000e-01 : f32
    %96 = vector.broadcast %cst_31 : f32 to vector<128x1xf32>
    %97 = arith.mulf %28, %96 : vector<128x1xf32>
    %cst_32 = arith.constant 0.000000e+00 : f32
    %cst_33 = arith.constant 7.000000e+00 : f32
    %98 = vector.broadcast %cst_32 : f32 to vector<128x1xf32>
    %99 = arith.maximumf %98, %97 : vector<128x1xf32>
    %100 = vector.broadcast %cst_33 : f32 to vector<128x1xf32>
    %101 = arith.minimumf %100, %99 : vector<128x1xf32>
    %102 = math.floor %95 : vector<128x1xf32>
    %103 = math.ceil %95 : vector<128x1xf32>
    %104 = math.floor %101 : vector<128x1xf32>
    %105 = math.ceil %101 : vector<128x1xf32>
    %106 = arith.subf %103, %95 : vector<128x1xf32>
    %107 = arith.subf %95, %102 : vector<128x1xf32>
    %108 = arith.subf %105, %101 : vector<128x1xf32>
    %109 = arith.subf %101, %104 : vector<128x1xf32>
    %110 = tpu.iota {dimensions = array<i32: 1>} : vector<128x64xi32>
    %111 = arith.sitofp %110 : vector<128x64xi32> to vector<128x64xf32>
    %cst_34 = arith.constant 5.000000e-01 : f32
    %112 = vector.broadcast %cst_34 : f32 to vector<128x64xf32>
    %113 = arith.addf %111, %112 : vector<128x64xf32>
    %cst_35 = arith.constant 1.250000e-01 : f32
    %114 = vector.broadcast %cst_35 : f32 to vector<128x64xf32>
    %115 = arith.mulf %113, %114 : vector<128x64xf32>
    %116 = math.floor %115 : vector<128x64xf32>
    %cst_36 = arith.constant 8.000000e+00 : f32
    %117 = vector.broadcast %cst_36 : f32 to vector<128x64xf32>
    %118 = arith.mulf %116, %117 : vector<128x64xf32>
    %119 = arith.subf %111, %118 : vector<128x64xf32>
    %120 = vector.broadcast %102 : vector<128x1xf32> to vector<128x64xf32>
    %121 = arith.cmpf oeq, %116, %120 : vector<128x64xf32>
    %cst_37 = arith.constant 0.000000e+00 : f32
    %122 = vector.shape_cast %106 : vector<128x1xf32> to vector<128x1xf32>
    %123 = vector.broadcast %122 : vector<128x1xf32> to vector<128x64xf32>
    %124 = vector.broadcast %cst_37 : f32 to vector<128x64xf32>
    %125 = arith.select %121, %123, %124 : vector<128x64xi1>, vector<128x64xf32>
    %126 = vector.broadcast %103 : vector<128x1xf32> to vector<128x64xf32>
    %127 = arith.cmpf oeq, %116, %126 : vector<128x64xf32>
    %cst_38 = arith.constant 0.000000e+00 : f32
    %128 = vector.shape_cast %107 : vector<128x1xf32> to vector<128x1xf32>
    %129 = vector.broadcast %128 : vector<128x1xf32> to vector<128x64xf32>
    %130 = vector.broadcast %cst_38 : f32 to vector<128x64xf32>
    %131 = arith.select %127, %129, %130 : vector<128x64xi1>, vector<128x64xf32>
    %132 = arith.addf %125, %131 : vector<128x64xf32>
    %133 = vector.broadcast %104 : vector<128x1xf32> to vector<128x64xf32>
    %134 = arith.cmpf oeq, %119, %133 : vector<128x64xf32>
    %cst_39 = arith.constant 0.000000e+00 : f32
    %135 = vector.shape_cast %108 : vector<128x1xf32> to vector<128x1xf32>
    %136 = vector.broadcast %135 : vector<128x1xf32> to vector<128x64xf32>
    %137 = vector.broadcast %cst_39 : f32 to vector<128x64xf32>
    %138 = arith.select %134, %136, %137 : vector<128x64xi1>, vector<128x64xf32>
    %139 = vector.broadcast %105 : vector<128x1xf32> to vector<128x64xf32>
    %140 = arith.cmpf oeq, %119, %139 : vector<128x64xf32>
    %cst_40 = arith.constant 0.000000e+00 : f32
    %141 = vector.shape_cast %109 : vector<128x1xf32> to vector<128x1xf32>
    %142 = vector.broadcast %141 : vector<128x1xf32> to vector<128x64xf32>
    %143 = vector.broadcast %cst_40 : f32 to vector<128x64xf32>
    %144 = arith.select %140, %142, %143 : vector<128x64xi1>, vector<128x64xf32>
    %145 = arith.addf %138, %144 : vector<128x64xf32>
    %146 = arith.mulf %132, %145 : vector<128x64xf32>
    %cst_41 = arith.constant dense<0.000000e+00> : vector<128x16xf32>
    %147 = tpu.matmul %146, %89, %cst_41 {dimension_numbers = #tpu.dot_dimension_numbers<[1], [0], [0], [1], [0, 0, 1, 1], [], []>} : vector<128x64xf32>, vector<64x16xf32>, vector<128x16xf32> -> vector<128x16xf32>
    %c0_42 = arith.constant 0 : index
    %c8 = arith.constant 8 : index
    %148 = vector.load %arg5[%c0_42, %c8] : memref<128x128xf32, #tpu.memory_space<vmem>>, vector<128x16xf32>
    tpu.vector_store %arg5[%c0_42, %c8], %147 {strides = array<i32>} : memref<128x128xf32, #tpu.memory_space<vmem>>, vector<128x16xf32>,
    %c0_43 = arith.constant 0 : index
    %c0_44 = arith.constant 0 : index
    %149 = vector.load %arg4[%c0_43, %c0_44] : memref<16x16xf32, #tpu.memory_space<vmem>>, vector<16x16xf32>
    %cst_45 = arith.constant 1.250000e-01 : f32
    %150 = vector.broadcast %cst_45 : f32 to vector<128x1xf32>
    %151 = arith.mulf %22, %150 : vector<128x1xf32>
    %cst_46 = arith.constant 0.000000e+00 : f32
    %cst_47 = arith.constant 3.000000e+00 : f32
    %152 = vector.broadcast %cst_46 : f32 to vector<128x1xf32>
    %153 = arith.maximumf %152, %151 : vector<128x1xf32>
    %154 = vector.broadcast %cst_47 : f32 to vector<128x1xf32>
    %155 = arith.minimumf %154, %153 : vector<128x1xf32>
    %cst_48 = arith.constant 1.250000e-01 : f32
    %156 = vector.broadcast %cst_48 : f32 to vector<128x1xf32>
    %157 = arith.mulf %28, %156 : vector<128x1xf32>
    %cst_49 = arith.constant 0.000000e+00 : f32
    %cst_50 = arith.constant 3.000000e+00 : f32
    %158 = vector.broadcast %cst_49 : f32 to vector<128x1xf32>
    %159 = arith.maximumf %158, %157 : vector<128x1xf32>
    %160 = vector.broadcast %cst_50 : f32 to vector<128x1xf32>
    %161 = arith.minimumf %160, %159 : vector<128x1xf32>
    %162 = math.floor %155 : vector<128x1xf32>
    %163 = math.ceil %155 : vector<128x1xf32>
    %164 = math.floor %161 : vector<128x1xf32>
    %165 = math.ceil %161 : vector<128x1xf32>
    %166 = arith.subf %163, %155 : vector<128x1xf32>
    %167 = arith.subf %155, %162 : vector<128x1xf32>
    %168 = arith.subf %165, %161 : vector<128x1xf32>
    %169 = arith.subf %161, %164 : vector<128x1xf32>
    %170 = tpu.iota {dimensions = array<i32: 1>} : vector<128x16xi32>
    %171 = arith.sitofp %170 : vector<128x16xi32> to vector<128x16xf32>
    %cst_51 = arith.constant 5.000000e-01 : f32
    %172 = vector.broadcast %cst_51 : f32 to vector<128x16xf32>
    %173 = arith.addf %171, %172 : vector<128x16xf32>
    %cst_52 = arith.constant 2.500000e-01 : f32
    %174 = vector.broadcast %cst_52 : f32 to vector<128x16xf32>
    %175 = arith.mulf %173, %174 : vector<128x16xf32>
    %176 = math.floor %175 : vector<128x16xf32>
    %cst_53 = arith.constant 4.000000e+00 : f32
    %177 = vector.broadcast %cst_53 : f32 to vector<128x16xf32>
    %178 = arith.mulf %176, %177 : vector<128x16xf32>
    %179 = arith.subf %171, %178 : vector<128x16xf32>
    %180 = vector.broadcast %162 : vector<128x1xf32> to vector<128x16xf32>
    %181 = arith.cmpf oeq, %176, %180 : vector<128x16xf32>
    %cst_54 = arith.constant 0.000000e+00 : f32
    %182 = vector.shape_cast %166 : vector<128x1xf32> to vector<128x1xf32>
    %183 = vector.broadcast %182 : vector<128x1xf32> to vector<128x16xf32>
    %184 = vector.broadcast %cst_54 : f32 to vector<128x16xf32>
    %185 = arith.select %181, %183, %184 : vector<128x16xi1>, vector<128x16xf32>
    %186 = vector.broadcast %163 : vector<128x1xf32> to vector<128x16xf32>
    %187 = arith.cmpf oeq, %176, %186 : vector<128x16xf32>
    %cst_55 = arith.constant 0.000000e+00 : f32
    %188 = vector.shape_cast %167 : vector<128x1xf32> to vector<128x1xf32>
    %189 = vector.broadcast %188 : vector<128x1xf32> to vector<128x16xf32>
    %190 = vector.broadcast %cst_55 : f32 to vector<128x16xf32>
    %191 = arith.select %187, %189, %190 : vector<128x16xi1>, vector<128x16xf32>
    %192 = arith.addf %185, %191 : vector<128x16xf32>
    %193 = vector.broadcast %164 : vector<128x1xf32> to vector<128x16xf32>
    %194 = arith.cmpf oeq, %179, %193 : vector<128x16xf32>
    %cst_56 = arith.constant 0.000000e+00 : f32
    %195 = vector.shape_cast %168 : vector<128x1xf32> to vector<128x1xf32>
    %196 = vector.broadcast %195 : vector<128x1xf32> to vector<128x16xf32>
    %197 = vector.broadcast %cst_56 : f32 to vector<128x16xf32>
    %198 = arith.select %194, %196, %197 : vector<128x16xi1>, vector<128x16xf32>
    %199 = vector.broadcast %165 : vector<128x1xf32> to vector<128x16xf32>
    %200 = arith.cmpf oeq, %179, %199 : vector<128x16xf32>
    %cst_57 = arith.constant 0.000000e+00 : f32
    %201 = vector.shape_cast %169 : vector<128x1xf32> to vector<128x1xf32>
    %202 = vector.broadcast %201 : vector<128x1xf32> to vector<128x16xf32>
    %203 = vector.broadcast %cst_57 : f32 to vector<128x16xf32>
    %204 = arith.select %200, %202, %203 : vector<128x16xi1>, vector<128x16xf32>
    %205 = arith.addf %198, %204 : vector<128x16xf32>
    %206 = arith.mulf %192, %205 : vector<128x16xf32>
    %cst_58 = arith.constant dense<0.000000e+00> : vector<128x16xf32>
    %207 = tpu.matmul %206, %149, %cst_58 {dimension_numbers = #tpu.dot_dimension_numbers<[1], [0], [0], [1], [0, 0, 1, 1], [], []>} : vector<128x16xf32>, vector<16x16xf32>, vector<128x16xf32> -> vector<128x16xf32>
    %c0_59 = arith.constant 0 : index
    %c24 = arith.constant 24 : index
    %208 = vector.load %arg5[%c0_59, %c24] : memref<128x128xf32, #tpu.memory_space<vmem>>, vector<128x16xf32>
    tpu.vector_store %arg5[%c0_59, %c24], %207 {strides = array<i32>} : memref<128x128xf32, #tpu.memory_space<vmem>>, vector<128x16xf32>,
    %cst_60 = arith.constant 0.000000e+00 : f32
    %209 = vector.broadcast %cst_60 : f32 to vector<128x88xf32>
    %c0_61 = arith.constant 0 : index
    %c40 = arith.constant 40 : index
    %210 = vector.load %arg5[%c0_61, %c40] : memref<128x128xf32, #tpu.memory_space<vmem>>, vector<128x88xf32>
    tpu.vector_store %arg5[%c0_61, %c40], %209 {strides = array<i32>} : memref<128x128xf32, #tpu.memory_space<vmem>>, vector<128x88xf32>,
    return
  }
  func.func @transform_0(%arg0: i32) -> (i32, i32) {
    %c0_i32 = arith.constant 0 : i32
    %c0_i32_0 = arith.constant 0 : i32
    return %arg0, %c0_i32 : i32, i32
  }
  func.func @transform_1(%arg0: i32) -> (i32, i32) {
    %c0_i32 = arith.constant 0 : i32
    %c0_i32_0 = arith.constant 0 : i32
    %c0_i32_1 = arith.constant 0 : i32
    return %c0_i32, %c0_i32_0 : i32, i32
  }
  func.func @transform_2(%arg0: i32) -> (i32, i32) {
    %c0_i32 = arith.constant 0 : i32
    %c0_i32_0 = arith.constant 0 : i32
    %c0_i32_1 = arith.constant 0 : i32
    return %c0_i32, %c0_i32_0 : i32, i32
  }
  func.func @transform_3(%arg0: i32) -> (i32, i32) {
    %c0_i32 = arith.constant 0 : i32
    %c0_i32_0 = arith.constant 0 : i32
    %c0_i32_1 = arith.constant 0 : i32
    return %c0_i32, %c0_i32_0 : i32, i32
  }
  func.func @transform_4(%arg0: i32) -> (i32, i32) {
    %c0_i32 = arith.constant 0 : i32
    %c0_i32_0 = arith.constant 0 : i32
    return %arg0, %c0_i32 : i32, i32
  }
}

</mosaic_0001>

<bundles_post_ra>
// kernel: tpu_custom_call.1
= control target key start
LH: loop header
LB: loop body
LE: loop exit
PB: predicated region body
PF: predicated region fallthrough
CT: control target
= control target key end

     0   :  { %9 = vsyncpa [#allocation3], 0  ;;  %s8540_s0 = inlined_call_operand.vmem [shape: f32[256,3], index: 0, kind: input, shape index: {}]   ;;  %s8541_s1 = inlined_call_operand.vmem [shape: f32[256,8], index: 1, kind: input, shape index: {}]   ;;  %s8542_s2 = inlined_call_operand.vmem [shape: f32[64,16], index: 2, kind: input, shape index: {}]   ;;  %s8543_s3 = inlined_call_operand.vmem [shape: f32[16,16], index: 3, kind: input, shape index: {}]   ;;  %s8544_s4 = inlined_call_operand.hbm [shape: f32[256,128], index: 4, kind: output, shape index: {}]  }
   0x1   :  { %11 = vsyncpa [#allocation3 + $0x1], 0  ;;  %s4908_s15 = smov 0   ;;  %s4910_s16 = smov 0  }
   0x2   :  { %s4912_s17 = smov 0   ;;  %s4914_s18 = smov 0  }
   0x3 LB: > { %s4929_s19 = sadd.s32 4294967295, %s4873_s18   ;;  %s4672_s20 = sadd.s32 4294967294, %s4873_s18   ;;  %s4873_s18 = sphi %s4914_s18, %s9390_s18   ;;  %s4869_s17 = sphi %s4912_s17, %s9389_s17   ;;  %s4865_s16 = sphi %s4910_s16, %s9388_s16   ;;  %s4861_s15 = sphi %s4908_s15, %s9387_s15  }
   0x4   : > { %s4933_s21 = sadd.s32 1, %s4873_s18   ;;  %s113_s22 = sadd.s32 1, %s4869_s17 }
   0x5   : > { %s110_s23 = ssub.s32 %s4873_s18, %s4933_s21  ;;  %p123_p0 = scmp.ne.s32.totalorder %s4869_s17, %s4865_s16 }
   0x6   : > { %p111_p1 = scmp.eq.s32.totalorder %s110_s23, 0  ;;  %p124_p2 = scmp.eq.s32.totalorder %s4929_s19, 1 }
   0x7   : > { %p129_p3 = scmp.ne.s32.totalorder %s4865_s16, %s4861_s15  ;;  %p130_p4 = scmp.eq.s32.totalorder %s4672_s20, 1 }
   0x8   : > { %s4944_s24 = scalar_select %p111_p1, %s4869_s17, %s113_s22  }
   0x9   : > { %p4946_p5 = por %p124_p2, %p123_p0  ;;  %p4950_p6 = por %p130_p4, %p129_p3 }
   0xa   : > { %p4675_p7 = scmp.ge.s32.totalorder %s4873_s18, 1  ;;  %p166_p8 = scmp.lt.s32.totalorder %s4873_s18, 3 }
   0xc   : > { %p167_p9 = pnand %p4675_p7, %p166_p8 }
   0xe   : > { %170 = sbr.rel (%p167_p9) target bundleno = 1967 (0x7af), region = 36 }
  0x13   : > { %s4677_s27 = sshll.u32 %s4929_s19, 4  ;;  %s4875_s6 = smov 126  }
  0x14   : > { %p193_p10 = scmp.lt.s32.totalorder %s4677_s27, 31  ;;  %s4876_s7 = smov 127  }
  0x15   : > { %s189_s30 = sand.u32 1, %s4865_s16   ;;  %s4879_s8 = smov 8  }
  0x16   : > { %s9392_s27 = smov (!%p193_p10, %s4677_s27), 31  ;;  %s4880_s13 = smov 24  }
  0x17   : > { %s4678_s28 = sshll.u32 %s9392_s27, 3  ;;  %s4716_s14 = sshll.u32 %s4929_s19, 7 }
  0x18   : > { %s4960_s5 = scalar_lea.vmem %s8540_s0, %s4678_s28  ;;  %s4606_s23 = scalar_lea.hbm %s8544_s4, %s4716_s14 }
  0x19   : > { %v4963_v0 = vld [vmem:[%s4960_s5 + $0x20] sm:$0xff]  ;;  %v4966_v1 = vld [vmem:[%s4960_s5 + $0x10] sm:$0xff]  ;;  %v4975_v6 = vld [vmem:[%s4960_s5 + $0x28] sm:$0xff]  ;;  %s4609_s28 = sshll.u32 %s4606_s23, 4  ;;  %s4595_s19 = scalar_lea.sflag [#allocation3], %s189_s30  ;;  %s4610_s28 = int_to_ptr.hbm [resolvable:$true] %s4609_s28 }
  0x1a   : > { %8828 = vst [vmem:[#allocation5_spill] sm:$0xff] %v4966_v1  ;;  %v4969_v2 = vld [vmem:[%s4960_s5] sm:$0xff]  ;;  %v219_v3 = vadd.f32 0.8, %v4963_v0  ;;  %v217_v4 = vadd.f32 0.8, %v4966_v1 }
  0x1b   : > { %v215_v5 = vadd.f32 0.8, %v4969_v2  ;;  %v4978_v7 = vld [vmem:[%s4960_s5 + $0x18] sm:$0xff]  ;;  %v4985_v10 = vld [vmem:[%s4960_s5 + $0x8] sm:$0xff]  ;;  %v220_v12 = vadd.f32 0.8, %v4975_v6 }
  0x1c   : > { %v4980_v8 = vmul.f32 16.0, %v219_v3  ;;  %v4982_v9 = vmul.f32 16.0, %v217_v4  ;;  %v218_v13 = vadd.f32 0.8, %v4978_v7  ;;  %v216_v14 = vadd.f32 0.8, %v4985_v10 }
  0x1d   : > { %v4987_v11 = vmul.f32 16.0, %v215_v5  ;;  %v4998_v15 = vadd.f32 1e-12, %v215_v5  ;;  %v5002_v17 = vmul.f32 16.0, %v220_v12  ;;  %v5009_v20 = vld [vmem:[%s4960_s5 + $0x40] sm:$0xff]  ;;  %v5012_v21 = vld [vmem:[%s4960_s5 + $0x38] sm:$0xff] }
  0x1e   : > { %415 = vrot.lane.b32.xlu2 %v4980_v8, %s4875_s6  ;;  %411 = vrot.lane.b32.xlu1 %v4982_v9, %s4875_s6  ;;  %v5000_v16 = vadd.f32 1e-12, %v216_v14  ;;  %v5004_v18 = vmul.f32 16.0, %v218_v13  ;;  %v5006_v19 = vmul.f32 16.0, %v216_v14  ;;  %8829 = vst [vmem:[#allocation6_spill] sm:$0xff] %v5009_v20  ;;  %v5016_v22 = vld [vmem:[%s4960_s5 + $0x30] sm:$0xff] }
  0x1f   : > { %407 = vrot.lane.b32.xlu0 %v4987_v11, %s4875_s6  ;;  %8830 = vst [vmem:[#allocation7_spill] sm:$0xff] %v5012_v21  ;;  %4779 = vrcp.f32 %v4998_v15  ;;  %v223_v23 = vadd.f32 0.8, %v5009_v20  ;;  %v222_v24 = vadd.f32 0.8, %v5012_v21  ;;  %v5042_v34 = vld [vmem:[%s4960_s5 + $0x58] sm:$0xff] }
  0x20   : > { %4781 = vrcp.f32 %v5000_v16  ;;  %v5025_v25 = vadd.f32 1e-12, %v219_v3  ;;  %v221_v26 = vadd.f32 0.8, %v5016_v22  ;;  %v5030_v27 = vadd.f32 1e-12, %v217_v4 }
  0x21   : > { %v5032_v28 = vadd.f32 1e-12, %v218_v13  ;;  %v5034_v30 = vmul.f32 16.0, %v223_v23  ;;  %v5036_v31 = vmul.f32 16.0, %v222_v24  ;;  %8831 = vst [vmem:[#allocation8_spill] sm:$0xff] %v5042_v34  ;;  %v5045_v35 = vld [vmem:[%s4960_s5 + $0x50] sm:$0xff] }
  0x22   : > { %4783 = vrcp.f32 %v5025_v25  ;;  %v5039_v33 = vmul.f32 16.0, %v221_v26  ;;  %8832 = vst [vmem:[#allocation9_spill] sm:$0xff] %v5045_v35  ;;  %v5049_v36 = vld [vmem:[%s4960_s5 + $0x48] sm:$0xff]  ;;  %v226_v37 = vadd.f32 0.8, %v5042_v34  ;;  %v5074_v49 = vld [vmem:[%s4960_s5 + $0x70] sm:$0xff] }
  0x23   : > { %4785 = vrcp.f32 %v5030_v27  ;;  %v225_v38 = vadd.f32 0.8, %v5045_v35  ;;  %v5060_v41 = vadd.f32 1e-12, %v220_v12  ;;  %v224_v42 = vadd.f32 0.8, %v5049_v36 }
  0x24   : > { %4787 = vrcp.f32 %v5032_v28  ;;  %v5065_v43 = vadd.f32 1e-12, %v222_v24  ;;  %v5067_v45 = vadd.f32 1e-12, %v221_v26  ;;  %v5069_v47 = vmul.f32 16.0, %v226_v37  ;;  %8833 = vst [vmem:[#allocation10_spill] sm:$0xff] %v5074_v49 }
  0x25   : > { %v4780_v29 = vpop.eup %4779  ;;  %v5071_v48 = vmul.f32 16.0, %v225_v38  ;;  %4789 = vrcp.f32 %v5060_v41  ;;  %v5077_v53 = vmul.f32 16.0, %v224_v42  ;;  %v5080_v54 = vld [vmem:[%s4960_s5 + $0x68] sm:$0xff]  ;;  %v5084_v55 = vld [vmem:[%s4960_s5 + $0x60] sm:$0xff]  ;;  %v5088_v56 = vadd.f32 0.8, %v5074_v49 }
  0x26   : > { %417 = vrot.lane.b32.xlu2 %v5002_v17, %s4875_s6  ;;  %413 = vrot.lane.b32.xlu1 %v5004_v18, %s4875_s6  ;;  %v4782_v32 = vpop.eup %4781  ;;  %v263_v40 = vmul.f32 %v4780_v29, %v4998_v15  ;;  %8834 = vst [vmem:[#allocation11_spill] sm:$0xff] %v5080_v54  ;;  %4791 = vrcp.f32 %v5065_v43  ;;  %v228_v58 = vadd.f32 0.8, %v5080_v54  ;;  %v5097_v62 = vadd.f32 1e-12, %v223_v23  ;;  %s4825_s29 = sshra.s32 %s4610_s28, 4  ;;  %s4826_s29 = int_to_ptr.hbm [resolvable:$true] %s4825_s29 }
  0x27   : > { %409 = vrot.lane.b32.xlu0 %v5006_v19, %s4875_s6  ;;  %v264_v39 = vmul.f32 %v4782_v32, %v5000_v16  ;;  %8835 = vst [vmem:[#allocation12_spill] sm:$0xff] %v5084_v55  ;;  %4793 = vrcp.f32 %v5067_v45  ;;  %v227_v63 = vadd.f32 0.8, %v5084_v55  ;;  %v5103_v4 = vadd.f32 1e-12, %v225_v38  ;;  %s4831_s10 = scalar_lea.hbm %s8544_s4, 256  ;;  %p4832_p0 = scmp.lt.s32.totalorder %s4826_s29, %s8544_s4 }
  0x28   : > { %v4784_v44 = vpop.eup %4783  ;;  %v279_v51 = vsub.f32 2.0, %v263_v40  ;;  %v5105_v12 = vadd.f32 1e-12, %v224_v42  ;;  %v5108_v13 = vmul.f32 16.0, %v5088_v56  ;;  %v5110_v23 = vmul.f32 16.0, %v228_v58  ;;  %v5119_v42 = vld [vmem:[%s4960_s5 + $0x78] sm:$0xff] }
  0x29   : > { %v4786_v46 = vpop.eup %4785  ;;  %v280_v50 = vsub.f32 2.0, %v264_v39  ;;  %v267_v57 = vmul.f32 %v4784_v44, %v5025_v25  ;;  %4795 = vrcp.f32 %v5097_v62  ;;  %v5115_v38 = vmul.f32 16.0, %v227_v63  ;;  %8836 = vst [vmem:[#allocation13_spill] sm:$0xff] %v5119_v42  ;;  %s4676_s5 = sshll.u32 %s189_s30, 7 }
  0x2a   : > { %v4788_v52 = vpop.eup %4787  ;;  %v295_v60 = vmul.f32 %v4780_v29, %v279_v51  ;;  %v265_v3 = vmul.f32 %v4786_v46, %v5030_v27  ;;  %4797 = vrcp.f32 %v5103_v4  ;;  %v5134_v35 = vadd.f32 1e-12, %v228_v58 }
  0x2b   : > { %v296_v59 = vmul.f32 %v4782_v32, %v280_v50  ;;  %v266_v61 = vmul.f32 %v4788_v52, %v5032_v28  ;;  %v4790_v5 = vpop.eup %4789  ;;  %v283_v14 = vsub.f32 2.0, %v267_v57  ;;  %4799 = vrcp.f32 %v5105_v12 }
  0x2c   : > { %v4792_v24 = vpop.eup %4791  ;;  %v311_v29 = vmul.f32 %v295_v60, %v4998_v15  ;;  %v281_v40 = vsub.f32 2.0, %v265_v3  ;;  %v5128_v3 = vadd.f32 1e-12, %v226_v37  ;;  %v268_v54 = vmul.f32 %v4790_v5, %v5060_v41 }
  0x2d   : > { %v312_v26 = vmul.f32 %v296_v59, %v5000_v16  ;;  %v282_v32 = vsub.f32 2.0, %v266_v61  ;;  %v4794_v39 = vpop.eup %4793  ;;  %v299_v50 = vmul.f32 %v4784_v44, %v283_v14  ;;  %v270_v51 = vmul.f32 %v4792_v24, %v5065_v43 }
  0x2e   : > { %423 = vrot.lane.b32.xlu2 %v5034_v30, %s4875_s6  ;;  %421 = vrot.lane.b32.xlu1 %v5036_v31, %s4875_s6  ;;  %v327_v16 = vsub.f32 2.0, %v311_v29  ;;  %v269_v61 = vmul.f32 %v4794_v39, %v5067_v45  ;;  %v230_v44 = vadd.f32 0.8, %v5119_v42  ;;  %v297_v14 = vmul.f32 %v4786_v46, %v281_v40 }
  0x2f   : > { %419 = vrot.lane.b32.xlu0 %v5039_v33, %s4875_s6  ;;  %v328_v15 = vsub.f32 2.0, %v312_v26  ;;  %v298_v57 = vmul.f32 %v4788_v52, %v282_v32  ;;  %v4796_v21 = vpop.eup %4795  ;;  %v5136_v49 = vadd.f32 1e-12, %v227_v63  ;;  %v315_v26 = vmul.f32 %v299_v50, %v5025_v25 }
  0x30   : > { %v286_v52 = vsub.f32 2.0, %v270_v51  ;;  %v4798_v29 = vpop.eup %4797  ;;  %v5141_v37 = vmul.f32 %v327_v16, %v295_v60  ;;  %v285_v34 = vsub.f32 2.0, %v269_v61  ;;  %4801 = vrcp.f32 %v5128_v3 }
  0x31   : > { %v5139_v32 = vmul.f32 %v328_v15, %v296_v59  ;;  %v314_v1 = vmul.f32 %v298_v57, %v5032_v28  ;;  %v4800_v42 = vpop.eup %4799  ;;  %v5145_v46 = vmul.f32 16.0, %v230_v44  ;;  %v313_v58 = vmul.f32 %v297_v14, %v5030_v27 }
  0x32   : > { %v284_v63 = vsub.f32 2.0, %v268_v54  ;;  %4803 = vrcp.f32 %v5134_v35  ;;  %v302_v25 = vmul.f32 %v4792_v24, %v286_v52  ;;  %v273_v59 = vmul.f32 %v4798_v29, %v5103_v4 }
  0x33   : > { %4805 = vrcp.f32 %v5136_v49  ;;  %v331_v28 = vsub.f32 2.0, %v315_v26  ;;  %v330_v60 = vsub.f32 2.0, %v314_v1  ;;  %v301_v40 = vmul.f32 %v4794_v39, %v285_v34 }
  0x34   : > { %v272_v51 = vmul.f32 %v4800_v42, %v5105_v12  ;;  %v329_v27 = vsub.f32 2.0, %v313_v58  ;;  %v300_v54 = vmul.f32 %v4790_v5, %v284_v63  ;;  %v271_v24 = vmul.f32 %v4796_v21, %v5097_v62 }
  0x35   : > { %v5160_v15 = vadd.f32 1e-12, %v5088_v56  ;;  %v5162_v61 = vadd.f32 1e-12, %v230_v44  ;;  %v318_v52 = vmul.f32 %v302_v25, %v5065_v43  ;;  %v289_v26 = vsub.f32 2.0, %v273_v59 }
  0x36   : > { %429 = vrot.lane.b32.xlu2 %v5069_v47, %s4875_s6  ;;  %427 = vrot.lane.b32.xlu1 %v5071_v48, %s4875_s6  ;;  %v4802_v16 = vpop.eup %4801  ;;  %v5165_v34 = vmul.f32 %v331_v28, %v299_v50  ;;  %v5167_v39 = vmul.f32 %v330_v60, %v298_v57  ;;  %v317_v55 = vmul.f32 %v301_v40, %v5067_v45  ;;  %v288_v58 = vsub.f32 2.0, %v272_v51 }
  0x37   : > { %425 = vrot.lane.b32.xlu0 %v5077_v53, %s4875_s6  ;;  %v5170_v63 = vmul.f32 %v329_v27, %v297_v14  ;;  %v316_v56 = vmul.f32 %v300_v54, %v5060_v41  ;;  %v287_v20 = vsub.f32 2.0, %v271_v24  ;;  %4807 = vrcp.f32 %v5160_v15 }
  0x38   : > { %v4804_v1 = vpop.eup %4803  ;;  %4809 = vrcp.f32 %v5162_v61  ;;  %v334_v43 = vsub.f32 2.0, %v318_v52  ;;  %v305_v44 = vmul.f32 %v4798_v29, %v289_v26  ;;  %v333_v45 = vsub.f32 2.0, %v317_v55 }
  0x39   : > { %v4806_v5 = vpop.eup %4805  ;;  %v304_v50 = vmul.f32 %v4800_v42, %v288_v58  ;;  %v276_v57 = vmul.f32 %v4804_v1, %v5134_v35  ;;  %v332_v41 = vsub.f32 2.0, %v316_v56  ;;  %v303_v59 = vmul.f32 %v4796_v21, %v287_v20 }
  0x3a   : > { %v275_v14 = vmul.f32 %v4806_v5, %v5136_v49  ;;  %v274_v28 = vmul.f32 %v4802_v16, %v5128_v3  ;;  %v5184_v29 = vmul.f32 %v334_v43, %v302_v25  ;;  %v321_v60 = vmul.f32 %v305_v44, %v5103_v4 }
  0x3b   : > { %v5187_v27 = vmul.f32 %v333_v45, %v301_v40  ;;  %v320_v55 = vmul.f32 %v304_v50, %v5105_v12  ;;  %v292_v42 = vsub.f32 2.0, %v276_v57  ;;  %v5190_v26 = vmul.f32 %v332_v41, %v300_v54 }
  0x3c   : > { %v291_v24 = vsub.f32 2.0, %v275_v14  ;;  %v319_v58 = vmul.f32 %v303_v59, %v5097_v62  ;;  %v290_v56 = vsub.f32 2.0, %v274_v28  ;;  %v337_v20 = vsub.f32 2.0, %v321_v60 }
  0x3d   : > { %v4808_v51 = vpop.eup %4807  ;;  %v336_v21 = vsub.f32 2.0, %v320_v55  ;;  %v308_v4 = vmul.f32 %v4804_v1, %v292_v42 }
  0x3e   : > { %435 = vrot.lane.b32.xlu2 %v5108_v13, %s4875_s6  ;;  %433 = vrot.lane.b32.xlu1 %v5110_v23, %s4875_s6  ;;  %v4810_v52 = vpop.eup %4809  ;;  %v307_v25 = vmul.f32 %v4806_v5, %v291_v24  ;;  %v335_v40 = vsub.f32 2.0, %v319_v58  ;;  %v306_v54 = vmul.f32 %v4802_v16, %v290_v56  ;;  %v277_v62 = vmul.f32 %v4808_v51, %v5160_v15 }
  0x3f   : > { %431 = vrot.lane.b32.xlu0 %v5115_v38, %s4875_s6  ;;  %v278_v12 = vmul.f32 %v4810_v52, %v5162_v61  ;;  %v5201_v43 = vmul.f32 %v337_v20, %v305_v44  ;;  %v5203_v45 = vmul.f32 %v336_v21, %v304_v50  ;;  %v324_v57 = vmul.f32 %v308_v4, %v5134_v35 }
  0x40   : > { %v323_v14 = vmul.f32 %v307_v25, %v5136_v49  ;;  %v5207_v1 = vmul.f32 %v335_v40, %v303_v59  ;;  %v322_v5 = vmul.f32 %v306_v54, %v5128_v3  ;;  %v293_v28 = vsub.f32 2.0, %v277_v62 }
  0x41   : > { %v294_v41 = vsub.f32 2.0, %v278_v12  ;;  %v340_v16 = vsub.f32 2.0, %v324_v57  ;;  %v8554_v21 = vmov 0   ;;  %v5336_v62 = vmul.f32 24.0, %v4969_v2 }
  0x42   : > { %v339_v44 = vsub.f32 2.0, %v323_v14  ;;  %v338_v35 = vsub.f32 2.0, %v322_v5  ;;  %v309_v49 = vmul.f32 %v4808_v51, %v293_v28  ;;  %4765 = vset.pattern.permute.xlu2 %v8554_v21  ;;  %4764 = vset.pattern.permute.xlu1 %v8554_v21  ;;  %v5351_v2 = vmul.f32 24.0, %v4978_v7 }
  0x43   : > { %v310_v50 = vmul.f32 %v4810_v52, %v294_v41  ;;  %v5216_v60 = vmul.f32 %v340_v16, %v308_v4 }
  0x44   : > { %v5218_v59 = vmul.f32 %v339_v44, %v307_v25  ;;  %v5221_v55 = vmul.f32 %v338_v35, %v306_v54  ;;  %v325_v42 = vmul.f32 %v309_v49, %v5160_v15  ;;  %v5374_v35 = vmul.f32 24.0, %v5016_v22 }
  0x45   : > { %v326_v3 = vmul.f32 %v310_v50, %v5162_v61 }
  0x46   : > { %489 = vrot.lane.b32.xlu2 %v5139_v32, %s4875_s6  ;;  %487 = vrot.lane.b32.xlu1 %v5141_v37, %s4875_s6  ;;  %v341_v51 = vsub.f32 2.0, %v325_v42 }
  0x47   : > { %437 = vrot.lane.b32.xlu0 %v5145_v46, %s4875_s6  ;;  %v342_v24 = vsub.f32 2.0, %v326_v3  ;;  %v5378_v3 = vmul.f32 24.0, %v4975_v6 }
  0x48   : > { %v5232_v58 = vmul.f32 %v341_v51, %v309_v49 }
  0x49   : > { %v5230_v52 = vmul.f32 %v342_v24, %v310_v50 }
  0x4e   : > { %495 = vrot.lane.b32.xlu2 %v5165_v34, %s4875_s6  ;;  %493 = vrot.lane.b32.xlu1 %v5167_v39, %s4875_s6 }
  0x4f   : > { %491 = vrot.lane.b32.xlu0 %v5170_v63, %s4875_s6 }
  0x56   : > { %501 = vrot.lane.b32.xlu2 %v5184_v29, %s4875_s6  ;;  %499 = vrot.lane.b32.xlu1 %v5187_v27, %s4875_s6 }
  0x57   : > { %497 = vrot.lane.b32.xlu0 %v5190_v26, %s4875_s6 }
  0x5e   : > { %507 = vrot.lane.b32.xlu2 %v5201_v43, %s4875_s6  ;;  %505 = vrot.lane.b32.xlu1 %v5203_v45, %s4875_s6 }
  0x5f   : > { %503 = vrot.lane.b32.xlu0 %v5207_v1, %s4875_s6 }
  0x66   : > { %513 = vrot.lane.b32.xlu2 %v5216_v60, %s4875_s6  ;;  %511 = vrot.lane.b32.xlu1 %v5218_v59, %s4875_s6 }
  0x67   : > { %509 = vrot.lane.b32.xlu0 %v5221_v55, %s4875_s6 }
  0x6e   : > { %551 = vrot.lane.b32.xlu2 %v4987_v11, %s4876_s7  ;;  %517 = vrot.lane.b32.xlu1 %v5230_v52, %s4875_s6 }
  0x6f   : > { %515 = vrot.lane.b32.xlu0 %v5232_v58, %s4875_s6  ;;  %s7164_s6 = scalar_lea.vmem [#allocation2], %s4676_s5  ;;  %s4827_s5 = scalar_lea.hbm %s4826_s29, 128 }
  0x70   : > { %s4607_s27 = sshll.u32 %s7164_s6, 4  ;;  %p4828_p11 = scmp.ne.s32.totalorder %s4826_s29, %s4827_s5  ;;  %s4608_s27 = int_to_ptr.vmem [resolvable:$true] %s4607_s27 }
  0x71   : > { %p4833_p1 = scmp.lt.s32.totalorder %s4831_s10, %s4827_s5 }
  0x72   : > { %p4829_p12 = pnand %p4828_p11, %p4946_p5 }
  0x73   : > { %p4834_p2 = por %p4833_p1, %p4832_p0 }
  0x74   : > { %p4830_p13 = pneg %p4829_p12 }
  0x76   : > { %557 = vrot.lane.b32.xlu2 %v5004_v18, %s4876_s7  ;;  %555 = vrot.lane.b32.xlu1 %v4982_v9, %s4876_s7  ;;  %p4835_p3 = pnand %p4834_p2, %p4830_p13 }
  0x77   : > { %553 = vrot.lane.b32.xlu0 %v5006_v19, %s4876_s7 }
  0x78   : > { %v416_v15 = vpop.permute.xlu2 %415 }
  0x7e   : > { %563 = vrot.lane.b32.xlu2 %v5039_v33, %s4876_s7  ;;  %561 = vrot.lane.b32.xlu1 %v5002_v17, %s4876_s7  ;;  %v5281_v33 = vmul.f32 24.0, %v4985_v10  ;;  %v5295_v10 = vmul.f32 24.0, %v4963_v0 }
  0x7f   : > { %559 = vrot.lane.b32.xlu0 %v4980_v8, %s4876_s7 }
  0x80   : > { %v5252_v11 = vpop.permute.xlu2 %417 }
  0x81   : > { %v460_v42 = vadd.f32 %v5252_v11, %v5378_v3 }
  0x86   : > { %569 = vrot.lane.b32.xlu2 %v5077_v53, %s4876_s7  ;;  %567 = vrot.lane.b32.xlu1 %v5034_v30, %s4876_s7 }
  0x87   : > { %565 = vrot.lane.b32.xlu0 %v5036_v31, %s4876_s7 }
  0x88   : > { %v5260_v9 = vpop.permute.xlu2 %423 }
  0x8e   : > { %575 = vrot.lane.b32.xlu2 %v5115_v38, %s4876_s7  ;;  %573 = vrot.lane.b32.xlu1 %v5069_v47, %s4876_s7 }
  0x8f   : > { %571 = vrot.lane.b32.xlu0 %v5071_v48, %s4876_s7 }
  0x90   : > { %v5268_v8 = vpop.permute.xlu2 %429  ;;  %v5270_v17 = vpop.permute.xlu1 %411 }
  0x91   : > { %v408_v18 = vpop.permute.xlu0 %407 }
  0x96   : > { %581 = vrot.lane.b32.xlu2 %v5145_v46, %s4876_s7  ;;  %579 = vrot.lane.b32.xlu1 %v5108_v13, %s4876_s7 }
  0x97   : > { %577 = vrot.lane.b32.xlu0 %v5110_v23, %s4876_s7 }
  0x98   : > { %v5278_v19 = vpop.permute.xlu2 %435  ;;  %v414_v30 = vpop.permute.xlu1 %413 }
  0x99   : > { %v410_v31 = vpop.permute.xlu0 %409  ;;  %v458_v28 = vadd.f32 %v414_v30, %v5351_v2 }
  0x9a   : > { %v456_v47 = vadd.f32 %v410_v31, %v5281_v33  ;;  %v8846_v31 = vld [vmem:[#allocation6_spill] sm:$0xff] }
  0x9e   : > { %619 = vrot.lane.b32.xlu2 %v5170_v63, %s4876_s7  ;;  %617 = vrot.lane.b32.xlu1 %v5139_v32, %s4876_s7  ;;  %v459_v32 = vadd.f32 %v416_v15, %v5295_v10 }
  0x9f   : > { %615 = vrot.lane.b32.xlu0 %v5141_v37, %s4876_s7 }
  0xa0   : > { %v5290_v48 = vpop.permute.xlu1 %421  ;;  %v490_v53 = vpop.permute.xlu2 %489 }
  0xa1   : > { %v5292_v13 = vmul.f32 %v490_v53, %v456_v47  ;;  %v420_v23 = vpop.permute.xlu0 %419 }
  0xa3   : > { %8837 = vst [vmem:[#allocation14_spill] sm:$0xff] %v5292_v13  ;;  %v712_v38 = vmul.f32 0.5, %v5292_v13 }
  0xa5   : > { %v728_v46 = vmax.f32 %v712_v38, 0.0 }
  0xa6   : > { %625 = vrot.lane.b32.xlu2 %v5190_v26, %s4876_s7  ;;  %623 = vrot.lane.b32.xlu1 %v5165_v34, %s4876_s7 }
  0xa7   : > { %v5303_v37 = vmin.f32 %v728_v46, 15.0  ;;  %621 = vrot.lane.b32.xlu0 %v5167_v39, %s4876_s7 }
  0xa8   : > { %v5307_v61 = vpop.permute.xlu1 %427  ;;  %v496_v0 = vpop.permute.xlu2 %495 }
  0xa9   : > { %v5309_v63 = vmul.f32 %v496_v0, %v459_v32  ;;  %v5311_v56 = vpop.permute.xlu0 %425  ;;  %v808_v20 = vfloor.f32 %v5303_v37 }
  0xab   : > { %8838 = vst [vmem:[#allocation15_spill] sm:$0xff] %v5309_v63  ;;  %v715_v26 = vmul.f32 0.5, %v5309_v63  ;;  %v5318_v34 = vsub.f32 %v5303_v37, %v808_v20 }
  0xad   : > { %8839 = vst [vmem:[#allocation16_spill] sm:$0xff] %v5318_v34  ;;  %v731_v39 = vmax.f32 %v715_v26, 0.0 }
  0xae   : > { %631 = vrot.lane.b32.xlu2 %v5207_v1, %s4876_s7  ;;  %629 = vrot.lane.b32.xlu1 %v5184_v29, %s4876_s7  ;;  %v455_v29 = vadd.f32 %v408_v18, %v5336_v62  ;;  %v5395_v18 = vmul.f32 24.0, %v5049_v36 }
  0xaf   : > { %v5324_v4 = vmin.f32 %v731_v39, 15.0  ;;  %627 = vrot.lane.b32.xlu0 %v5187_v27, %s4876_s7 }
  0xb0   : > { %v5328_v25 = vpop.permute.xlu1 %433  ;;  %v5330_v12 = vpop.permute.xlu2 %501  ;;  %8845 = vst [vmem:[#allocation22_spill] sm:$0xff] %v5395_v18  ;;  %v464_v38 = vadd.f32 %v5311_v56, %v5395_v18 }
  0xb1   : > { %v5332_v40 = vpop.permute.xlu0 %431  ;;  %v811_v54 = vfloor.f32 %v5324_v4 }
  0xb3   : > { %v5339_v57 = vsub.f32 %v5324_v4, %v811_v54 }
  0xb5   : > { %8840 = vst [vmem:[#allocation17_spill] sm:$0xff] %v5339_v57 }
  0xb6   : > { %637 = vrot.lane.b32.xlu2 %v5221_v55, %s4876_s7  ;;  %635 = vrot.lane.b32.xlu1 %v5201_v43, %s4876_s7  ;;  %v461_v55 = vadd.f32 %v420_v23, %v5374_v35 }
  0xb7   : > { %633 = vrot.lane.b32.xlu0 %v5203_v45, %s4876_s7 }
  0xb8   : > { %v5348_v27 = vpop.permute.xlu2 %507  ;;  %v488_v14 = vpop.permute.xlu1 %487 }
  0xb9   : > { %v5353_v41 = vpop.permute.xlu0 %437  ;;  %v5355_v1 = vmul.f32 %v488_v14, %v455_v29 }
  0xbb   : > { %8841 = vst [vmem:[#allocation18_spill] sm:$0xff] %v5355_v1  ;;  %v711_v5 = vmul.f32 0.5, %v5355_v1  ;;  %v8589_v1 = vceil.f32 %v5324_v4 }
  0xbd   : > { %v727_v43 = vmax.f32 %v711_v5, 0.0  ;;  %v8852_v5 = vld [vmem:[#allocation8_spill] sm:$0xff] }
  0xbe   : > { %643 = vrot.lane.b32.xlu2 %v5232_v58, %s4876_s7  ;;  %641 = vrot.lane.b32.xlu1 %v5216_v60, %s4876_s7 }
  0xbf   : > { %639 = vrot.lane.b32.xlu0 %v5218_v59, %s4876_s7  ;;  %v5365_v7 = vmin.f32 %v727_v43, 15.0 }
  0xc0   : > { %v5367_v45 = vpop.permute.xlu2 %513  ;;  %v494_v16 = vpop.permute.xlu1 %493 }
  0xc1   : > { %v5369_v44 = vpop.permute.xlu0 %491  ;;  %v5371_v50 = vmul.f32 %v494_v16, %v458_v28  ;;  %v807_v60 = vfloor.f32 %v5365_v7  ;;  %v5422_v28 = vmul.f32 24.0, %v8852_v5  ;;  %v8859_v5 = vld [vmem:[#allocation10_spill] sm:$0xff] }
  0xc3   : > { %8842 = vst [vmem:[#allocation19_spill] sm:$0xff] %v5371_v50  ;;  %v714_v49 = vmul.f32 0.5, %v5371_v50 }
  0xc5   : > { %v730_v59 = vmax.f32 %v714_v49, 0.0 }
  0xc6   : > { %957 = vperm.xlu2 %4765, %v808_v20   ;;  %952 = vperm.xlu1 %4764, %v807_v60  }
  0xc7   : > { %645 = vrot.lane.b32.xlu0 %v5230_v52, %s4876_s7  ;;  %v5386_v22 = vmin.f32 %v730_v59, 15.0  ;;  %v5399_v52 = vmul.f32 24.0, %v8846_v31  ;;  %v5428_v59 = vsub.f32 %v5365_v7, %v807_v60 }
  0xc8   : > { %v5388_v24 = vpop.permute.xlu2 %551  ;;  %v500_v51 = vpop.permute.xlu1 %499 }
  0xc9   : > { %v498_v6 = vpop.permute.xlu0 %497  ;;  %v5390_v58 = vmul.f32 %v500_v51, %v461_v55  ;;  %v810_v47 = vfloor.f32 %v5386_v22  ;;  %v463_v36 = vadd.f32 %v5260_v9, %v5399_v52 }
  0xca   : > { %v5392_v15 = vmul.f32 %v498_v6, %v460_v42 }
  0xcb   : > { %8843 = vst [vmem:[#allocation20_spill] sm:$0xff] %v5390_v58  ;;  %v717_v30 = vmul.f32 0.5, %v5390_v58  ;;  %v5435_v6 = vsub.f32 %v5386_v22, %v810_v47 }
  0xcc   : > { %8844 = vst [vmem:[#allocation21_spill] sm:$0xff] %v5392_v15  ;;  %v716_v11 = vmul.f32 0.5, %v5392_v15  ;;  %v8584_v15 = vceil.f32 %v5303_v37 }
  0xcd   : > { %v733_v53 = vmax.f32 %v717_v30, 0.0  ;;  %v466_v30 = vadd.f32 %v5268_v8, %v5422_v28 }
  0xce   : > { %v732_v23 = vmax.f32 %v716_v11, 0.0  ;;  %972 = vperm.xlu2 %4765, %v811_v54   ;;  %967 = vperm.xlu1 %4764, %v810_v47   ;;  %v8850_v54 = vld [vmem:[#allocation12_spill] sm:$0xff] }
  0xcf   : > { %v5409_v32 = vmin.f32 %v733_v53, 15.0  ;;  %v5418_v14 = vmul.f32 24.0, %v8850_v54 }
  0xd0   : > { %v5407_v46 = vmin.f32 %v732_v23, 15.0  ;;  %v5411_v0 = vpop.permute.xlu2 %557  ;;  %v506_v20 = vpop.permute.xlu1 %505 }
  0xd1   : > { %v504_v26 = vpop.permute.xlu0 %503  ;;  %v5413_v39 = vmul.f32 %v506_v20, %v464_v38  ;;  %8851 = vst [vmem:[#allocation12_spill] sm:$0xff] %v5418_v14  ;;  %v813_v16 = vfloor.f32 %v5409_v32  ;;  %v467_v42 = vadd.f32 %v5332_v40, %v5418_v14  ;;  %v8855_v38 = vld [vmem:[#allocation5_spill] sm:$0xff] }
  0xd2   : > { %8847 = vst [vmem:[#allocation6_spill] sm:$0xff] %v5407_v46  ;;  %v5415_v29 = vmul.f32 %v504_v26, %v463_v36  ;;  %v812_v43 = vfloor.f32 %v5407_v46  ;;  %v5446_v36 = vmul.f32 24.0, %v8855_v38  ;;  %v8857_v26 = vld [vmem:[#allocation13_spill] sm:$0xff] }
  0xd3   : > { %8848 = vst [vmem:[#allocation23_spill] sm:$0xff] %v5413_v39  ;;  %v720_v56 = vmul.f32 0.5, %v5413_v39  ;;  %v5455_v8 = vmul.f32 24.0, %v8857_v26 }
  0xd4   : > { %8849 = vst [vmem:[#allocation24_spill] sm:$0xff] %v5415_v29  ;;  %v719_v9 = vmul.f32 0.5, %v5415_v29  ;;  %v5452_v47 = vsub.f32 %v5407_v46, %v812_v43 }
  0xd5   : > { %v736_v49 = vmax.f32 %v720_v56, 0.0  ;;  %8858 = vst [vmem:[#allocation13_spill] sm:$0xff] %v5455_v8 }
  0xd6   : > { %v735_v55 = vmax.f32 %v719_v9, 0.0  ;;  %977 = vperm.xlu1 %4764, %v812_v43   ;;  %982 = vperm.xlu2 %4765, %v813_v16   ;;  %v5460_v9 = vmul.f32 24.0, %v8859_v5  ;;  %v457_v43 = vadd.f32 %v5270_v17, %v5446_v36 }
  0xd7   : > { %v5432_v51 = vmin.f32 %v736_v49, 15.0 }
  0xd8   : > { %v5439_v31 = vmin.f32 %v735_v55, 15.0  ;;  %v5441_v11 = vpop.permute.xlu2 %563  ;;  %v512_v60 = vpop.permute.xlu1 %511 }
  0xd9   : > { %v510_v53 = vpop.permute.xlu0 %509  ;;  %v5443_v23 = vmul.f32 %v512_v60, %v467_v42  ;;  %v816_v56 = vfloor.f32 %v5432_v51  ;;  %v5464_v42 = vsub.f32 %v5409_v32, %v813_v16  ;;  %v469_v16 = vadd.f32 %v5278_v19, %v5460_v9 }
  0xda   : > { %8853 = vst [vmem:[#allocation8_spill] sm:$0xff] %v5439_v31  ;;  %v5448_v40 = vmul.f32 %v510_v53, %v466_v30  ;;  %v815_v20 = vfloor.f32 %v5439_v31  ;;  %v470_v53 = vadd.f32 %v5353_v41, %v5455_v8 }
  0xdb   : > { %8854 = vst [vmem:[#allocation25_spill] sm:$0xff] %v5443_v23  ;;  %v723_v54 = vmul.f32 0.5, %v5443_v23  ;;  %v5476_v26 = vsub.f32 %v5432_v51, %v816_v56 }
  0xdc   : > { %8856 = vst [vmem:[#allocation5_spill] sm:$0xff] %v5448_v40  ;;  %v722_v49 = vmul.f32 0.5, %v5448_v40  ;;  %v5469_v60 = vsub.f32 %v5439_v31, %v815_v20 }
  0xdd   : > { %v739_v55 = vmax.f32 %v723_v54, 0.0  ;;  %v5481_v54 = vmul.f32 %v5369_v44, %v457_v43 }
  0xde   : > { %v738_v30 = vmax.f32 %v722_v49, 0.0  ;;  %992 = vperm.xlu1 %4764, %v815_v20   ;;  %997 = vperm.xlu2 %4765, %v816_v56  }
  0xdf   : > { %v5473_v38 = vmin.f32 %v739_v55, 15.0  ;;  %8860 = vst [vmem:[#allocation10_spill] sm:$0xff] %v5481_v54  ;;  %v713_v19 = vmul.f32 0.5, %v5481_v54 }
  0xe0   : > { %v5483_v17 = vmin.f32 %v738_v30, 15.0  ;;  %v5485_v5 = vpop.permute.xlu2 %569  ;;  %v518_v20 = vpop.permute.xlu1 %517 }
  0xe1   : > { %8862 = vst [vmem:[#allocation27_spill] sm:$0xff] %v5485_v5  ;;  %v516_v49 = vpop.permute.xlu0 %515  ;;  %v5487_v21 = vmul.f32 %v518_v20, %v470_v53  ;;  %v819_v56 = vfloor.f32 %v5473_v38  ;;  %v8865_v20 = vld [vmem:[#allocation7_spill] sm:$0xff] }
  0xe2   : > { %8861 = vst [vmem:[#allocation26_spill] sm:$0xff] %v5483_v17  ;;  %v5489_v41 = vmul.f32 %v516_v49, %v469_v16  ;;  %v818_v55 = vfloor.f32 %v5483_v17  ;;  %v5505_v49 = vmul.f32 24.0, %v8865_v20 }
  0xe3   : > { %8863 = vst [vmem:[#allocation28_spill] sm:$0xff] %v5487_v21  ;;  %v726_v57 = vmul.f32 0.5, %v5487_v21  ;;  %v5500_v53 = vsub.f32 %v5473_v38, %v819_v56  ;;  %v729_v21 = vmax.f32 %v713_v19, 0.0  ;;  %v8868_v19 = vld [vmem:[#allocation9_spill] sm:$0xff] }
  0xe4   : > { %8864 = vst [vmem:[#allocation29_spill] sm:$0xff] %v5489_v41  ;;  %v725_v44 = vmul.f32 0.5, %v5489_v41  ;;  %v5497_v30 = vsub.f32 %v5483_v17, %v818_v55  ;;  %v5528_v13 = vmul.f32 24.0, %v8868_v19 }
  0xe5   : > { %v742_v43 = vmax.f32 %v726_v57, 0.0  ;;  %v5522_v20 = vmin.f32 %v729_v21, 15.0 }
  0xe6   : > { %v741_v34 = vmax.f32 %v725_v44, 0.0  ;;  %1007 = vperm.xlu1 %4764, %v818_v55   ;;  %1012 = vperm.xlu2 %4765, %v819_v56   ;;  %v465_v63 = vadd.f32 %v5307_v61, %v5528_v13 }
  0xe7   : > { %v5502_v16 = vmin.f32 %v742_v43, 15.0  ;;  %v462_v43 = vadd.f32 %v5290_v48, %v5505_v49  ;;  %v8585_v48 = vceil.f32 %v5522_v20 }
  0xe8   : > { %v5507_v23 = vmin.f32 %v741_v34, 15.0  ;;  %v5509_v39 = vpop.permute.xlu2 %575  ;;  %v5511_v57 = vpop.permute.xlu1 %555  ;;  %v5552_v54 = vmul.f32 %v5348_v27, %v465_v63  ;;  %v875_v63 = vsub.f32 %v8589_v1, %v5324_v4 }
  0xe9   : > { %8866 = vst [vmem:[#allocation7_spill] sm:$0xff] %v5509_v39  ;;  %v5513_v58 = vpop.permute.xlu0 %553  ;;  %v822_v55 = vfloor.f32 %v5502_v16  ;;  %v5531_v41 = vmul.f32 %v5330_v12, %v462_v43  ;;  %v873_v12 = vsub.f32 %v8585_v48, %v5522_v20  ;;  %v8871_v43 = vld [vmem:[#allocation11_spill] sm:$0xff]  ;;  %v8592_v39 = vmov 1  }
  0xea   : > { %v821_v44 = vfloor.f32 %v5507_v23  ;;  %v5549_v19 = vmul.f32 24.0, %v8871_v43  ;;  %8872 = vst [vmem:[#allocation11_spill] sm:$0xff] %v5552_v54  ;;  %v721_v43 = vmul.f32 0.5, %v5552_v54  ;;  %v8598_v54 = vceil.f32 %v5439_v31  ;;  %4766 = vset.pattern.permute.xlu0 %v8592_v39 }
  0xeb   : > { %v5518_v56 = vsub.f32 %v5502_v16, %v822_v55  ;;  %8869 = vst [vmem:[#allocation9_spill] sm:$0xff] %v5531_v41  ;;  %v8605_v5 = vceil.f32 %v5507_v23 }
  0xec   : > { %v5525_v34 = vsub.f32 %v5507_v23, %v821_v44 }
  0xed   : > { %8867 = vst [vmem:[#allocation30_spill] sm:$0xff] %v5518_v56 }
  0xee   : > { %1022 = vperm.xlu1 %4764, %v821_v44   ;;  %1027 = vperm.xlu2 %4765, %v822_v55   ;;  %v718_v55 = vmul.f32 0.5, %v5531_v41  ;;  %v872_v44 = vsub.f32 %v8584_v15, %v5303_v37  ;;  %v8591_v15 = vceil.f32 %v5407_v46 }
  0xf0   : > { %v5533_v40 = vpop.permute.xlu2 %581  ;;  %v562_v29 = vpop.permute.xlu1 %561  ;;  %v734_v50 = vmax.f32 %v718_v55, 0.0  ;;  %v876_v27 = vsub.f32 %v8591_v15, %v5407_v46  ;;  %v737_v55 = vmax.f32 %v721_v43, 0.0 }
  0xf1   : > { %8870 = vst [vmem:[#allocation31_spill] sm:$0xff] %v5533_v40  ;;  %v5537_v21 = vpop.permute.xlu0 %559 }
  0xf2   : > { %v5579_v14 = vmin.f32 %v737_v55, 15.0  ;;  %v8602_v55 = vceil.f32 %v5483_v17 }
  0xf4   : > { %v8601_v39 = vceil.f32 %v5579_v14 }
  0xf6   : > { %1069 = vperm.xlu1 %4764, %v872_v44   ;;  %1074 = vperm.xlu2 %4765, %v873_v12   ;;  %v468_v44 = vadd.f32 %v5328_v25, %v5549_v19  ;;  %v5562_v12 = vmin.f32 %v734_v50, 15.0 }
  0xf8   : > { %v5554_v61 = vpop.permute.xlu2 %619  ;;  %v568_v41 = vpop.permute.xlu1 %567  ;;  %v5572_v48 = vmul.f32 %v5367_v45, %v468_v44  ;;  %v8597_v50 = vceil.f32 %v5562_v12  ;;  %v879_v44 = vsub.f32 %v8598_v54, %v5439_v31 }
  0xf9   : > { %v5558_v40 = vpop.permute.xlu0 %565 }
  0xfa   : > { %8873 = vst [vmem:[#allocation32_spill] sm:$0xff] %v5572_v48  ;;  %v878_v45 = vsub.f32 %v8597_v50, %v5562_v12  ;;  %v881_v50 = vsub.f32 %v8601_v39, %v5579_v14 }
  0xfe   : > { %1084 = vperm.xlu1 %4764, %v875_v63   ;;  %1089 = vperm.xlu2 %4765, %v876_v27   ;;  %v724_v63 = vmul.f32 0.5, %v5572_v48 }
 0x100   : > { %v626_v8 = vpop.permute.xlu2 %625  ;;  %v574_v25 = vpop.permute.xlu1 %573  ;;  %v740_v43 = vmax.f32 %v724_v63, 0.0  ;;  %v604_v63 = vadd.f32 %v562_v29, %v5378_v3 }
 0x101   : > { %v5577_v1 = vpop.permute.xlu0 %571 }
 0x102   : > { %v5592_v48 = vmin.f32 %v740_v43, 15.0  ;;  %v5605_v56 = vmul.f32 %v626_v8, %v604_v63 }
 0x104   : > { %v8603_v43 = vceil.f32 %v5592_v48  ;;  %8874 = vst [vmem:[#allocation33_spill] sm:$0xff] %v5605_v56  ;;  %v764_v29 = vmul.f32 0.5, %v5605_v56 }
 0x106   : > { %1099 = vperm.xlu1 %4764, %v878_v45   ;;  %1104 = vperm.xlu2 %4765, %v879_v44   ;;  %v882_v45 = vsub.f32 %v8602_v55, %v5483_v17  ;;  %v599_v44 = vadd.f32 %v5388_v24, %v5336_v62  ;;  %v884_v3 = vsub.f32 %v8603_v43, %v5592_v48  ;;  %v780_v63 = vmax.f32 %v764_v29, 0.0 }
 0x107   : > { %v885_v62 = vsub.f32 %v8605_v5, %v5507_v23  ;;  %v607_v24 = vadd.f32 %v568_v41, %v5399_v52  ;;  %v8606_v17 = vceil.f32 %v5365_v7  ;;  %v610_v52 = vadd.f32 %v574_v25, %v5422_v28 }
 0x108   : > { %v632_v27 = vpop.permute.xlu2 %631  ;;  %v580_v15 = vpop.permute.xlu1 %579  ;;  %v5624_v5 = vmin.f32 %v780_v63, 15.0  ;;  %v8607_v28 = vceil.f32 %v5386_v22 }
 0x109   : > { %v5590_v46 = vpop.permute.xlu0 %577  ;;  %v613_v63 = vadd.f32 %v580_v15, %v5460_v9  ;;  %v8609_v15 = vceil.f32 %v5409_v32 }
 0x10e   : > { %1114 = vperm.xlu1 %4764, %v881_v50   ;;  %1119 = vperm.xlu2 %4765, %v882_v45  }
 0x110   : > { %v638_v54 = vpop.permute.xlu2 %637  ;;  %v618_v31 = vpop.permute.xlu1 %617 }
 0x111   : > { %v616_v18 = vpop.permute.xlu0 %615  ;;  %v5637_v29 = vmul.f32 %v638_v54, %v610_v52 }
 0x112   : > { %v5607_v39 = vmul.f32 %v616_v18, %v599_v44  ;;  %v5620_v44 = vmul.f32 %v632_v27, %v607_v24 }
 0x113   : > { %8879 = vst [vmem:[#allocation37_spill] sm:$0xff] %v5637_v29 }
 0x114   : > { %8875 = vst [vmem:[#allocation34_spill] sm:$0xff] %v5607_v39  ;;  %v759_v55 = vmul.f32 0.5, %v5607_v39  ;;  %v767_v41 = vmul.f32 0.5, %v5620_v44 }
 0x115   : > { %8876 = vst [vmem:[#allocation35_spill] sm:$0xff] %v5620_v44 }
 0x116   : > { %v775_v50 = vmax.f32 %v759_v55, 0.0  ;;  %1129 = vperm.xlu1 %4764, %v884_v3   ;;  %1134 = vperm.xlu2 %4765, %v885_v62   ;;  %v8877_v55 = vceil.f32 %v5303_v37  ;;  %v783_v24 = vmax.f32 %v767_v41, 0.0  ;;  %v770_v37 = vmul.f32 0.5, %v5637_v29 }
 0x118   : > { %v5618_v8 = vmin.f32 %v775_v50, 15.0  ;;  %v644_v18 = vpop.permute.xlu2 %643  ;;  %v624_v45 = vpop.permute.xlu1 %623  ;;  %v844_v50 = vfloor.f32 %v5624_v5  ;;  %v5641_v25 = vmin.f32 %v783_v24, 15.0  ;;  %v786_v52 = vmax.f32 %v770_v37, 0.0 }
 0x119   : > { %v600_v24 = vadd.f32 %v5513_v58, %v5281_v33 }
 0x11a   : > { %v839_v43 = vfloor.f32 %v5618_v8  ;;  %v5657_v9 = vmin.f32 %v786_v52, 15.0  ;;  %v8612_v52 = vceil.f32 %v5432_v51 }
 0x11c   : > { %1432 = vperm.xlu0 %4766, %v839_v43   ;;  %v5635_v62 = vsub.f32 %v5618_v8, %v839_v43  ;;  %v8880_v43 = vceil.f32 %v5324_v4 }
 0x11e   : > { %1176 = vperm.xlu1 %4764, %v8606_v17   ;;  %1181 = vperm.xlu2 %4765, %v8877_v55   ;;  %v5651_v55 = vmul.f32 %v644_v18, %v613_v63  ;;  %v847_v17 = vfloor.f32 %v5641_v25  ;;  %v8884_v18 = vceil.f32 %v5562_v12 }
 0x120   : > { %v5632_v3 = vpop.permute.xlu2 %957  ;;  %v630_v27 = vpop.permute.xlu1 %629  ;;  %8882 = vst [vmem:[#allocation39_spill] sm:$0xff] %v5651_v55  ;;  %v773_v4 = vmul.f32 0.5, %v5651_v55 }
 0x121   : > { %8878 = vst [vmem:[#allocation36_spill] sm:$0xff] %v5632_v3 }
 0x122   : > { %v789_v58 = vmax.f32 %v773_v4, 0.0 }
 0x124   : > { %1457 = vperm.xlu0 %4766, %v844_v50  }
 0x126   : > { %1191 = vperm.xlu1 %4764, %v8607_v28   ;;  %1196 = vperm.xlu2 %4765, %v8880_v43   ;;  %v5659_v28 = vmul.f32 %v618_v31, %v600_v24  ;;  %v850_v43 = vfloor.f32 %v5657_v9  ;;  %v603_v31 = vadd.f32 %v5537_v21, %v5295_v10 }
 0x128   : > { %v5649_v41 = vpop.permute.xlu2 %972  ;;  %v636_v54 = vpop.permute.xlu1 %635  ;;  %8883 = vst [vmem:[#allocation40_spill] sm:$0xff] %v5659_v28  ;;  %v760_v33 = vmul.f32 0.5, %v5659_v28 }
 0x129   : > { %8881 = vst [vmem:[#allocation38_spill] sm:$0xff] %v5649_v41  ;;  %v5673_v41 = vmin.f32 %v789_v58, 15.0 }
 0x12a   : > { %v776_v24 = vmax.f32 %v760_v33, 0.0  ;;  %v8614_v33 = vceil.f32 %v5473_v38 }
 0x12b   : > { %v853_v21 = vfloor.f32 %v5673_v41 }
 0x12c   : > { %1472 = vperm.xlu0 %4766, %v847_v17   ;;  %v5685_v3 = vmin.f32 %v776_v24, 15.0 }
 0x12e   : > { %1206 = vperm.xlu1 %4764, %v8609_v15   ;;  %1211 = vperm.xlu2 %4765, %v8884_v18   ;;  %v5675_v15 = vmul.f32 %v624_v45, %v603_v31  ;;  %v8886_v18 = vceil.f32 %v5579_v14  ;;  %v606_v45 = vadd.f32 %v5558_v40, %v5505_v49  ;;  %v8616_v24 = vceil.f32 %v5685_v3 }
 0x130   : > { %v5666_v63 = vpop.permute.xlu2 %982  ;;  %v642_v37 = vpop.permute.xlu1 %641  ;;  %v763_v10 = vmul.f32 0.5, %v5675_v15  ;;  %v5692_v31 = vmul.f32 %v630_v27, %v606_v45  ;;  %v5710_v27 = vsub.f32 %v5657_v9, %v850_v43 }
 0x131   : > { %8885 = vst [vmem:[#allocation41_spill] sm:$0xff] %v5666_v63 }
 0x132   : > { %v779_v58 = vmax.f32 %v763_v10, 0.0  ;;  %8888 = vst [vmem:[#allocation43_spill] sm:$0xff] %v5692_v31  ;;  %v766_v45 = vmul.f32 0.5, %v5692_v31 }
 0x134   : > { %1487 = vperm.xlu0 %4766, %v850_v43   ;;  %v5712_v10 = vmin.f32 %v779_v58, 15.0 }
 0x136   : > { %1221 = vperm.xlu1 %4764, %v8612_v52   ;;  %1226 = vperm.xlu2 %4765, %v8886_v18   ;;  %v8889_v18 = vceil.f32 %v5592_v48  ;;  %v5700_v52 = vsub.f32 %v5624_v5, %v844_v50  ;;  %v5719_v50 = vsub.f32 %v5673_v41, %v853_v21  ;;  %v8620_v58 = vceil.f32 %v5712_v10 }
 0x138   : > { %v5681_v4 = vpop.permute.xlu2 %997  ;;  %v5683_v63 = vpop.permute.xlu1 %952 }
 0x139   : > { %8887 = vst [vmem:[#allocation42_spill] sm:$0xff] %v5681_v4  ;;  %v5703_v4 = vsub.f32 %v5641_v25, %v847_v17  ;;  %v609_v17 = vadd.f32 %v5577_v1, %v5528_v13 }
 0x13b   : > { %v5724_v43 = vmul.f32 %v636_v54, %v609_v17  ;;  %v907_v54 = vsub.f32 %v8620_v58, %v5712_v10 }
 0x13c   : > { %1502 = vperm.xlu0 %4766, %v853_v21  }
 0x13d   : > { %8892 = vst [vmem:[#allocation46_spill] sm:$0xff] %v5724_v43  ;;  %v769_v1 = vmul.f32 0.5, %v5724_v43 }
 0x13e   : > { %1236 = vperm.xlu1 %4764, %v8614_v33   ;;  %1241 = vperm.xlu2 %4765, %v8889_v18   ;;  %v904_v18 = vsub.f32 %v8616_v24, %v5685_v3  ;;  %v8618_v33 = vceil.f32 %v5502_v16 }
 0x140   : > { %v5705_v40 = vpop.permute.xlu2 %1012  ;;  %v5707_v49 = vpop.permute.xlu1 %967 }
 0x141   : > { %8890 = vst [vmem:[#allocation44_spill] sm:$0xff] %v5705_v40  ;;  %v782_v40 = vmax.f32 %v766_v45, 0.0  ;;  %v612_v45 = vadd.f32 %v5590_v46, %v5549_v19 }
 0x142   : > { %8891 = vst [vmem:[#allocation45_spill] sm:$0xff] %v5707_v49  ;;  %v8621_v49 = vfloor.f32 %v5522_v20 }
 0x143   : > { %v5735_v13 = vmin.f32 %v782_v40, 15.0  ;;  %v5746_v17 = vmul.f32 %v642_v37, %v612_v45 }
 0x144   : > { %1549 = vperm.xlu0 %4766, %v904_v18   ;;  %v785_v18 = vmax.f32 %v769_v1, 0.0  ;;  %v622_v1 = vpop.permute.xlu0 %621 }
 0x145   : > { %8895 = vst [vmem:[#allocation49_spill] sm:$0xff] %v5746_v17  ;;  %v8622_v40 = vceil.f32 %v5735_v13  ;;  %v772_v46 = vmul.f32 0.5, %v5746_v17 }
 0x146   : > { %1251 = vperm.xlu1 %4764, %v8618_v33   ;;  %1288 = vperm.xlu2 %4765, %v5428_v59   ;;  %v889_v59 = vsub.f32 %v5522_v20, %v8621_v49  ;;  %v5754_v58 = vmin.f32 %v785_v18, 15.0 }
 0x147   : > { %v910_v19 = vsub.f32 %v8622_v40, %v5735_v13  ;;  %v788_v37 = vmax.f32 %v772_v46, 0.0 }
 0x148   : > { %v5730_v24 = vpop.permute.xlu2 %1027  ;;  %v5732_v21 = vpop.permute.xlu1 %977 }
 0x149   : > { %8893 = vst [vmem:[#allocation47_spill] sm:$0xff] %v5730_v24 }
 0x14a   : > { %8894 = vst [vmem:[#allocation48_spill] sm:$0xff] %v5732_v21 }
 0x14c   : > { %1564 = vperm.xlu0 %4766, %v907_v54   ;;  %v628_v49 = vpop.permute.xlu0 %627 }
 0x14e   : > { %1298 = vperm.xlu1 %4764, %v889_v59   ;;  %1303 = vperm.xlu2 %4765, %v5435_v6   ;;  %v8624_v6 = vceil.f32 %v5754_v58  ;;  %v5767_v59 = vmin.f32 %v788_v37, 15.0  ;;  %v601_v37 = vadd.f32 %v5511_v57, %v5446_v36 }
 0x150   : > { %v5750_v33 = vpop.permute.xlu2 %1074  ;;  %v5752_v24 = vpop.permute.xlu1 %992  ;;  %v913_v18 = vsub.f32 %v8624_v6, %v5754_v58 }
 0x151   : > { %8896 = vst [vmem:[#allocation50_spill] sm:$0xff] %v5750_v33 }
 0x152   : > { %8897 = vst [vmem:[#allocation51_spill] sm:$0xff] %v5752_v24  ;;  %v8640_v24 = vfloor.f32 %v5712_v10 }
 0x154   : > { %1579 = vperm.xlu0 %4766, %v910_v19  }
 0x156   : > { %1313 = vperm.xlu1 %4764, %v5452_v47   ;;  %1318 = vperm.xlu2 %4765, %v5464_v42   ;;  %v8623_v47 = vceil.f32 %v5767_v59  ;;  %v602_v42 = vadd.f32 %v5411_v0, %v5351_v2  ;;  %v605_v0 = vadd.f32 %v5441_v11, %v5374_v35  ;;  %v8906_v11 = vld [vmem:[#allocation30_spill] sm:$0xff] }
 0x158   : > { %v5763_v54 = vpop.permute.xlu2 %1089  ;;  %v5765_v45 = vpop.permute.xlu1 %1007  ;;  %v5783_v40 = vmul.f32 %v622_v1, %v602_v42  ;;  %v5801_v42 = vmul.f32 %v628_v49, %v605_v0 }
 0x159   : > { %8898 = vst [vmem:[#allocation52_spill] sm:$0xff] %v5763_v54 }
 0x15a   : > { %8899 = vst [vmem:[#allocation53_spill] sm:$0xff] %v5765_v45  ;;  %v762_v2 = vmul.f32 0.5, %v5783_v40  ;;  %v765_v35 = vmul.f32 0.5, %v5801_v42 }
 0x15b   : > { %8905 = vst [vmem:[#allocation59_spill] sm:$0xff] %v5801_v42 }
 0x15c   : > { %1594 = vperm.xlu0 %4766, %v913_v18   ;;  %v778_v18 = vmax.f32 %v762_v2, 0.0 }
 0x15e   : > { %1328 = vperm.xlu1 %4764, %v5469_v60   ;;  %1333 = vperm.xlu2 %4765, %v5476_v26   ;;  %v916_v60 = vsub.f32 %v8623_v47, %v5767_v59  ;;  %v5789_v26 = vmul.f32 %v5554_v61, %v601_v37  ;;  %v8626_v61 = vceil.f32 %v5618_v8  ;;  %v634_v37 = vpop.permute.xlu0 %633  ;;  %v8908_v47 = vld [vmem:[#allocation27_spill] sm:$0xff] }
 0x160   : > { %v5777_v46 = vpop.permute.xlu2 %1104  ;;  %v5779_v19 = vpop.permute.xlu1 %1022  ;;  %8902 = vst [vmem:[#allocation56_spill] sm:$0xff] %v5789_v26  ;;  %v761_v1 = vmul.f32 0.5, %v5789_v26 }
 0x161   : > { %8900 = vst [vmem:[#allocation54_spill] sm:$0xff] %v5777_v46 }
 0x162   : > { %8901 = vst [vmem:[#allocation55_spill] sm:$0xff] %v5779_v19  ;;  %v781_v19 = vmax.f32 %v765_v35, 0.0 }
 0x164   : > { %1609 = vperm.xlu0 %4766, %v916_v60   ;;  %v8907_v60 = vld [vmem:[#allocation22_spill] sm:$0xff] }
 0x165   : > { %v608_v2 = vadd.f32 %v8908_v47, %v8907_v60  ;;  %v5826_v47 = vmin.f32 %v781_v19, 15.0 }
 0x166   : > { %1343 = vperm.xlu1 %4764, %v5497_v30   ;;  %1348 = vperm.xlu2 %4765, %v5500_v53   ;;  %v777_v30 = vmax.f32 %v761_v1, 0.0  ;;  %v5806_v53 = vmin.f32 %v778_v18, 15.0 }
 0x167   : > { %v8635_v45 = vceil.f32 %v5826_v47 }
 0x168   : > { %v5796_v36 = vpop.permute.xlu2 %1119  ;;  %v5798_v57 = vpop.permute.xlu1 %1069  ;;  %v5817_v6 = vmin.f32 %v777_v30, 15.0  ;;  %v8628_v1 = vceil.f32 %v5806_v53  ;;  %v8914_v30 = vld [vmem:[#allocation7_spill] sm:$0xff]  ;;  %v8638_v46 = vfloor.f32 %v5806_v53 }
 0x169   : > { %8903 = vst [vmem:[#allocation57_spill] sm:$0xff] %v5796_v36 }
 0x16a   : > { %8904 = vst [vmem:[#allocation58_spill] sm:$0xff] %v5798_v57  ;;  %v841_v18 = vfloor.f32 %v5817_v6  ;;  %v9047_v57 = vld [vmem:[#allocation25_spill] sm:$0xff] }
 0x16c   : > { %1656 = vperm.xlu0 %4766, %v8626_v61   ;;  %v5819_v61 = vmul.f32 %v634_v37, %v608_v2  ;;  %v8913_v37 = vld [vmem:[#allocation12_spill] sm:$0xff] }
 0x16d   : > { %v611_v35 = vadd.f32 %v8914_v30, %v8913_v37 }
 0x16e   : > { %1358 = vperm.xlu1 %4764, %v5525_v34   ;;  %1363 = vperm.xlu2 %4765, %v8906_v11   ;;  %8911 = vst [vmem:[#allocation27_spill] sm:$0xff] %v5819_v61  ;;  %v640_v34 = vpop.permute.xlu0 %639  ;;  %v8633_v11 = vfloor.f32 %v5685_v3  ;;  %v768_v60 = vmul.f32 0.5, %v5819_v61 }
 0x16f   : > { %v5839_v19 = vmul.f32 %v640_v34, %v611_v35  ;;  %v8918_v34 = vld [vmem:[#allocation13_spill] sm:$0xff] }
 0x170   : > { %v5813_v49 = vpop.permute.xlu2 %1134  ;;  %v5815_v0 = vpop.permute.xlu1 %1084  ;;  %v784_v36 = vmax.f32 %v768_v60, 0.0  ;;  %v8919_v60 = vld [vmem:[#allocation31_spill] sm:$0xff] }
 0x171   : > { %8909 = vst [vmem:[#allocation30_spill] sm:$0xff] %v5813_v49  ;;  %v8912_v49 = vmov 1   ;;  %v771_v37 = vmul.f32 0.5, %v5839_v19  ;;  %v614_v35 = vadd.f32 %v8919_v60, %v8918_v34 }
 0x172   : > { %8910 = vst [vmem:[#allocation22_spill] sm:$0xff] %v5815_v0  ;;  %v8644_v0 = vfloor.f32 %v5735_v13 }
 0x173   : > { %8917 = vst [vmem:[#allocation60_spill] sm:$0xff] %v5839_v19  ;;  %v787_v54 = vmax.f32 %v771_v37, 0.0 }
 0x174   : > { %1671 = vperm.xlu0 %4766, %v8628_v1  }
 0x176   : > { %4767 = vset.pattern.permute.xlu1 %v8912_v49  ;;  %4768 = vset.pattern.permute.xlu2 %v8912_v49  ;;  %v646_v30 = vpop.permute.xlu0 %645 }
 0x177   : > { %1442 = vperm.xlu2 %4768, %v841_v18   ;;  %1437 = vperm.xlu1 %4767, %v8633_v11   ;;  %v5846_v11 = vmin.f32 %v784_v36, 15.0  ;;  %v5859_v21 = vmul.f32 %v646_v30, %v614_v35 }
 0x178   : > { %v5835_v2 = vpop.permute.xlu2 %1181  ;;  %v5837_v1 = vpop.permute.xlu1 %1099 }
 0x179   : > { %8915 = vst [vmem:[#allocation12_spill] sm:$0xff] %v5835_v2  ;;  %v8641_v36 = vceil.f32 %v5846_v11  ;;  %v774_v34 = vmul.f32 0.5, %v5859_v21 }
 0x17a   : > { %8916 = vst [vmem:[#allocation7_spill] sm:$0xff] %v5837_v1 }
 0x17b   : > { %8922 = vst [vmem:[#allocation61_spill] sm:$0xff] %v5859_v21  ;;  %v790_v60 = vmax.f32 %v774_v34, 0.0 }
 0x17c   : > { %1686 = vperm.xlu0 %4766, %v8635_v45  }
 0x17f   : > { %1447 = vperm.xlu1 %4767, %v8638_v46   ;;  %1452 = vperm.xlu2 %4768, %v8640_v24   ;;  %v8643_v46 = vfloor.f32 %v5826_v47  ;;  %v5866_v24 = vmin.f32 %v787_v54, 15.0  ;;  %v8649_v54 = vfloor.f32 %v5846_v11 }
 0x180   : > { %v5855_v1 = vpop.permute.xlu2 %1196  ;;  %v5857_v45 = vpop.permute.xlu1 %1114 }
 0x181   : > { %8920 = vst [vmem:[#allocation13_spill] sm:$0xff] %v5855_v1  ;;  %v8645_v35 = vceil.f32 %v5866_v24  ;;  %v8929_v1 = vceil.f32 %v5618_v8 }
 0x182   : > { %8921 = vst [vmem:[#allocation31_spill] sm:$0xff] %v5857_v45  ;;  %v5882_v45 = vmin.f32 %v790_v60, 15.0  ;;  %v8656_v60 = vfloor.f32 %v5866_v24 }
 0x183   : > { %v903_v33 = vsub.f32 %v8929_v1, %v5618_v8  ;;  %v8932_v8 = vceil.f32 %v5806_v53 }
 0x184   : > { %1701 = vperm.xlu0 %4766, %v8641_v36   ;;  %v8648_v36 = vfloor.f32 %v5754_v58 }
 0x185   : > { %v906_v1 = vsub.f32 %v8932_v8, %v5806_v53 }
 0x187   : > { %1462 = vperm.xlu1 %4767, %v8643_v46   ;;  %1467 = vperm.xlu2 %4768, %v8644_v0  }
 0x188   : > { %v5873_v37 = vpop.permute.xlu2 %1211  ;;  %v5875_v30 = vpop.permute.xlu1 %1129 }
 0x189   : > { %8923 = vst [vmem:[#allocation62_spill] sm:$0xff] %v5873_v37 }
 0x18a   : > { %8924 = vst [vmem:[#allocation63_spill] sm:$0xff] %v5875_v30  ;;  %v8655_v30 = vfloor.f32 %v5767_v59 }
 0x18c   : > { %1716 = vperm.xlu0 %4766, %v8645_v35   ;;  %v8651_v35 = vceil.f32 %v5882_v45 }
 0x18e   : > { %v5884_v46 = vpop.permute.xlu0 %1432 }
 0x18f   : > { %1477 = vperm.xlu1 %4767, %v8649_v54   ;;  %1482 = vperm.xlu2 %4768, %v8648_v36  }
 0x190   : > { %v5890_v34 = vpop.permute.xlu2 %1226  ;;  %v5892_v0 = vpop.permute.xlu1 %1176 }
 0x191   : > { %8925 = vst [vmem:[#allocation64_spill] sm:$0xff] %v5890_v34  ;;  %v921_v34 = vsub.f32 %v5817_v6, %v841_v18 }
 0x194   : > { %1731 = vperm.xlu0 %4766, %v8651_v35   ;;  %v8660_v35 = vfloor.f32 %v5882_v45 }
 0x196   : > { %v5899_v37 = vpop.permute.xlu0 %1457 }
 0x197   : > { %8926 = vst [vmem:[#allocation65_spill] sm:$0xff] %v5899_v37  ;;  %1492 = vperm.xlu1 %4767, %v8656_v60   ;;  %1497 = vperm.xlu2 %4768, %v8655_v30   ;;  %v3389_v30 = vmul.f32 0.125, %v5783_v40  ;;  %v3390_v60 = vmul.f32 0.125, %v5675_v15 }
 0x198   : > { %v5905_v36 = vpop.permute.xlu2 %1241  ;;  %v5907_v54 = vpop.permute.xlu1 %1191 }
 0x199   : > { %8927 = vst [vmem:[#allocation66_spill] sm:$0xff] %v5905_v36  ;;  %v3406_v2 = vmax.f32 %v3390_v60, 0.0 }
 0x19a   : > { %8928 = vst [vmem:[#allocation67_spill] sm:$0xff] %v5907_v54  ;;  %v3405_v54 = vmax.f32 %v3389_v30, 0.0 }
 0x19c   : > { %1778 = vperm.xlu0 %4766, %v921_v34   ;;  %v8663_v34 = vceil.f32 %v5817_v6 }
 0x19e   : > { %v5914_v37 = vpop.permute.xlu0 %1472 }
 0x19f   : > { %8930 = vst [vmem:[#allocation68_spill] sm:$0xff] %v5914_v37  ;;  %1507 = vperm.xlu1 %4767, %v8660_v35   ;;  %1544 = vperm.xlu2 %4768, %v903_v33   ;;  %v905_v33 = vsub.f32 %v8663_v34, %v5817_v6  ;;  %v5934_v37 = vmin.f32 %v3405_v54, 3.0 }
 0x1a0   : > { %v5920_v36 = vpop.permute.xlu2 %1288  ;;  %v5922_v18 = vpop.permute.xlu1 %1206 }
 0x1a1   : > { %8931 = vst [vmem:[#allocation69_spill] sm:$0xff] %v5922_v18  ;;  %v5936_v18 = vmin.f32 %v3406_v2, 3.0  ;;  %v8668_v8 = vfloor.f32 %v5934_v37 }
 0x1a2   : > { %8934 = vst [vmem:[#allocation71_spill] sm:$0xff] %v5934_v37 }
 0x1a3   : > { %8935 = vst [vmem:[#allocation72_spill] sm:$0xff] %v5936_v18  ;;  %v8669_v34 = vfloor.f32 %v5936_v18 }
 0x1a4   : > { %1793 = vperm.xlu0 %4766, %v5700_v52   ;;  %v8666_v52 = vceil.f32 %v5624_v5 }
 0x1a6   : > { %v5932_v35 = vpop.permute.xlu0 %1487  ;;  %v908_v2 = vsub.f32 %v8666_v52, %v5624_v5  ;;  %v8674_v52 = vceil.f32 %v5641_v25 }
 0x1a7   : > { %8933 = vst [vmem:[#allocation70_spill] sm:$0xff] %v5932_v35  ;;  %1554 = vperm.xlu1 %4767, %v905_v33   ;;  %1559 = vperm.xlu2 %4768, %v906_v1   ;;  %v8938_v33 = vceil.f32 %v5826_v47  ;;  %v5957_v35 = vsub.f32 %v5934_v37, %v8668_v8 }
 0x1a8   : > { %v5938_v30 = vpop.permute.xlu2 %1303  ;;  %v5940_v60 = vpop.permute.xlu1 %1221 }
 0x1a9   : > { %8936 = vst [vmem:[#allocation73_spill] sm:$0xff] %v5938_v30  ;;  %v909_v1 = vsub.f32 %v8938_v33, %v5826_v47 }
 0x1aa   : > { %8937 = vst [vmem:[#allocation74_spill] sm:$0xff] %v5940_v60 }
 0x1ab   : > { %8940 = vst [vmem:[#allocation76_spill] sm:$0xff] %v5957_v35  ;;  %v911_v35 = vsub.f32 %v8674_v52, %v5641_v25 }
 0x1ac   : > { %1808 = vperm.xlu0 %4766, %v5703_v4   ;;  %v5962_v4 = vsub.f32 %v5936_v18, %v8669_v34  ;;  %v2147_v34 = vmul.f32 0.25, %v5789_v26 }
 0x1ae   : > { %v5952_v54 = vpop.permute.xlu0 %1502  ;;  %8941 = vst [vmem:[#allocation77_spill] sm:$0xff] %v5962_v4  ;;  %v2163_v18 = vmax.f32 %v2147_v34, 0.0 }
 0x1af   : > { %8939 = vst [vmem:[#allocation75_spill] sm:$0xff] %v5952_v54  ;;  %1569 = vperm.xlu1 %4767, %v908_v2   ;;  %1574 = vperm.xlu2 %4768, %v909_v1   ;;  %v8944_v54 = vceil.f32 %v5846_v11 }
 0x1b0   : > { %v5964_v60 = vpop.permute.xlu2 %1318  ;;  %v5966_v33 = vpop.permute.xlu1 %1236  ;;  %v5991_v26 = vmin.f32 %v2163_v18, 7.0  ;;  %v8952_v18 = vceil.f32 %v5882_v45 }
 0x1b1   : > { %8942 = vst [vmem:[#allocation78_spill] sm:$0xff] %v5964_v60  ;;  %v912_v8 = vsub.f32 %v8944_v54, %v5846_v11  ;;  %v8948_v54 = vceil.f32 %v5866_v24 }
 0x1b2   : > { %8943 = vst [vmem:[#allocation79_spill] sm:$0xff] %v5966_v33 }
 0x1b3   : > { %v915_v37 = vsub.f32 %v8948_v54, %v5866_v24  ;;  %v8682_v54 = vfloor.f32 %v5991_v26 }
 0x1b4   : > { %1823 = vperm.xlu0 %4766, %v5710_v27   ;;  %v8678_v27 = vceil.f32 %v5657_v9 }
 0x1b6   : > { %v5977_v2 = vpop.permute.xlu0 %1549  ;;  %v914_v52 = vsub.f32 %v8678_v27, %v5657_v9  ;;  %v918_v27 = vsub.f32 %v8952_v18, %v5882_v45 }
 0x1b7   : > { %8945 = vst [vmem:[#allocation80_spill] sm:$0xff] %v5977_v2  ;;  %1584 = vperm.xlu1 %4767, %v911_v35   ;;  %1589 = vperm.xlu2 %4768, %v912_v8   ;;  %v2152_v35 = vmul.f32 0.25, %v5692_v31  ;;  %v2155_v31 = vmul.f32 0.25, %v5724_v43  ;;  %v8957_v43 = vceil.f32 %v5685_v3 }
 0x1b8   : > { %v5979_v1 = vpop.permute.xlu2 %1333  ;;  %v5981_v4 = vpop.permute.xlu1 %1251 }
 0x1b9   : > { %8946 = vst [vmem:[#allocation81_spill] sm:$0xff] %v5979_v1  ;;  %v2168_v33 = vmax.f32 %v2152_v35, 0.0 }
 0x1ba   : > { %8947 = vst [vmem:[#allocation82_spill] sm:$0xff] %v5981_v4 }
 0x1bc   : > { %1838 = vperm.xlu0 %4766, %v5719_v50   ;;  %v8684_v50 = vceil.f32 %v5673_v41 }
 0x1be   : > { %v5994_v8 = vpop.permute.xlu0 %1564 }
 0x1bf   : > { %8949 = vst [vmem:[#allocation83_spill] sm:$0xff] %v5994_v8  ;;  %1599 = vperm.xlu1 %4767, %v914_v52   ;;  %1604 = vperm.xlu2 %4768, %v915_v37   ;;  %v917_v37 = vsub.f32 %v8684_v50, %v5673_v41  ;;  %v6010_v52 = vmin.f32 %v2168_v33, 7.0  ;;  %v2158_v33 = vmul.f32 0.25, %v5746_v17 }
 0x1c0   : > { %v5996_v4 = vpop.permute.xlu2 %1348  ;;  %v5998_v34 = vpop.permute.xlu1 %1298 }
 0x1c1   : > { %8950 = vst [vmem:[#allocation84_spill] sm:$0xff] %v5996_v4  ;;  %v8688_v60 = vfloor.f32 %v6010_v52 }
 0x1c2   : > { %8951 = vst [vmem:[#allocation85_spill] sm:$0xff] %v5998_v34 }
 0x1c4   : > { %2737 = vperm.xlu0 %4766, %v8682_v54   ;;  %v2171_v54 = vmax.f32 %v2155_v31, 0.0 }
 0x1c6   : > { %v6013_v4 = vpop.permute.xlu0 %1579  ;;  %v6022_v18 = vmin.f32 %v2171_v54, 7.0 }
 0x1c7   : > { %8953 = vst [vmem:[#allocation86_spill] sm:$0xff] %v6013_v4  ;;  %1614 = vperm.xlu1 %4767, %v917_v37   ;;  %1619 = vperm.xlu2 %4768, %v918_v27   ;;  %v8958_v27 = vceil.f32 %v5817_v6  ;;  %v2174_v4 = vmax.f32 %v2158_v33, 0.0  ;;  %v8963_v6 = vceil.f32 %v5624_v5  ;;  %v8966_v5 = vceil.f32 %v5735_v13 }
 0x1c8   : > { %v6015_v35 = vpop.permute.xlu2 %1363  ;;  %v6017_v1 = vpop.permute.xlu1 %1313  ;;  %v8693_v54 = vfloor.f32 %v6022_v18 }
 0x1c9   : > { %8954 = vst [vmem:[#allocation87_spill] sm:$0xff] %v6015_v35  ;;  %v2145_v35 = vmul.f32 0.25, %v5607_v39  ;;  %v6039_v17 = vmin.f32 %v2174_v4, 7.0 }
 0x1ca   : > { %8955 = vst [vmem:[#allocation88_spill] sm:$0xff] %v6017_v1 }
 0x1cc   : > { %2762 = vperm.xlu0 %4766, %v8688_v60   ;;  %v2161_v60 = vmax.f32 %v2145_v35, 0.0  ;;  %v8696_v35 = vfloor.f32 %v6039_v17 }
 0x1ce   : > { %v6025_v50 = vpop.permute.xlu0 %1594  ;;  %v6051_v33 = vmin.f32 %v2161_v60, 7.0 }
 0x1cf   : > { %8956 = vst [vmem:[#allocation89_spill] sm:$0xff] %v6025_v50  ;;  %1661 = vperm.xlu1 %4767, %v8957_v43   ;;  %1666 = vperm.xlu2 %4768, %v8958_v27   ;;  %v8962_v43 = vceil.f32 %v5712_v10 }
 0x1d0   : > { %v6031_v37 = vpop.permute.xlu1 %1328 }
 0x1d1   : > { %8959 = vst [vmem:[#allocation90_spill] sm:$0xff] %v6031_v37  ;;  %v6033_v31 = vpop.permute.xlu2 %1442  ;;  %v2148_v37 = vmul.f32 0.25, %v5783_v40 }
 0x1d2   : > { %8960 = vst [vmem:[#allocation91_spill] sm:$0xff] %v6033_v31 }
 0x1d3   : > { %v2164_v4 = vmax.f32 %v2148_v37, 0.0 }
 0x1d4   : > { %2777 = vperm.xlu0 %4766, %v8693_v54  }
 0x1d5   : > { %v6068_v40 = vmin.f32 %v2164_v4, 7.0 }
 0x1d6   : > { %v6041_v50 = vpop.permute.xlu0 %1609 }
 0x1d7   : > { %8961 = vst [vmem:[#allocation92_spill] sm:$0xff] %v6041_v50  ;;  %1676 = vperm.xlu1 %4767, %v8962_v43   ;;  %1681 = vperm.xlu2 %4768, %v8963_v6   ;;  %v8700_v43 = vceil.f32 %v6051_v33  ;;  %v8967_v6 = vceil.f32 %v5641_v25  ;;  %v8971_v25 = vceil.f32 %v5754_v58 }
 0x1d8   : > { %v6047_v27 = vpop.permute.xlu1 %1343 }
 0x1d9   : > { %8964 = vst [vmem:[#allocation93_spill] sm:$0xff] %v6047_v27  ;;  %v6049_v39 = vpop.permute.xlu2 %1452  ;;  %v2151_v27 = vmul.f32 0.25, %v5801_v42  ;;  %v2289_v37 = vsub.f32 %v8700_v43, %v6051_v33  ;;  %v2154_v43 = vmul.f32 0.25, %v5819_v61 }
 0x1da   : > { %8965 = vst [vmem:[#allocation94_spill] sm:$0xff] %v6049_v39 }
 0x1dc   : > { %2792 = vperm.xlu0 %4766, %v8696_v35   ;;  %v2167_v35 = vmax.f32 %v2151_v27, 0.0 }
 0x1de   : > { %v6057_v54 = vpop.permute.xlu0 %1656  ;;  %v6085_v42 = vmin.f32 %v2167_v35, 7.0 }
 0x1df   : > { %1691 = vperm.xlu1 %4767, %v8966_v5   ;;  %1696 = vperm.xlu2 %4768, %v8967_v6   ;;  %v8704_v5 = vceil.f32 %v6068_v40  ;;  %v8972_v6 = vceil.f32 %v5657_v9  ;;  %v8975_v9 = vceil.f32 %v5767_v59 }
 0x1e0   : > { %v6064_v60 = vpop.permute.xlu1 %1358 }
 0x1e1   : > { %8968 = vst [vmem:[#allocation95_spill] sm:$0xff] %v6064_v60  ;;  %v6066_v50 = vpop.permute.xlu2 %1467  ;;  %v2292_v27 = vsub.f32 %v8704_v5, %v6068_v40  ;;  %v2157_v5 = vmul.f32 0.25, %v5839_v19 }
 0x1e2   : > { %8969 = vst [vmem:[#allocation96_spill] sm:$0xff] %v6066_v50 }
 0x1e4   : > { %2823 = vperm.xlu0 %4766, %v2289_v37   ;;  %v2170_v37 = vmax.f32 %v2154_v43, 0.0 }
 0x1e6   : > { %v6074_v1 = vpop.permute.xlu0 %1671  ;;  %v6102_v61 = vmin.f32 %v2170_v37, 7.0 }
 0x1e7   : > { %8970 = vst [vmem:[#allocation97_spill] sm:$0xff] %v6074_v1  ;;  %1706 = vperm.xlu1 %4767, %v8971_v25   ;;  %1711 = vperm.xlu2 %4768, %v8972_v6   ;;  %v8708_v25 = vceil.f32 %v6085_v42  ;;  %v8976_v6 = vceil.f32 %v5673_v41 }
 0x1e9   : > { %v6081_v4 = vpop.permute.xlu2 %1482  ;;  %v6083_v60 = vpop.permute.xlu1 %1437  ;;  %v2295_v43 = vsub.f32 %v8708_v25, %v6085_v42 }
 0x1ea   : > { %8973 = vst [vmem:[#allocation98_spill] sm:$0xff] %v6081_v4 }
 0x1ec   : > { %2838 = vperm.xlu0 %4766, %v2292_v27   ;;  %v8979_v27 = vfloor.f32 %v5685_v3 }
 0x1ee   : > { %v6091_v50 = vpop.permute.xlu0 %1686 }
 0x1ef   : > { %8974 = vst [vmem:[#allocation99_spill] sm:$0xff] %v6091_v50  ;;  %1721 = vperm.xlu1 %4767, %v8975_v9   ;;  %1726 = vperm.xlu2 %4768, %v8976_v6   ;;  %v920_v9 = vsub.f32 %v5685_v3, %v8979_v27  ;;  %v2173_v50 = vmax.f32 %v2157_v5, 0.0  ;;  %v8712_v6 = vceil.f32 %v6102_v61  ;;  %v8982_v5 = vfloor.f32 %v5806_v53 }
 0x1f1   : > { %v6098_v35 = vpop.permute.xlu2 %1497  ;;  %v6100_v4 = vpop.permute.xlu1 %1447  ;;  %v2298_v3 = vsub.f32 %v8712_v6, %v6102_v61  ;;  %v922_v27 = vsub.f32 %v5806_v53, %v8982_v5  ;;  %v8988_v5 = vfloor.f32 %v5735_v13 }
 0x1f2   : > { %8977 = vst [vmem:[#allocation100_spill] sm:$0xff] %v6098_v35  ;;  %v6119_v35 = vmin.f32 %v2173_v50, 7.0 }
 0x1f3   : > { %8978 = vst [vmem:[#allocation101_spill] sm:$0xff] %v6100_v4  ;;  %v2149_v4 = vmul.f32 0.25, %v5675_v15 }
 0x1f4   : > { %2853 = vperm.xlu0 %4766, %v2295_v43   ;;  %v2160_v43 = vmul.f32 0.25, %v5859_v21  ;;  %v8713_v50 = vceil.f32 %v6119_v35 }
 0x1f6   : > { %v6111_v41 = vpop.permute.xlu0 %1701  ;;  %v2176_v25 = vmax.f32 %v2160_v43, 0.0  ;;  %v2301_v53 = vsub.f32 %v8713_v50, %v6119_v35 }
 0x1f7   : > { %8980 = vst [vmem:[#allocation102_spill] sm:$0xff] %v6111_v41  ;;  %1768 = vperm.xlu1 %4767, %v5635_v62   ;;  %1773 = vperm.xlu2 %4768, %v920_v9   ;;  %v8983_v62 = vfloor.f32 %v5712_v10 }
 0x1f9   : > { %v6115_v37 = vpop.permute.xlu2 %1544  ;;  %v6117_v19 = vpop.permute.xlu1 %1462  ;;  %v923_v9 = vsub.f32 %v5712_v10, %v8983_v62  ;;  %v8987_v10 = vfloor.f32 %v5826_v47 }
 0x1fa   : > { %8981 = vst [vmem:[#allocation103_spill] sm:$0xff] %v6117_v19 }
 0x1fb   : > { %v925_v43 = vsub.f32 %v5826_v47, %v8987_v10  ;;  %v8992_v47 = vfloor.f32 %v5846_v11 }
 0x1fc   : > { %2868 = vperm.xlu0 %4766, %v2298_v3   ;;  %v6138_v3 = vmin.f32 %v2176_v25, 7.0 }
 0x1fd   : > { %v928_v10 = vsub.f32 %v5846_v11, %v8992_v47  ;;  %v8999_v47 = vfloor.f32 %v5767_v59 }
 0x1fe   : > { %v6131_v41 = vpop.permute.xlu0 %1716 }
 0x1ff   : > { %8984 = vst [vmem:[#allocation104_spill] sm:$0xff] %v6131_v41  ;;  %1783 = vperm.xlu1 %4767, %v922_v27   ;;  %1788 = vperm.xlu2 %4768, %v923_v9   ;;  %v926_v27 = vsub.f32 %v5735_v13, %v8988_v5  ;;  %v8715_v9 = vceil.f32 %v6138_v3  ;;  %v8993_v13 = vfloor.f32 %v5754_v58  ;;  %v8720_v41 = vceil.f32 %v5991_v26 }
 0x201   : > { %v6134_v21 = vpop.permute.xlu2 %1559  ;;  %v6136_v19 = vpop.permute.xlu1 %1477  ;;  %v929_v5 = vsub.f32 %v5754_v58, %v8993_v13  ;;  %v8998_v58 = vfloor.f32 %v5866_v24 }
 0x202   : > { %8985 = vst [vmem:[#allocation105_spill] sm:$0xff] %v6134_v21 }
 0x203   : > { %8986 = vst [vmem:[#allocation106_spill] sm:$0xff] %v6136_v19  ;;  %v931_v11 = vsub.f32 %v5866_v24, %v8998_v58  ;;  %v9005_v58 = vld [vmem:[#allocation19_spill] sm:$0xff] }
 0x204   : > { %2883 = vperm.xlu0 %4766, %v2301_v53   ;;  %v2304_v53 = vsub.f32 %v8715_v9, %v6138_v3  ;;  %v8997_v9 = vld [vmem:[#allocation18_spill] sm:$0xff]  ;;  %v2100_v19 = vmul.f32 0.25, %v9005_v58 }
 0x206   : > { %v6149_v62 = vpop.permute.xlu0 %1731 }
 0x207   : > { %8989 = vst [vmem:[#allocation107_spill] sm:$0xff] %v6149_v62  ;;  %1798 = vperm.xlu1 %4767, %v925_v43   ;;  %1803 = vperm.xlu2 %4768, %v926_v27   ;;  %v2150_v43 = vmul.f32 0.25, %v5605_v56  ;;  %v2153_v56 = vmul.f32 0.25, %v5620_v44 }
 0x209   : > { %v6152_v25 = vpop.permute.xlu2 %1574  ;;  %v6154_v6 = vpop.permute.xlu1 %1492 }
 0x20a   : > { %8990 = vst [vmem:[#allocation108_spill] sm:$0xff] %v6152_v25 }
 0x20b   : > { %8991 = vst [vmem:[#allocation109_spill] sm:$0xff] %v6154_v6  ;;  %v2166_v6 = vmax.f32 %v2150_v43, 0.0  ;;  %v9001_v43 = vld [vmem:[#allocation10_spill] sm:$0xff] }
 0x20c   : > { %2898 = vperm.xlu0 %4766, %v2304_v53   ;;  %v2097_v53 = vmul.f32 0.25, %v8997_v9 }
 0x20e   : > { %v6166_v27 = vpop.permute.xlu0 %1778  ;;  %v2113_v13 = vmax.f32 %v2097_v53, 0.0 }
 0x20f   : > { %8994 = vst [vmem:[#allocation110_spill] sm:$0xff] %v6166_v27  ;;  %1813 = vperm.xlu1 %4767, %v928_v10   ;;  %1818 = vperm.xlu2 %4768, %v929_v5   ;;  %v932_v10 = vsub.f32 %v5767_v59, %v8999_v47  ;;  %v6182_v5 = vmin.f32 %v2166_v6, 7.0  ;;  %v2169_v59 = vmax.f32 %v2153_v56, 0.0  ;;  %v9008_v56 = vmov 0  }
 0x210   : > { %v6192_v24 = vmin.f32 %v2113_v13, 7.0 }
 0x211   : > { %v6168_v50 = vpop.permute.xlu2 %1589  ;;  %v6170_v62 = vpop.permute.xlu1 %1507  ;;  %v8724_v6 = vceil.f32 %v6182_v5  ;;  %v6201_v44 = vmin.f32 %v2169_v59, 7.0 }
 0x212   : > { %8995 = vst [vmem:[#allocation111_spill] sm:$0xff] %v6168_v50  ;;  %v8729_v58 = vfloor.f32 %v6192_v24 }
 0x213   : > { %8996 = vst [vmem:[#allocation112_spill] sm:$0xff] %v6170_v62  ;;  %v2099_v62 = vmul.f32 0.25, %v9001_v43  ;;  %v2156_v43 = vmul.f32 0.25, %v5637_v29 }
 0x214   : > { %2929 = vperm.xlu0 %4766, %v8720_v41   ;;  %9004 = vst [vmem:[#allocation116_spill] sm:$0xff] %v6192_v24 }
 0x215   : > { %v2115_v53 = vmax.f32 %v2099_v62, 0.0  ;;  %v9009_v62 = vld [vmem:[#allocation15_spill] sm:$0xff]  ;;  %v2172_v29 = vmax.f32 %v2156_v43, 0.0 }
 0x216   : > { %v6185_v9 = vpop.permute.xlu0 %1793 }
 0x217   : > { %9000 = vst [vmem:[#allocation113_spill] sm:$0xff] %v6185_v9  ;;  %1828 = vperm.xlu1 %4767, %v931_v11   ;;  %1833 = vperm.xlu2 %4768, %v932_v10   ;;  %v9006_v11 = vfloor.f32 %v5882_v45  ;;  %v2116_v10 = vmax.f32 %v2100_v19, 0.0  ;;  %v6216_v59 = vmin.f32 %v2115_v53, 7.0  ;;  %v6223_v9 = vmin.f32 %v2172_v29, 7.0  ;;  %v9015_v29 = vld [vmem:[#allocation9_spill] sm:$0xff] }
 0x219   : > { %v6188_v41 = vpop.permute.xlu2 %1604  ;;  %v6190_v50 = vpop.permute.xlu1 %1554  ;;  %v934_v47 = vsub.f32 %v5882_v45, %v9006_v11  ;;  %v6218_v11 = vmin.f32 %v2116_v10, 7.0 }
 0x21a   : > { %9002 = vst [vmem:[#allocation114_spill] sm:$0xff] %v6188_v41  ;;  %v9010_v41 = vld [vmem:[#allocation21_spill] sm:$0xff] }
 0x21b   : > { %9003 = vst [vmem:[#allocation115_spill] sm:$0xff] %v6190_v50  ;;  %v2102_v25 = vmul.f32 0.25, %v9010_v41  ;;  %v2159_v41 = vmul.f32 0.25, %v5651_v55  ;;  %v8738_v53 = vfloor.f32 %v6218_v11  ;;  %v9018_v55 = vld [vmem:[#allocation24_spill] sm:$0xff]  ;;  %v8777_v34 = vceil.f32 %v6218_v11 }
 0x21c   : > { %2944 = vperm.xlu0 %4766, %v8724_v6   ;;  %v2101_v6 = vmul.f32 0.25, %v9009_v62  ;;  %9013 = vst [vmem:[#allocation120_spill] sm:$0xff] %v6218_v11 }
 0x21d   : > { %v2175_v8 = vmax.f32 %v2159_v41, 0.0 }
 0x21e   : > { %v6204_v13 = vpop.permute.xlu0 %1808 }
 0x21f   : > { %9007 = vst [vmem:[#allocation117_spill] sm:$0xff] %v6204_v13  ;;  %1843 = vperm.xlu1 %4767, %v934_v47   ;;  %4769 = vset.pattern.permute.xlu2 %v9008_v56  ;;  %v8732_v47 = vceil.f32 %v6201_v44  ;;  %v2117_v13 = vmax.f32 %v2101_v6, 0.0  ;;  %v6250_v39 = vmin.f32 %v2175_v8, 7.0 }
 0x220   : > { %2327 = vperm.xlu2 %4769, %v8729_v58   ;;  %v2118_v58 = vmax.f32 %v2102_v25, 0.0  ;;  %v2104_v25 = vmul.f32 0.25, %v9015_v29 }
 0x221   : > { %v6212_v45 = vpop.permute.xlu2 %1619  ;;  %v6214_v19 = vpop.permute.xlu1 %1569  ;;  %v6235_v43 = vmin.f32 %v2117_v13, 7.0 }
 0x222   : > { %9011 = vst [vmem:[#allocation118_spill] sm:$0xff] %v6212_v45  ;;  %v8737_v45 = vfloor.f32 %v6216_v59  ;;  %v6238_v6 = vmin.f32 %v2118_v58, 7.0  ;;  %v2120_v13 = vmax.f32 %v2104_v25, 0.0 }
 0x223   : > { %9012 = vst [vmem:[#allocation119_spill] sm:$0xff] %v6214_v19  ;;  %v2146_v19 = vmul.f32 0.25, %v5659_v28  ;;  %v9021_v28 = vld [vmem:[#allocation5_spill] sm:$0xff] }
 0x224   : > { %2959 = vperm.xlu0 %4766, %v8732_v47   ;;  %v6259_v41 = vmin.f32 %v2120_v13, 7.0 }
 0x225   : > { %v2162_v58 = vmax.f32 %v2146_v19, 0.0 }
 0x226   : > { %v6226_v62 = vpop.permute.xlu0 %1823 }
 0x227   : > { %9014 = vst [vmem:[#allocation121_spill] sm:$0xff] %v6226_v62  ;;  %4770 = vset.pattern.permute.xlu1 %v9008_v56  ;;  %v2105_v62 = vmul.f32 0.25, %v9018_v55  ;;  %v2108_v55 = vmul.f32 0.25, %v9021_v28  ;;  %v8753_v28 = vfloor.f32 %v6259_v41 }
 0x228   : > { %2337 = vperm.xlu1 %4770, %v8737_v45   ;;  %2342 = vperm.xlu2 %4769, %v8738_v53   ;;  %v8742_v45 = vceil.f32 %v6223_v9  ;;  %v8746_v53 = vfloor.f32 %v6235_v43 }
 0x229   : > { %v6240_v10 = vpop.permute.xlu2 %1666  ;;  %v6242_v47 = vpop.permute.xlu1 %1584  ;;  %v2121_v29 = vmax.f32 %v2105_v62, 0.0 }
 0x22a   : > { %9016 = vst [vmem:[#allocation122_spill] sm:$0xff] %v6240_v10  ;;  %v9042_v10 = vld [vmem:[#allocation23_spill] sm:$0xff] }
 0x22b   : > { %9017 = vst [vmem:[#allocation123_spill] sm:$0xff] %v6242_v47  ;;  %v8747_v47 = vfloor.f32 %v6238_v6  ;;  %v6267_v19 = vmin.f32 %v2121_v29, 7.0 }
 0x22c   : > { %2974 = vperm.xlu0 %4766, %v8742_v45   ;;  %v9020_v45 = vld [vmem:[#allocation11_spill] sm:$0xff] }
 0x22d   : > { %v2107_v25 = vmul.f32 0.25, %v9020_v45  ;;  %v2165_v45 = vmax.f32 %v2149_v4, 0.0 }
 0x22e   : > { %v6252_v21 = vpop.permute.xlu0 %1838 }
 0x22f   : > { %9019 = vst [vmem:[#allocation124_spill] sm:$0xff] %v6252_v21  ;;  %v6269_v21 = vmin.f32 %v2162_v58, 7.0  ;;  %v2123_v13 = vmax.f32 %v2107_v25, 0.0  ;;  %v9025_v58 = vld [vmem:[#allocation32_spill] sm:$0xff]  ;;  %v6294_v1 = vmin.f32 %v2165_v45, 7.0 }
 0x230   : > { %2347 = vperm.xlu1 %4770, %v8746_v53   ;;  %2352 = vperm.xlu2 %4769, %v8747_v47   ;;  %v8750_v53 = vceil.f32 %v6250_v39  ;;  %v2124_v47 = vmax.f32 %v2108_v55, 0.0  ;;  %v2110_v25 = vmul.f32 0.25, %v9025_v58 }
 0x231   : > { %v6263_v62 = vpop.permute.xlu2 %1681  ;;  %v6265_v8 = vpop.permute.xlu1 %1599  ;;  %v8759_v29 = vfloor.f32 %v6269_v21  ;;  %v6284_v15 = vmin.f32 %v2123_v13, 7.0 }
 0x232   : > { %9022 = vst [vmem:[#allocation125_spill] sm:$0xff] %v6263_v62  ;;  %v2126_v50 = vmax.f32 %v2110_v25, 0.0 }
 0x233   : > { %9023 = vst [vmem:[#allocation126_spill] sm:$0xff] %v6265_v8  ;;  %v8754_v8 = vfloor.f32 %v6267_v19 }
 0x234   : > { %2989 = vperm.xlu0 %4766, %v8750_v53   ;;  %v6291_v53 = vmin.f32 %v2124_v47, 7.0 }
 0x236   : > { %v6275_v30 = vpop.permute.xlu0 %2737  ;;  %v8761_v47 = vfloor.f32 %v6291_v53 }
 0x237   : > { %9024 = vst [vmem:[#allocation127_spill] sm:$0xff] %v6275_v30  ;;  %v9028_v30 = vld [vmem:[#allocation29_spill] sm:$0xff] }
 0x238   : > { %2362 = vperm.xlu1 %4770, %v8753_v28   ;;  %2367 = vperm.xlu2 %4769, %v8754_v8   ;;  %v2111_v62 = vmul.f32 0.25, %v9028_v30  ;;  %v2306_v28 = vsub.f32 %v6269_v21, %v8759_v29  ;;  %v9029_v8 = vld [vmem:[#allocation14_spill] sm:$0xff] }
 0x239   : > { %v6287_v55 = vpop.permute.xlu2 %1696  ;;  %v6289_v4 = vpop.permute.xlu1 %1614  ;;  %v2098_v13 = vmul.f32 0.25, %v9029_v8 }
 0x23a   : > { %9026 = vst [vmem:[#allocation128_spill] sm:$0xff] %v6287_v55  ;;  %v2127_v31 = vmax.f32 %v2111_v62, 0.0  ;;  %v8760_v55 = vfloor.f32 %v6284_v15  ;;  %v6313_v62 = vmin.f32 %v2126_v50, 7.0 }
 0x23b   : > { %9027 = vst [vmem:[#allocation129_spill] sm:$0xff] %v6289_v4  ;;  %v8762_v4 = vfloor.f32 %v6294_v1  ;;  %v2114_v25 = vmax.f32 %v2098_v13, 0.0 }
 0x23c   : > { %3020 = vperm.xlu0 %4766, %v2306_v28   ;;  %v6315_v29 = vmin.f32 %v2127_v31, 7.0 }
 0x23d   : > { %v2309_v30 = vsub.f32 %v6294_v1, %v8762_v4  ;;  %v6320_v8 = vmin.f32 %v2114_v25, 7.0  ;;  %v8772_v4 = vceil.f32 %v6192_v24 }
 0x23e   : > { %v6300_v58 = vpop.permute.xlu0 %2762 }
 0x23f   : > { %9030 = vst [vmem:[#allocation130_spill] sm:$0xff] %v6300_v58  ;;  %v8766_v58 = vfloor.f32 %v6315_v29  ;;  %v8770_v25 = vceil.f32 %v6320_v8 }
 0x240   : > { %2377 = vperm.xlu1 %4770, %v8760_v55   ;;  %2382 = vperm.xlu2 %4769, %v8761_v47   ;;  %v8765_v47 = vfloor.f32 %v6313_v62 }
 0x241   : > { %v6309_v45 = vpop.permute.xlu2 %1711  ;;  %v6311_v28 = vpop.permute.xlu1 %1661 }
 0x242   : > { %9031 = vst [vmem:[#allocation131_spill] sm:$0xff] %v6309_v45 }
 0x243   : > { %9032 = vst [vmem:[#allocation132_spill] sm:$0xff] %v6311_v28 }
 0x244   : > { %3035 = vperm.xlu0 %4766, %v2309_v30   ;;  %v9036_v30 = vfloor.f32 %v6010_v52 }
 0x246   : > { %v6322_v55 = vpop.permute.xlu0 %2777  ;;  %v2312_v13 = vsub.f32 %v6010_v52, %v9036_v30 }
 0x247   : > { %9033 = vst [vmem:[#allocation133_spill] sm:$0xff] %v6322_v55  ;;  %v9037_v55 = vld [vmem:[#allocation20_spill] sm:$0xff] }
 0x248   : > { %2392 = vperm.xlu1 %4770, %v8765_v47   ;;  %2397 = vperm.xlu2 %4769, %v8766_v58   ;;  %v2103_v45 = vmul.f32 0.25, %v9037_v55  ;;  %v2258_v47 = vsub.f32 %v8770_v25, %v6320_v8  ;;  %v2257_v58 = vsub.f32 %v8772_v4, %v6192_v24  ;;  %v2106_v4 = vmul.f32 0.25, %v9042_v10 }
 0x249   : > { %v6330_v31 = vpop.permute.xlu2 %1726  ;;  %v6332_v50 = vpop.permute.xlu1 %1676 }
 0x24a   : > { %9034 = vst [vmem:[#allocation134_spill] sm:$0xff] %v6330_v31 }
 0x24b   : > { %9035 = vst [vmem:[#allocation135_spill] sm:$0xff] %v6332_v50  ;;  %v2119_v50 = vmax.f32 %v2103_v45, 0.0  ;;  %v2260_v45 = vsub.f32 %v8777_v34, %v6218_v11  ;;  %v2109_v34 = vmul.f32 0.25, %v9047_v57  ;;  %v9051_v57 = vfloor.f32 %v5522_v20 }
 0x24c   : > { %3050 = vperm.xlu0 %4766, %v2312_v13   ;;  %v9041_v13 = vfloor.f32 %v6022_v18 }
 0x24d   : > { %v6357_v25 = vmin.f32 %v2119_v50, 7.0  ;;  %v9046_v50 = vfloor.f32 %v6039_v17 }
 0x24e   : > { %v6340_v27 = vpop.permute.xlu0 %2792  ;;  %v2315_v55 = vsub.f32 %v6022_v18, %v9041_v13 }
 0x24f   : > { %9038 = vst [vmem:[#allocation136_spill] sm:$0xff] %v6340_v27  ;;  %v8775_v27 = vceil.f32 %v6235_v43  ;;  %v2318_v10 = vsub.f32 %v6039_v17, %v9046_v50  ;;  %v2215_v2 = vceil.f32 %v6357_v25 }
 0x250   : > { %2428 = vperm.xlu2 %4769, %v2258_v47   ;;  %2423 = vperm.xlu1 %4770, %v2257_v58  }
 0x251   : > { %v6348_v30 = vpop.permute.xlu2 %1773  ;;  %v6350_v31 = vpop.permute.xlu1 %1691  ;;  %v2261_v58 = vsub.f32 %v8775_v27, %v6235_v43 }
 0x252   : > { %9039 = vst [vmem:[#allocation137_spill] sm:$0xff] %v6348_v30 }
 0x253   : > { %9040 = vst [vmem:[#allocation138_spill] sm:$0xff] %v6350_v31 }
 0x254   : > { %3065 = vperm.xlu0 %4766, %v2315_v55   ;;  %v2122_v55 = vmax.f32 %v2106_v4, 0.0  ;;  %v2263_v4 = vsub.f32 %v2215_v2, %v6357_v25 }
 0x256   : > { %v6360_v47 = vpop.permute.xlu0 %2823  ;;  %v6377_v27 = vmin.f32 %v2122_v55, 7.0 }
 0x257   : > { %9043 = vst [vmem:[#allocation139_spill] sm:$0xff] %v6360_v47  ;;  %v8780_v47 = vceil.f32 %v6259_v41 }
 0x258   : > { %2443 = vperm.xlu2 %4769, %v2261_v58   ;;  %2438 = vperm.xlu1 %4770, %v2260_v45   ;;  %v2218_v55 = vceil.f32 %v6377_v27 }
 0x259   : > { %v6368_v13 = vpop.permute.xlu2 %1788  ;;  %v6370_v31 = vpop.permute.xlu1 %1706  ;;  %v2264_v45 = vsub.f32 %v8780_v47, %v6259_v41  ;;  %v9052_v47 = vld [vmem:[#allocation28_spill] sm:$0xff] }
 0x25a   : > { %9044 = vst [vmem:[#allocation140_spill] sm:$0xff] %v6368_v13  ;;  %v2125_v13 = vmax.f32 %v2109_v34, 0.0  ;;  %v2112_v30 = vmul.f32 0.25, %v9052_v47  ;;  %v2266_v34 = vsub.f32 %v2218_v55, %v6377_v27  ;;  %v8788_v47 = vfloor.f32 %v5562_v12 }
 0x25b   : > { %9045 = vst [vmem:[#allocation141_spill] sm:$0xff] %v6370_v31 }
 0x25c   : > { %3080 = vperm.xlu0 %4766, %v2318_v10   ;;  %v8785_v10 = vceil.f32 %v6284_v15 }
 0x25e   : > { %v6380_v58 = vpop.permute.xlu0 %2838 }
 0x25f   : > { %9048 = vst [vmem:[#allocation142_spill] sm:$0xff] %v6380_v58  ;;  %v6395_v58 = vmin.f32 %v2125_v13, 7.0 }
 0x260   : > { %2458 = vperm.xlu2 %4769, %v2264_v45   ;;  %2453 = vperm.xlu1 %4770, %v2263_v4   ;;  %v2267_v4 = vsub.f32 %v8785_v10, %v6284_v15 }
 0x261   : > { %v6386_v50 = vpop.permute.xlu2 %1803  ;;  %v6388_v31 = vpop.permute.xlu1 %1721  ;;  %v2221_v13 = vceil.f32 %v6395_v58 }
 0x262   : > { %9049 = vst [vmem:[#allocation143_spill] sm:$0xff] %v6386_v50  ;;  %v2128_v50 = vmax.f32 %v2112_v30, 0.0 }
 0x263   : > { %9050 = vst [vmem:[#allocation144_spill] sm:$0xff] %v6388_v31 }
 0x264   : > { %4773 = vset.pattern.permute.xlu0 %v9008_v56 }
 0x265   : > { %962 = vperm.xlu0 %4773, %v9051_v57   ;;  %v8789_v57 = vceil.f32 %v6313_v62 }
 0x266   : > { %v6398_v45 = vpop.permute.xlu0 %2853 }
 0x267   : > { %9053 = vst [vmem:[#allocation145_spill] sm:$0xff] %v6398_v45  ;;  %v6413_v45 = vmin.f32 %v2128_v50, 7.0 }
 0x268   : > { %2473 = vperm.xlu2 %4769, %v2267_v4   ;;  %2468 = vperm.xlu1 %4770, %v2266_v34   ;;  %v2270_v4 = vsub.f32 %v8789_v57, %v6313_v62  ;;  %v2269_v34 = vsub.f32 %v2221_v13, %v6395_v58  ;;  %v9059_v57 = vceil.f32 %v6192_v24 }
 0x269   : > { %v6404_v31 = vpop.permute.xlu2 %1818  ;;  %v6406_v56 = vpop.permute.xlu1 %1768  ;;  %v2224_v28 = vceil.f32 %v6413_v45 }
 0x26a   : > { %9054 = vst [vmem:[#allocation146_spill] sm:$0xff] %v6404_v31 }
 0x26d   : > { %987 = vperm.xlu0 %4773, %v8788_v47   ;;  %v8792_v47 = vfloor.f32 %v5579_v14 }
 0x26e   : > { %v6415_v10 = vpop.permute.xlu0 %2868 }
 0x26f   : > { %9055 = vst [vmem:[#allocation147_spill] sm:$0xff] %v6415_v10  ;;  %v2272_v10 = vsub.f32 %v2224_v28, %v6413_v45 }
 0x270   : > { %2488 = vperm.xlu2 %4769, %v2270_v4   ;;  %2483 = vperm.xlu1 %4770, %v2269_v34  }
 0x271   : > { %v6421_v30 = vpop.permute.xlu2 %1833  ;;  %v6423_v31 = vpop.permute.xlu1 %1783 }
 0x272   : > { %9056 = vst [vmem:[#allocation148_spill] sm:$0xff] %v6421_v30  ;;  %v8795_v30 = vfloor.f32 %v5592_v48 }
 0x273   : > { %9057 = vst [vmem:[#allocation149_spill] sm:$0xff] %v6423_v31 }
 0x275   : > { %1002 = vperm.xlu0 %4773, %v8792_v47   ;;  %v8796_v47 = vceil.f32 %v6216_v59 }
 0x276   : > { %v6429_v50 = vpop.permute.xlu0 %2883 }
 0x277   : > { %9058 = vst [vmem:[#allocation150_spill] sm:$0xff] %v6429_v50  ;;  %v9062_v50 = vceil.f32 %v6218_v11 }
 0x278   : > { %2519 = vperm.xlu2 %4769, %v9059_v57   ;;  %2498 = vperm.xlu1 %4770, %v2272_v10  }
 0x279   : > { %v6434_v4 = vpop.permute.xlu1 %1798 }
 0x27a   : > { %v6436_v34 = vpop.permute.xlu2 %2327 }
 0x27b   : > { %9060 = vst [vmem:[#allocation151_spill] sm:$0xff] %v6436_v34  ;;  %v9065_v34 = vceil.f32 %v5365_v7 }
 0x27d   : > { %1017 = vperm.xlu0 %4773, %v8795_v30   ;;  %v871_v24 = vsub.f32 %v9065_v34, %v5365_v7  ;;  %v8801_v7 = vceil.f32 %v6267_v19  ;;  %v9071_v34 = vceil.f32 %v5409_v32 }
 0x27e   : > { %v6441_v31 = vpop.permute.xlu0 %2898 }
 0x27f   : > { %9061 = vst [vmem:[#allocation152_spill] sm:$0xff] %v6441_v31  ;;  %v8800_v31 = vceil.f32 %v6238_v6 }
 0x280   : > { %2534 = vperm.xlu2 %4769, %v9062_v50   ;;  %2529 = vperm.xlu1 %4770, %v8796_v47  }
 0x281   : > { %v6448_v10 = vpop.permute.xlu1 %1813 }
 0x282   : > { %9063 = vst [vmem:[#allocation153_spill] sm:$0xff] %v6448_v10  ;;  %v6450_v57 = vpop.permute.xlu2 %2342 }
 0x283   : > { %9064 = vst [vmem:[#allocation154_spill] sm:$0xff] %v6450_v57  ;;  %v9068_v57 = vceil.f32 %v5386_v22 }
 0x285   : > { %1064 = vperm.xlu0 %4773, %v871_v24   ;;  %v874_v10 = vsub.f32 %v9068_v57, %v5386_v22  ;;  %v8802_v22 = vceil.f32 %v6291_v53  ;;  %v9075_v57 = vceil.f32 %v5432_v51 }
 0x286   : > { %v6455_v30 = vpop.permute.xlu0 %2929 }
 0x287   : > { %9066 = vst [vmem:[#allocation155_spill] sm:$0xff] %v6455_v30 }
 0x288   : > { %2549 = vperm.xlu2 %4769, %v2215_v2   ;;  %2544 = vperm.xlu1 %4770, %v8800_v31   ;;  %v877_v31 = vsub.f32 %v9071_v34, %v5409_v32  ;;  %v8803_v32 = vceil.f32 %v6315_v29  ;;  %v8804_v34 = vfloor.f32 %v6320_v8 }
 0x289   : > { %v6460_v50 = vpop.permute.xlu1 %1828 }
 0x28a   : > { %v6462_v47 = vpop.permute.xlu2 %2352 }
 0x28b   : > { %9067 = vst [vmem:[#allocation156_spill] sm:$0xff] %v6462_v47 }
 0x28d   : > { %1079 = vperm.xlu0 %4773, %v874_v10  }
 0x28e   : > { %v6467_v11 = vpop.permute.xlu0 %2944 }
 0x28f   : > { %9069 = vst [vmem:[#allocation157_spill] sm:$0xff] %v6467_v11 }
 0x290   : > { %2564 = vperm.xlu2 %4769, %v2218_v55   ;;  %2559 = vperm.xlu1 %4770, %v8801_v7   ;;  %v880_v7 = vsub.f32 %v9075_v57, %v5432_v51  ;;  %v2274_v57 = vsub.f32 %v6320_v8, %v8804_v34 }
 0x291   : > { %v6472_v2 = vpop.permute.xlu1 %1843 }
 0x292   : > { %v6474_v24 = vpop.permute.xlu2 %2367 }
 0x293   : > { %9070 = vst [vmem:[#allocation158_spill] sm:$0xff] %v6474_v24 }
 0x295   : > { %1094 = vperm.xlu0 %4773, %v877_v31  }
 0x296   : > { %v6479_v47 = vpop.permute.xlu0 %2959 }
 0x297   : > { %9072 = vst [vmem:[#allocation159_spill] sm:$0xff] %v6479_v47 }
 0x298   : > { %2579 = vperm.xlu2 %4769, %v2221_v13   ;;  %2574 = vperm.xlu1 %4770, %v8802_v22   ;;  %v9079_v22 = vceil.f32 %v5473_v38 }
 0x29a   : > { %v6484_v55 = vpop.permute.xlu2 %2382  ;;  %v6486_v10 = vpop.permute.xlu1 %2337 }
 0x29b   : > { %9073 = vst [vmem:[#allocation160_spill] sm:$0xff] %v6484_v55  ;;  %v883_v55 = vsub.f32 %v9079_v22, %v5473_v38 }
 0x29c   : > { %9074 = vst [vmem:[#allocation161_spill] sm:$0xff] %v6486_v10 }
 0x29d   : > { %1109 = vperm.xlu0 %4773, %v880_v7   ;;  %v9081_v7 = vfloor.f32 %v6216_v59 }
 0x29e   : > { %v6491_v24 = vpop.permute.xlu0 %2974 }
 0x29f   : > { %9076 = vst [vmem:[#allocation162_spill] sm:$0xff] %v6491_v24 }
 0x2a0   : > { %2594 = vperm.xlu2 %4769, %v2224_v28   ;;  %2589 = vperm.xlu1 %4770, %v8803_v32   ;;  %v2275_v28 = vsub.f32 %v6216_v59, %v9081_v7 }
 0x2a2   : > { %v6496_v31 = vpop.permute.xlu2 %2397  ;;  %v6498_v13 = vpop.permute.xlu1 %2347 }
 0x2a3   : > { %9077 = vst [vmem:[#allocation163_spill] sm:$0xff] %v6496_v31  ;;  %v9083_v31 = vceil.f32 %v5502_v16 }
 0x2a4   : > { %9078 = vst [vmem:[#allocation164_spill] sm:$0xff] %v6498_v13 }
 0x2a5   : > { %1124 = vperm.xlu0 %4773, %v883_v55   ;;  %v886_v24 = vsub.f32 %v9083_v31, %v5502_v16  ;;  %v9086_v55 = vfloor.f32 %v6238_v6  ;;  %v9090_v16 = vceil.f32 %v5522_v20  ;;  %v9092_v31 = vfloor.f32 %v6267_v19  ;;  %v694_v20 = vld [vmem:[%s8541_s1 + $0x78] sm:$0xff] }
 0x2a6   : > { %v6504_v51 = vpop.permute.xlu0 %2989  ;;  %1942 = vmatpush.msra.mxu0 %v694_v20  ;;  %v708_v20 = vld [vmem:[%s8541_s1 + $0xe8] sm:$0xff] }
 0x2a7   : > { %9080 = vst [vmem:[#allocation165_spill] sm:$0xff] %v6504_v51  ;;  %v2278_v7 = vsub.f32 %v6238_v6, %v9086_v55  ;;  %v9087_v51 = vfloor.f32 %v6235_v43  ;;  %v2281_v47 = vsub.f32 %v6267_v19, %v9092_v31  ;;  %v9093_v55 = vfloor.f32 %v6259_v41 }
 0x2a8   : > { %2625 = vperm.xlu2 %4769, %v2275_v28   ;;  %2620 = vperm.xlu1 %4770, %v2274_v57  }
 0x2a9   : > { %v2277_v28 = vsub.f32 %v6235_v43, %v9087_v51 }
 0x2aa   : > { %v6512_v32 = vpop.permute.xlu1 %2362  ;;  %v6517_v38 = vpop.permute.xlu2 %2428 }
 0x2ab   : > { %9082 = vst [vmem:[#allocation166_spill] sm:$0xff] %v6512_v32  ;;  %v2280_v32 = vsub.f32 %v6259_v41, %v9093_v55 }
 0x2ac   : > { %9084 = vst [vmem:[#allocation167_spill] sm:$0xff] %v6517_v38 }
 0x2ad   : > { %1139 = vperm.xlu0 %4773, %v886_v24  }
 0x2ae   : > { %v6519_v22 = vpop.permute.xlu0 %3020 }
 0x2af   : > { %9085 = vst [vmem:[#allocation168_spill] sm:$0xff] %v6519_v22 }
 0x2b0   : > { %2640 = vperm.xlu2 %4769, %v2278_v7   ;;  %2635 = vperm.xlu1 %4770, %v2277_v28   ;;  %v9095_v7 = vld [vmem:[#allocation6_spill] sm:$0xff] }
 0x2b1   : > { %v9096_v28 = vceil.f32 %v9095_v7 }
 0x2b2   : > { %v6527_v57 = vpop.permute.xlu1 %2377  ;;  %v6529_v34 = vpop.permute.xlu2 %2443 }
 0x2b3   : > { %9088 = vst [vmem:[#allocation169_spill] sm:$0xff] %v6527_v57  ;;  %v9098_v57 = vfloor.f32 %v6291_v53 }
 0x2b4   : > { %9089 = vst [vmem:[#allocation170_spill] sm:$0xff] %v6529_v34 }
 0x2b5   : > { %1186 = vperm.xlu0 %4773, %v9090_v16   ;;  %v710_v16 = vld [vmem:[%s8541_s1 + $0xf8] sm:$0xff] }
 0x2b6   : > { %v6533_v24 = vpop.permute.xlu0 %3035  ;;  %2007 = vmatpush.msra.mxu1 %v710_v16 }
 0x2b7   : > { %9091 = vst [vmem:[#allocation171_spill] sm:$0xff] %v6533_v24  ;;  %v8807_v24 = vfloor.f32 %v6068_v40 }
 0x2b8   : > { %2655 = vperm.xlu2 %4769, %v2281_v47   ;;  %2650 = vperm.xlu1 %4770, %v2280_v32   ;;  %v2284_v47 = vsub.f32 %v6291_v53, %v9098_v57  ;;  %v9099_v32 = vfloor.f32 %v6284_v15  ;;  %v692_v57 = vld [vmem:[%s8541_s1 + $0x68] sm:$0xff] }
 0x2ba   : > { %v6541_v51 = vpop.permute.xlu1 %2392  ;;  %v2283_v55 = vsub.f32 %v6284_v15, %v9099_v32  ;;  %v6559_v7 = vpop.permute.xlu2 %2458  ;;  %v707_v32 = vld [vmem:[%s8541_s1 + $0xe0] sm:$0xff] }
 0x2bb   : > { %9094 = vst [vmem:[#allocation172_spill] sm:$0xff] %v6541_v51  ;;  %v709_v51 = vld [vmem:[%s8541_s1 + $0xf0] sm:$0xff] }
 0x2bc   : > { %9100 = vst [vmem:[#allocation173_spill] sm:$0xff] %v6559_v7  ;;  %2008 = vmatpush.msra.mxu1 %v709_v51  ;;  %v690_v51 = vld [vmem:[%s8541_s1 + $0x58] sm:$0xff]  ;;  %v9106_v7 = vfloor.f32 %v6313_v62 }
 0x2bd   : > { %1201 = vperm.xlu0 %4773, %v9096_v28   ;;  %v693_v28 = vld [vmem:[%s8541_s1 + $0x70] sm:$0xff] }
 0x2be   : > { %v6551_v31 = vpop.permute.xlu0 %3050  ;;  %1943 = vmatpush.msra.mxu0 %v693_v28  ;;  %2009 = vmatpush.msra.mxu1 %v708_v20  ;;  %v2286_v11 = vsub.f32 %v6313_v62, %v9106_v7  ;;  %v688_v7 = vld [vmem:[%s8541_s1 + $0x48] sm:$0xff] }
 0x2bf   : > { %9097 = vst [vmem:[#allocation6_spill] sm:$0xff] %v6551_v31 }
 0x2c0   : > { %2670 = vperm.xlu2 %4769, %v2284_v47   ;;  %2665 = vperm.xlu1 %4770, %v2283_v55   ;;  %v691_v47 = vld [vmem:[%s8541_s1 + $0x60] sm:$0xff]  ;;  %v9102_v55 = vld [vmem:[#allocation8_spill] sm:$0xff] }
 0x2c1   : > { %1944 = vmatpush.msra.mxu0 %v692_v57  ;;  %v9103_v31 = vceil.f32 %v9102_v55  ;;  %v9105_v57 = vfloor.f32 %v6315_v29  ;;  %2010 = vmatpush.msra.mxu1 %v707_v32  ;;  %v705_v55 = vld [vmem:[%s8541_s1 + $0xd0] sm:$0xff] }
 0x2c2   : > { %v6573_v16 = vpop.permute.xlu1 %2423  ;;  %v6606_v32 = vpop.permute.xlu2 %2473 }
 0x2c3   : > { %9101 = vst [vmem:[#allocation174_spill] sm:$0xff] %v6573_v16  ;;  %1945 = vmatpush.msra.mxu0 %v691_v47  ;;  %v2287_v20 = vsub.f32 %v6315_v29, %v9105_v57  ;;  %v689_v47 = vld [vmem:[%s8541_s1 + $0x50] sm:$0xff] }
 0x2c4   : > { %9107 = vst [vmem:[#allocation175_spill] sm:$0xff] %v6606_v32 }
 0x2c5   : > { %1216 = vperm.xlu0 %4773, %v9103_v31   ;;  %v706_v31 = vld [vmem:[%s8541_s1 + $0xd8] sm:$0xff]  ;;  %1946 = vmatpush.msra.mxu0 %v690_v51  ;;  %v687_v51 = vld [vmem:[%s8541_s1 + $0x40] sm:$0xff] }
 0x2c6   : > { %v6586_v28 = vpop.permute.xlu0 %3065  ;;  %2011 = vmatpush.msra.mxu1 %v706_v31 }
 0x2c7   : > { %9104 = vst [vmem:[#allocation8_spill] sm:$0xff] %v6586_v28  ;;  %1947 = vmatpush.msra.mxu0 %v689_v47  ;;  %v9109_v28 = vld [vmem:[#allocation26_spill] sm:$0xff]  ;;  %v8806_v47 = vfloor.f32 %v6051_v33 }
 0x2c8   : > { %2685 = vperm.xlu2 %4769, %v2287_v20   ;;  %2680 = vperm.xlu1 %4770, %v2286_v11   ;;  %v704_v11 = vld [vmem:[%s8541_s1 + $0xc8] sm:$0xff]  ;;  %v703_v20 = vld [vmem:[%s8541_s1 + $0xc0] sm:$0xff]  ;;  %v9110_v32 = vceil.f32 %v9109_v28  ;;  %v9112_v28 = vfloor.f32 %v6269_v21 }
 0x2c9   : > { %2012 = vmatpush.msra.mxu1 %v705_v55  ;;  %1948 = vmatpush.msra.mxu0 %v688_v7  ;;  %v686_v55 = vld [vmem:[%s8541_s1 + $0x38] sm:$0xff] }
 0x2ca   : > { %v6608_v57 = vpop.permute.xlu1 %2438  ;;  %v702_v7 = vld [vmem:[%s8541_s1 + $0xb8] sm:$0xff] }
 0x2cb   : > { %9108 = vst [vmem:[#allocation176_spill] sm:$0xff] %v6608_v57  ;;  %2013 = vmatpush.msra.mxu1 %v704_v11  ;;  %1949 = vmatpush.msra.mxu0 %v687_v51  ;;  %v701_v11 = vld [vmem:[%s8541_s1 + $0xb0] sm:$0xff] }
 0x2cd   : > { %1231 = vperm.xlu0 %4773, %v9110_v32   ;;  %2014 = vmatpush.msra.mxu1 %v703_v20  ;;  %v685_v32 = vld [vmem:[%s8541_s1 + $0x30] sm:$0xff]  ;;  %v935_v20 = vlaneseq }
 0x2ce   : > { %v6621_v31 = vpop.permute.xlu0 %3080  ;;  %1950 = vmatpush.msra.mxu0 %v686_v55  ;;  %v683_v55 = vld [vmem:[%s8541_s1 + $0x20] sm:$0xff] }
 0x2cf   : > { %9111 = vst [vmem:[#allocation26_spill] sm:$0xff] %v6621_v31  ;;  %2015 = vmatpush.msra.mxu1 %v702_v7  ;;  %v9115_v31 = vceil.f32 %v5507_v23  ;;  %v699_v7 = vld [vmem:[%s8541_s1 + $0xa0] sm:$0xff]  ;;  %v682_v23 = vld [vmem:[%s8541_s1 + $0x18] sm:$0xff] }
 0x2d0   : > { %4772 = vset.pattern.permute.xlu2 %v8912_v49  ;;  %4771 = vset.pattern.permute.xlu1 %v8912_v49  ;;  %v6644_v49 = vpop.permute.xlu2 %2488 }
 0x2d1   : > { %2732 = vperm.xlu2 %4772, %v9112_v28   ;;  %2727 = vperm.xlu1 %4771, %v8806_v47   ;;  %9114 = vst [vmem:[#allocation178_spill] sm:$0xff] %v6644_v49  ;;  %v684_v28 = vld [vmem:[%s8541_s1 + $0x28] sm:$0xff]  ;;  %v936_v49 = vand.u32 127, %v935_v20 }
 0x2d2   : > { %v6642_v51 = vpop.permute.xlu1 %2453  ;;  %v700_v47 = vld [vmem:[%s8541_s1 + $0xa8] sm:$0xff]  ;;  %1951 = vmatpush.msra.mxu0 %v685_v32  ;;  %2016 = vmatpush.msra.mxu1 %v701_v11  ;;  %v9116_v32 = vfloor.f32 %v6294_v1  ;;  %v697_v11 = vld [vmem:[%s8541_s1 + $0x90] sm:$0xff] }
 0x2d3   : > { %9113 = vst [vmem:[#allocation177_spill] sm:$0xff] %v6642_v51 }
 0x2d4   : > { %1952 = vmatpush.msra.mxu0 %v684_v28  ;;  %2017 = vmatpush.msra.mxu1 %v700_v47  ;;  %v681_v47 = vld [vmem:[%s8541_s1 + $0x10] sm:$0xff]  ;;  %v937_v28 = vadd.s32 128, %v936_v49 }
 0x2d5   : > { %1246 = vperm.xlu0 %4773, %v9115_v31   ;;  %v698_v31 = vld [vmem:[%s8541_s1 + $0x98] sm:$0xff] }
 0x2d6   : > { %1953 = vmatpush.msra.mxu0 %v683_v55  ;;  %2018 = vmatpush.msra.mxu1 %v699_v7  ;;  %v680_v55 = vld [vmem:[%s8541_s1 + $0x8] sm:$0xff]  ;;  %v939_v34 = vcvt.s32.f32 %v937_v28 }
 0x2d7   : > { %v6660_v51 = vpop.permute.xlu0 %962  ;;  %v696_v7 = vld [vmem:[%s8541_s1 + $0x88] sm:$0xff] }
 0x2d8   : > { %1954 = vmatpush.msra.mxu0 %v682_v23  ;;  %2019 = vmatpush.msra.mxu1 %v698_v31  ;;  %v679_v23 = vld [vmem:[%s8541_s1] sm:$0xff]  ;;  %v941_v28 = vadd.f32 0.5, %v939_v34 }
 0x2d9   : > { %2747 = vperm.xlu2 %4772, %v9116_v32   ;;  %2742 = vperm.xlu1 %4771, %v8807_v24   ;;  %v6687_v32 = vpop.permute.xlu2 %2519  ;;  %v9119_v24 = vld [vmem:[#allocation16_spill] sm:$0xff]  ;;  %v695_v31 = vld [vmem:[%s8541_s1 + $0x80] sm:$0xff] }
 0x2da   : > { %v6679_v20 = vpop.permute.xlu1 %2468  ;;  %1955 = vmatpush.msra.mxu0 %v681_v47  ;;  %2020 = vmatpush.msra.mxu1 %v697_v11  ;;  %9118 = vst [vmem:[#allocation180_spill] sm:$0xff] %v6687_v32  ;;  %v8808_v47 = vfloor.f32 %v6085_v42  ;;  %v8809_v11 = vfloor.f32 %v6182_v5  ;;  %v943_v57 = vmul.f32 0.0625, %v941_v28  ;;  %v9126_v28 = vfloor.f32 %v5562_v12 }
 0x2db   : > { %9117 = vst [vmem:[#allocation179_spill] sm:$0xff] %v6679_v20  ;;  %v6696_v20 = vcvt.s32.f32 %v936_v49  ;;  %v9132_v32 = vfloor.f32 %v5592_v48 }
 0x2dc   : > { %1956 = vmatpush.msra.mxu0 %v680_v55  ;;  %2021 = vmatpush.msra.mxu1 %v696_v7  ;;  %v9123_v55 = vld [vmem:[#allocation17_spill] sm:$0xff] }
 0x2dd   : > { %1293 = vperm.xlu0 %4773, %v9119_v24   ;;  %9120 = vst [vmem:[#allocation16_spill] sm:$0xff] %v6696_v20  ;;  %v6709_v49 = vadd.f32 0.5, %v6696_v20 }
 0x2de   : > { %1957 = vmatpush.msra.mxu0 %v679_v23  ;;  %2022 = vmatpush.msra.mxu1 %v695_v31  ;;  %v8810_v31 = vfloor.f32 %v6102_v61 }
 0x2df   : > { %v6698_v13 = vpop.permute.xlu0 %987  ;;  %9122 = vst [vmem:[#allocation182_spill] sm:$0xff] %v6709_v49  ;;  %v942_v7 = vmul.f32 0.0625, %v6709_v49 }
 0x2e1   : > { %2757 = vperm.xlu2 %4772, %v8808_v47   ;;  %2752 = vperm.xlu1 %4771, %v8809_v11   ;;  %v6713_v10 = vpop.permute.xlu2 %2534  ;;  %v8811_v47 = vfloor.f32 %v6201_v44 }
 0x2e2   : > { %v6706_v24 = vpop.permute.xlu1 %2483  ;;  %9124 = vst [vmem:[#allocation17_spill] sm:$0xff] %v6713_v10  ;;  %v894_v10 = vsub.f32 %v5562_v12, %v9126_v28 }
 0x2e3   : > { %9121 = vst [vmem:[#allocation181_spill] sm:$0xff] %v6706_v24  ;;  %v6727_v24 = vfloor.f32 %v943_v57 }
 0x2e5   : > { %1308 = vperm.xlu0 %4773, %v9123_v55   ;;  %v6725_v55 = vfloor.f32 %v942_v7  ;;  %v947_v22 = vmul.f32 16.0, %v6727_v24  ;;  %vm1031_vm1 = vcmp.eq.f32.partialorder %v6727_v24, %v5683_v63  ;;  %vm1255_vm7 = vcmp.eq.f32.partialorder %v6727_v24, %v5892_v0 }
 0x2e7   : > { %v6715_v23 = vpop.permute.xlu0 %1002  ;;  %v946_v30 = vmul.f32 16.0, %v6725_v55  ;;  %v6741_v57 = vsub.f32 %v939_v34, %v947_v22  ;;  %vm1030_vm0 = vcmp.eq.f32.partialorder %v6725_v55, %v5683_v63  ;;  %vm1254_vm6 = vcmp.eq.f32.partialorder %v6725_v55, %v5892_v0 }
 0x2e8   : > { %v8819_v34 = vfloor.f32 %v6250_v39  ;;  %v1366_v22 = vsel %vm1254_vm6, %v5920_v36, 0.0 }
 0x2e9   : > { %2772 = vperm.xlu2 %4772, %v8810_v31   ;;  %2767 = vperm.xlu1 %4771, %v8811_v47   ;;  %v8812_v31 = vfloor.f32 %v6119_v35  ;;  %v8813_v47 = vfloor.f32 %v6223_v9  ;;  %v6739_v7 = vsub.f32 %v6696_v20, %v946_v30  ;;  %vm1511_vm4 = vcmp.eq.f32.partialorder %v6741_v57, %v5884_v46 }
 0x2ea   : > { %v6723_v11 = vpop.permute.xlu1 %2498  ;;  %vm1735_vm5 = vcmp.eq.f32.partialorder %v6741_v57, %v6057_v54  ;;  %v900_v20 = vsub.f32 %v5592_v48, %v9132_v32  ;;  %v2245_v48 = vceil.f32 %v6294_v1  ;;  %vm1513_vm9 = vcmp.eq.f32.partialorder %v6741_v57, %v6083_v60 }
 0x2eb   : > { %9125 = vst [vmem:[#allocation183_spill] sm:$0xff] %v6723_v11  ;;  %v6743_v11 = vpop.permute.xlu2 %2549  ;;  %vm1734_vm2 = vcmp.eq.f32.partialorder %v6739_v7, %v6057_v54  ;;  %vm1510_vm3 = vcmp.eq.f32.partialorder %v6739_v7, %v5884_v46  ;;  %v1847_v30 = vsel %vm1735_vm5, %v6406_v56, 0.0  ;;  %v1367_v46 = vsel %vm1255_vm7, %v5920_v36, 0.0 }
 0x2ec   : > { %9127 = vst [vmem:[#allocation184_spill] sm:$0xff] %v6743_v11  ;;  %vm1512_vm8 = vcmp.eq.f32.partialorder %v6739_v7, %v6083_v60  ;;  %vm1035_vm5 = vcmp.eq.f32.partialorder %v6727_v24, %v6660_v51 }
 0x2ed   : > { %1323 = vperm.xlu0 %4773, %v894_v10   ;;  %v9129_v10 = vfloor.f32 %v5579_v14 }
 0x2ef   : > { %v6734_v38 = vpop.permute.xlu0 %1017  ;;  %v897_v28 = vsub.f32 %v5579_v14, %v9129_v10  ;;  %v1846_v14 = vsel %vm1734_vm2, %v6406_v56, 0.0  ;;  %v1622_v10 = vsel %vm1510_vm3, %v6115_v37, 0.0  ;;  %vm1034_vm3 = vcmp.eq.f32.partialorder %v6725_v55, %v6660_v51  ;;  %v9174_v51 = vld [vmem:[#allocation50_spill] sm:$0xff] }
 0x2f0   : > { %v1878_v56 = vadd.f32 %v1846_v14, %v1622_v10  ;;  %v2242_v14 = vceil.f32 %v6269_v21 }
 0x2f1   : > { %2787 = vperm.xlu2 %4772, %v8812_v31   ;;  %2782 = vperm.xlu1 %4771, %v8813_v47   ;;  %v8817_v31 = vfloor.f32 %v6138_v3 }
 0x2f2   : > { %v6749_v12 = vpop.permute.xlu1 %2529 }
 0x2f3   : > { %9128 = vst [vmem:[#allocation185_spill] sm:$0xff] %v6749_v12 }
 0x2f5   : > { %1338 = vperm.xlu0 %4773, %v897_v28   ;;  %v1623_v28 = vsel %vm1511_vm4, %v6115_v37, 0.0  ;;  %v6790_v37 = vpop.permute.xlu2 %2564 }
 0x2f6   : > { %v1879_v12 = vadd.f32 %v1847_v30, %v1623_v28  ;;  %9131 = vst [vmem:[#allocation187_spill] sm:$0xff] %v6790_v37 }
 0x2f7   : > { %v1065_v54 = vpop.permute.xlu0 %1064 }
 0x2f8   : > { %v1142_v47 = vsel %vm1030_vm0, %v1065_v54, 0.0  ;;  %v1143_v0 = vsel %vm1031_vm1, %v1065_v54, 0.0 }
 0x2f9   : > { %2802 = vperm.xlu2 %4772, %v8817_v31   ;;  %2797 = vperm.xlu1 %4771, %v8819_v34   ;;  %v1398_v36 = vadd.f32 %v1366_v22, %v1142_v47  ;;  %v1399_v11 = vadd.f32 %v1367_v46, %v1143_v0  ;;  %v9133_v47 = vceil.f32 %v5991_v26  ;;  %v2290_v22 = vsub.f32 %v2242_v14, %v6269_v21 }
 0x2fa   : > { %v6788_v16 = vpop.permute.xlu1 %2544  ;;  %v2293_v0 = vsub.f32 %v2245_v48, %v6294_v1 }
 0x2fb   : > { %9130 = vst [vmem:[#allocation186_spill] sm:$0xff] %v6788_v16  ;;  %v1910_v63 = vmul.f32 %v1878_v56, %v1398_v36  ;;  %v1911_v54 = vmul.f32 %v1879_v12, %v1399_v11  ;;  %v2291_v30 = vsub.f32 %v9133_v47, %v5991_v26  ;;  %v9137_v12 = vceil.f32 %v6182_v5  ;;  %v9169_v16 = vld [vmem:[#allocation122_spill] sm:$0xff] }
 0x2fc   : > { %v8816_v56 = vfloor.f32 %v6357_v25  ;;  %v2248_v36 = vceil.f32 %v6010_v52  ;;  %v9140_v47 = vceil.f32 %v6201_v44  ;;  %vm1738_vm2 = vcmp.eq.f32.partialorder %v6739_v7, %v9169_v16 }
 0x2fd   : > { %1353 = vperm.xlu0 %4773, %v900_v20   ;;  %1958 = vmatmul.f32.vlgmr.msra.gmra.mxu0 %v1910_v63  ;;  %v6805_v32 = vpop.permute.xlu2 %2579  ;;  %v9136_v20 = vfloor.f32 %v6320_v8  ;;  %v2294_v28 = vsub.f32 %v9137_v12, %v6182_v5  ;;  %v2251_v12 = vceil.f32 %v6022_v18  ;;  %vm1739_vm4 = vcmp.eq.f32.partialorder %v6741_v57, %v9169_v16 }
 0x2fe   : > { %2023 = vmatmul.f32.vlgmr.msra.gmra.mxu1 %v1911_v54  ;;  %9135 = vst [vmem:[#allocation189_spill] sm:$0xff] %v6805_v32  ;;  %v2296_v1 = vsub.f32 %v2248_v36, %v6010_v52 }
 0x2ff   : > { %v6796_v10 = vpop.permute.xlu0 %1079 }
 0x301   : > { %2833 = vperm.xlu2 %4772, %v2291_v30   ;;  %2828 = vperm.xlu1 %4771, %v2290_v22   ;;  %v2297_v30 = vsub.f32 %v9140_v47, %v6201_v44  ;;  %v2299_v47 = vsub.f32 %v2251_v12, %v6022_v18 }
 0x302   : > { %v6802_v46 = vpop.permute.xlu1 %2559 }
 0x303   : > { %9134 = vst [vmem:[#allocation188_spill] sm:$0xff] %v6802_v46 }
 0x305   : > { %2332 = vperm.xlu0 %4773, %v9136_v20   ;;  %v6821_v63 = vpop.permute.xlu2 %2594  ;;  %v8818_v20 = vfloor.f32 %v6377_v27 }
 0x306   : > { %9139 = vst [vmem:[#allocation191_spill] sm:$0xff] %v6821_v63 }
 0x307   : > { %v6809_v11 = vpop.permute.xlu0 %1094 }
 0x309   : > { %2848 = vperm.xlu2 %4772, %v2294_v28   ;;  %2843 = vperm.xlu1 %4771, %v2293_v0   ;;  %v9142_v0 = vceil.f32 %v6223_v9 }
 0x30a   : > { %v6815_v21 = vpop.permute.xlu1 %2574 }
 0x30b   : > { %9138 = vst [vmem:[#allocation190_spill] sm:$0xff] %v6815_v21 }
 0x30d   : > { %2357 = vperm.xlu0 %4773, %v8816_v56   ;;  %v2300_v56 = vsub.f32 %v9142_v0, %v6223_v9  ;;  %v6841_v52 = vpop.permute.xlu2 %2625  ;;  %v9143_v0 = vceil.f32 %v6250_v39 }
 0x30f   : > { %v6823_v54 = vpop.permute.xlu0 %1109  ;;  %v2303_v34 = vsub.f32 %v9143_v0, %v6250_v39 }
 0x311   : > { %2863 = vperm.xlu2 %4772, %v2297_v30   ;;  %2858 = vperm.xlu1 %4771, %v2296_v1   ;;  %v8820_v30 = vfloor.f32 %v6395_v58  ;;  %v2254_v1 = vceil.f32 %v6039_v17 }
 0x312   : > { %v6829_v22 = vpop.permute.xlu1 %2589 }
 0x313   : > { %9141 = vst [vmem:[#allocation192_spill] sm:$0xff] %v6829_v22  ;;  %v2302_v18 = vsub.f32 %v2254_v1, %v6039_v17  ;;  %v9145_v22 = vceil.f32 %v6051_v33  ;;  %v9146_v17 = vceil.f32 %v6216_v59 }
 0x315   : > { %2372 = vperm.xlu0 %4773, %v8818_v20  }
 0x317   : > { %v6835_v28 = vpop.permute.xlu0 %1124 }
 0x319   : > { %2878 = vperm.xlu2 %4772, %v2300_v56   ;;  %2873 = vperm.xlu1 %4771, %v2299_v47   ;;  %v6855_v56 = vpop.permute.xlu2 %2640  ;;  %v8821_v47 = vfloor.f32 %v6413_v45 }
 0x31a   : > { %v6845_v31 = vpop.permute.xlu1 %2620  ;;  %9144 = vst [vmem:[#allocation193_spill] sm:$0xff] %v6855_v56 }
 0x31d   : > { %2387 = vperm.xlu0 %4773, %v8820_v30  }
 0x31f   : > { %v6849_v20 = vpop.permute.xlu0 %1139 }
 0x321   : > { %2893 = vperm.xlu2 %4772, %v2303_v34   ;;  %2888 = vperm.xlu1 %4771, %v2302_v18   ;;  %v2259_v34 = vsub.f32 %v9146_v17, %v6216_v59  ;;  %v6869_v0 = vpop.permute.xlu2 %2655  ;;  %v9152_v59 = vceil.f32 %v6085_v42 }
 0x322   : > { %v6860_v63 = vpop.permute.xlu1 %2635  ;;  %9147 = vst [vmem:[#allocation194_spill] sm:$0xff] %v6869_v0 }
 0x325   : > { %2402 = vperm.xlu0 %4773, %v8821_v47   ;;  %v9149_v47 = vceil.f32 %v6068_v40 }
 0x327   : > { %v6862_v30 = vpop.permute.xlu0 %1186 }
 0x328   : > { %vm1258_vm0 = vcmp.eq.f32.partialorder %v6725_v55, %v6862_v30  ;;  %vm1259_vm1 = vcmp.eq.f32.partialorder %v6727_v24, %v6862_v30  ;;  %v9171_v30 = vceil.f32 %v6320_v8 }
 0x329   : > { %2924 = vperm.xlu2 %4772, %v2242_v14   ;;  %2919 = vperm.xlu1 %4771, %v9145_v22   ;;  %v9150_v14 = vceil.f32 %v6238_v6  ;;  %v6880_v22 = vpop.permute.xlu2 %2670 }
 0x32a   : > { %v6873_v32 = vpop.permute.xlu1 %2650  ;;  %9151 = vst [vmem:[#allocation196_spill] sm:$0xff] %v6880_v22 }
 0x32b   : > { %9148 = vst [vmem:[#allocation195_spill] sm:$0xff] %v6873_v32  ;;  %v2262_v21 = vsub.f32 %v9150_v14, %v6238_v6  ;;  %v9156_v6 = vceil.f32 %v6102_v61 }
 0x32d   : > { %2433 = vperm.xlu0 %4773, %v2259_v34  }
 0x32f   : > { %v6871_v18 = vpop.permute.xlu0 %1201 }
 0x331   : > { %2939 = vperm.xlu2 %4772, %v2245_v48   ;;  %2934 = vperm.xlu1 %4771, %v9149_v47   ;;  %v9154_v48 = vceil.f32 %v6267_v19  ;;  %v6893_v0 = vpop.permute.xlu2 %2685 }
 0x332   : > { %v6886_v17 = vpop.permute.xlu1 %2665  ;;  %9155 = vst [vmem:[#allocation198_spill] sm:$0xff] %v6893_v0  ;;  %v9165_v0 = vld [vmem:[#allocation12_spill] sm:$0xff] }
 0x333   : > { %9153 = vst [vmem:[#allocation197_spill] sm:$0xff] %v6886_v17  ;;  %v2265_v34 = vsub.f32 %v9154_v48, %v6267_v19  ;;  %v9159_v19 = vceil.f32 %v6119_v35  ;;  %vm1256_vm14 = vcmp.eq.f32.partialorder %v6725_v55, %v9165_v0  ;;  %vm1257_vm15 = vcmp.eq.f32.partialorder %v6727_v24, %v9165_v0  ;;  %v9167_v17 = vld [vmem:[#allocation80_spill] sm:$0xff] }
 0x335   : > { %2448 = vperm.xlu0 %4773, %v2262_v21   ;;  %v9157_v21 = vceil.f32 %v6291_v53 }
 0x337   : > { %v6882_v37 = vpop.permute.xlu0 %1216 }
 0x339   : > { %2954 = vperm.xlu2 %4772, %v2248_v36   ;;  %2949 = vperm.xlu1 %4771, %v9152_v59   ;;  %v2268_v36 = vsub.f32 %v9157_v21, %v6291_v53  ;;  %v6906_v48 = vpop.permute.xlu2 %2732  ;;  %v9161_v53 = vld [vmem:[#allocation132_spill] sm:$0xff] }
 0x33a   : > { %v6900_v14 = vpop.permute.xlu1 %2680  ;;  %vm1736_vm10 = vcmp.eq.f32.partialorder %v6739_v7, %v9161_v53  ;;  %vm1737_vm11 = vcmp.eq.f32.partialorder %v6741_v57, %v9161_v53 }
 0x33b   : > { %9158 = vst [vmem:[#allocation199_spill] sm:$0xff] %v6900_v14 }
 0x33d   : > { %2463 = vperm.xlu0 %4773, %v2265_v34  }
 0x33f   : > { %v6891_v47 = vpop.permute.xlu0 %1231 }
 0x341   : > { %2969 = vperm.xlu2 %4772, %v2251_v12   ;;  %2964 = vperm.xlu1 %4771, %v9156_v6   ;;  %v9160_v12 = vceil.f32 %v6315_v29  ;;  %v9163_v6 = vld [vmem:[#allocation137_spill] sm:$0xff] }
 0x342   : > { %v1849_v21 = vsel %vm1737_vm11, %v9163_v6, 0.0 }
 0x343   : > { %v2271_v34 = vsub.f32 %v9160_v12, %v6315_v29  ;;  %v1848_v29 = vsel %vm1736_vm10, %v9163_v6, 0.0  ;;  %v6931_v53 = vpop.permute.xlu1 %2727  ;;  %v1625_v6 = vsel %vm1513_vm9, %v9167_v17, 0.0 }
 0x344   : > { %v1881_v32 = vadd.f32 %v1849_v21, %v1625_v6  ;;  %v9172_v21 = vfloor.f32 %v5991_v26 }
 0x345   : > { %2478 = vperm.xlu0 %4773, %v2268_v36   ;;  %v9164_v36 = vld [vmem:[#allocation58_spill] sm:$0xff] }
 0x347   : > { %v6902_v59 = vpop.permute.xlu0 %1246 }
 0x349   : > { %2984 = vperm.xlu2 %4772, %v2254_v1   ;;  %2979 = vperm.xlu1 %4771, %v9159_v19   ;;  %v9162_v1 = vld [vmem:[#allocation36_spill] sm:$0xff] }
 0x34a   : > { %vm1032_vm12 = vcmp.eq.f32.partialorder %v6725_v55, %v9162_v1  ;;  %vm1033_vm13 = vcmp.eq.f32.partialorder %v6727_v24, %v9162_v1  ;;  %v9166_v1 = vfloor.f32 %v6051_v33 }
 0x34b   : > { %v1144_v19 = vsel %vm1032_vm12, %v9164_v36, 0.0  ;;  %v1145_v12 = vsel %vm1033_vm13, %v9164_v36, 0.0 }
 0x34c   : > { %v2305_v22 = vsub.f32 %v6051_v33, %v9166_v1  ;;  %v9168_v33 = vceil.f32 %v6138_v3 }
 0x34d   : > { %2493 = vperm.xlu0 %4773, %v2271_v34   ;;  %v1624_v34 = vsel %vm1512_vm8, %v9167_v17, 0.0 }
 0x34e   : > { %v1880_v0 = vadd.f32 %v1848_v29, %v1624_v34  ;;  %v9175_v34 = vld [vmem:[#allocation110_spill] sm:$0xff] }
 0x34f   : > { %v1294_v14 = vpop.permute.xlu0 %1293  ;;  %v1850_v6 = vsel %vm1738_vm2, %v9175_v34, 0.0 }
 0x350   : > { %v1368_v36 = vsel %vm1256_vm14, %v1294_v14, 0.0  ;;  %v1369_v46 = vsel %vm1257_vm15, %v1294_v14, 0.0 }
 0x351   : > { %3015 = vperm.xlu2 %4772, %v2305_v22   ;;  %2994 = vperm.xlu1 %4771, %v9168_v33   ;;  %v1400_v1 = vadd.f32 %v1368_v36, %v1144_v19  ;;  %v1401_v56 = vadd.f32 %v1369_v46, %v1145_v12  ;;  %v9170_v22 = vld [vmem:[#allocation85_spill] sm:$0xff]  ;;  %v6959_v46 = vpop.permute.xlu2 %2747  ;;  %v1146_v12 = vsel %vm1034_vm3, %v9174_v51, 0.0  ;;  %v9176_v36 = vld [vmem:[#allocation91_spill] sm:$0xff]  ;;  %v1147_v33 = vsel %vm1035_vm5, %v9174_v51, 0.0 }
 0x352   : > { %v1370_v14 = vsel %vm1258_vm0, %v9170_v22, 0.0  ;;  %v1371_v29 = vsel %vm1259_vm1, %v9170_v22, 0.0  ;;  %vm1514_vm6 = vcmp.eq.f32.partialorder %v6739_v7, %v9176_v36  ;;  %vm1515_vm7 = vcmp.eq.f32.partialorder %v6741_v57, %v9176_v36  ;;  %v6983_v22 = vpop.permute.xlu1 %2742 }
 0x353   : > { %v1912_v60 = vmul.f32 %v1880_v0, %v1400_v1  ;;  %v1913_v17 = vmul.f32 %v1881_v32, %v1401_v56  ;;  %v2307_v32 = vsub.f32 %v5991_v26, %v9172_v21  ;;  %v9173_v56 = vfloor.f32 %v6068_v40  ;;  %v9178_v21 = vld [vmem:[#allocation45_spill] sm:$0xff] }
 0x354   : > { %v1402_v0 = vadd.f32 %v1370_v14, %v1146_v12  ;;  %v1851_v26 = vsel %vm1739_vm4, %v9175_v34, 0.0  ;;  %vm1036_vm8 = vcmp.eq.f32.partialorder %v6725_v55, %v9178_v21  ;;  %vm1037_vm9 = vcmp.eq.f32.partialorder %v6727_v24, %v9178_v21  ;;  %v9180_v34 = vld [vmem:[#allocation67_spill] sm:$0xff] }
 0x355   : > { %2524 = vperm.xlu0 %4773, %v9171_v30   ;;  %1961 = vmatmul.f32.gmra.mxu0 %v1912_v60  ;;  %v2308_v19 = vsub.f32 %v6068_v40, %v9173_v56  ;;  %v9177_v40 = vld [vmem:[#allocation115_spill] sm:$0xff]  ;;  %v1403_v60 = vadd.f32 %v1371_v29, %v1147_v33  ;;  %v1148_v16 = vsel %vm1036_vm8, %v6796_v10, 0.0  ;;  %v9179_v29 = vfloor.f32 %v6182_v5 }
 0x356   : > { %2026 = vmatmul.f32.gmra.mxu1 %v1913_v17  ;;  %v1626_v1 = vsel %vm1514_vm6, %v9177_v40, 0.0  ;;  %v1627_v17 = vsel %vm1515_vm7, %v9177_v40, 0.0  ;;  %vm1260_vm10 = vcmp.eq.f32.partialorder %v6725_v55, %v9180_v34  ;;  %v9183_v36 = vfloor.f32 %v6085_v42 }
 0x357   : > { %v1309_v8 = vpop.permute.xlu0 %1308  ;;  %v1882_v14 = vadd.f32 %v1850_v6, %v1626_v1  ;;  %v1883_v30 = vadd.f32 %v1851_v26, %v1627_v17  ;;  %v2310_v12 = vsub.f32 %v6182_v5, %v9179_v29  ;;  %v9182_v6 = vceil.f32 %v6235_v43  ;;  %v9184_v5 = vld [vmem:[#allocation73_spill] sm:$0xff] }
 0x358   : > { %vm1261_vm12 = vcmp.eq.f32.partialorder %v6727_v24, %v9180_v34  ;;  %v1372_v33 = vsel %vm1260_vm10, %v9184_v5, 0.0  ;;  %v9185_v26 = vld [vmem:[#allocation149_spill] sm:$0xff]  ;;  %v9188_v34 = vld [vmem:[#allocation38_spill] sm:$0xff]  ;;  %vm1264_vm8 = vcmp.eq.f32.partialorder %v6725_v55, %v6871_v18 }
 0x359   : > { %3030 = vperm.xlu2 %4772, %v2308_v19   ;;  %3025 = vperm.xlu1 %4771, %v2307_v32   ;;  %v1914_v56 = vmul.f32 %v1882_v14, %v1402_v0  ;;  %v1915_v51 = vmul.f32 %v1883_v30, %v1403_v60  ;;  %v9181_v32 = vld [vmem:[#allocation97_spill] sm:$0xff]  ;;  %v1149_v19 = vsel %vm1037_vm9, %v6796_v10, 0.0  ;;  %v2311_v0 = vsub.f32 %v6085_v42, %v9183_v36  ;;  %v7013_v60 = vpop.permute.xlu2 %2757 }
 0x35a   : > { %vm1740_vm11 = vcmp.eq.f32.partialorder %v6739_v7, %v9181_v32  ;;  %vm1741_vm13 = vcmp.eq.f32.partialorder %v6741_v57, %v9181_v32  ;;  %v1373_v10 = vsel %vm1261_vm12, %v9184_v5, 0.0  ;;  %v9186_v43 = vld [vmem:[#allocation101_spill] sm:$0xff]  ;;  %v1404_v17 = vadd.f32 %v1372_v33, %v1148_v16  ;;  %v9191_v5 = vld [vmem:[#allocation94_spill] sm:$0xff]  ;;  %v9192_v33 = vld [vmem:[#allocation135_spill] sm:$0xff] }
 0x35b   : > { %v1852_v40 = vsel %vm1740_vm11, %v9185_v26, 0.0  ;;  %vm1516_vm14 = vcmp.eq.f32.partialorder %v6739_v7, %v9186_v43  ;;  %v1853_v1 = vsel %vm1741_vm13, %v9185_v26, 0.0  ;;  %vm1517_vm15 = vcmp.eq.f32.partialorder %v6741_v57, %v9186_v43  ;;  %v9187_v14 = vld [vmem:[#allocation105_spill] sm:$0xff]  ;;  %v9194_v43 = vld [vmem:[#allocation140_spill] sm:$0xff] }
 0x35c   : > { %v1628_v30 = vsel %vm1516_vm14, %v9187_v14, 0.0  ;;  %v1405_v21 = vadd.f32 %v1373_v10, %v1149_v19  ;;  %vm1038_vm0 = vcmp.eq.f32.partialorder %v6725_v55, %v9188_v34  ;;  %v9189_v32 = vld [vmem:[#allocation13_spill] sm:$0xff]  ;;  %vm1039_vm2 = vcmp.eq.f32.partialorder %v6727_v24, %v9188_v34 }
 0x35d   : > { %2539 = vperm.xlu0 %4773, %v9182_v6   ;;  %1964 = vmatmul.f32.gmra.mxu0 %v1914_v56  ;;  %v1629_v56 = vsel %vm1517_vm15, %v9187_v14, 0.0  ;;  %vm1262_vm1 = vcmp.eq.f32.partialorder %v6725_v55, %v9189_v32  ;;  %v7025_v6 = vpop.permute.xlu1 %2752  ;;  %vm1263_vm3 = vcmp.eq.f32.partialorder %v6727_v24, %v9189_v32  ;;  %vm1518_vm4 = vcmp.eq.f32.partialorder %v6739_v7, %v9191_v5 }
 0x35e   : > { %2029 = vmatmul.f32.gmra.mxu1 %v1915_v51  ;;  %v1884_v51 = vadd.f32 %v1852_v40, %v1628_v30  ;;  %v1885_v29 = vadd.f32 %v1853_v1, %v1629_v56  ;;  %v1374_v19 = vsel %vm1262_vm1, %v1309_v8, 0.0  ;;  %vm1742_vm5 = vcmp.eq.f32.partialorder %v6739_v7, %v9192_v33 }
 0x35f   : > { %v7015_v42 = vpop.permute.xlu0 %1323  ;;  %v1375_v26 = vsel %vm1263_vm3, %v1309_v8, 0.0  ;;  %v9193_v40 = vceil.f32 %v6259_v41  ;;  %vm1519_vm6 = vcmp.eq.f32.partialorder %v6741_v57, %v9191_v5  ;;  %vm1743_vm7 = vcmp.eq.f32.partialorder %v6741_v57, %v9192_v33 }
 0x360   : > { %v1916_v16 = vmul.f32 %v1884_v51, %v1404_v17  ;;  %v1917_v36 = vmul.f32 %v1885_v29, %v1405_v21  ;;  %v1854_v1 = vsel %vm1742_vm5, %v9194_v43, 0.0  ;;  %v1855_v17 = vsel %vm1743_vm7, %v9194_v43, 0.0  ;;  %v9197_v51 = vld [vmem:[#allocation83_spill] sm:$0xff] }
 0x361   : > { %3045 = vperm.xlu2 %4772, %v2311_v0   ;;  %3040 = vperm.xlu1 %4771, %v2310_v12   ;;  %v9190_v12 = vld [vmem:[#allocation22_spill] sm:$0xff]  ;;  %v9195_v8 = vfloor.f32 %v6102_v61  ;;  %v9196_v30 = vfloor.f32 %v6201_v44  ;;  %v1630_v29 = vsel %vm1518_vm4, %v9197_v51, 0.0  ;;  %v7056_v32 = vpop.permute.xlu2 %2772  ;;  %vm1265_vm9 = vcmp.eq.f32.partialorder %v6727_v24, %v6871_v18 }
 0x362   : > { %v1150_v0 = vsel %vm1038_vm0, %v9190_v12, 0.0  ;;  %v1151_v10 = vsel %vm1039_vm2, %v9190_v12, 0.0  ;;  %v9201_v18 = vceil.f32 %v6284_v15  ;;  %v9206_v15 = vfloor.f32 %v6119_v35 }
 0x363   : > { %v2314_v41 = vsub.f32 %v6102_v61, %v9195_v8  ;;  %v2313_v21 = vsub.f32 %v6201_v44, %v9196_v30  ;;  %v1406_v56 = vadd.f32 %v1374_v19, %v1150_v0  ;;  %v1407_v34 = vadd.f32 %v1375_v26, %v1151_v10  ;;  %v9198_v19 = vld [vmem:[#allocation125_spill] sm:$0xff]  ;;  %v9199_v0 = vld [vmem:[#allocation88_spill] sm:$0xff] }
 0x364   : > { %v1631_v61 = vsel %vm1519_vm6, %v9197_v51, 0.0  ;;  %vm1744_vm10 = vcmp.eq.f32.partialorder %v6739_v7, %v9198_v19  ;;  %vm1745_vm11 = vcmp.eq.f32.partialorder %v6741_v57, %v9198_v19  ;;  %v1376_v33 = vsel %vm1264_vm8, %v9199_v0, 0.0  ;;  %v9200_v26 = vld [vmem:[#allocation48_spill] sm:$0xff] }
 0x365   : > { %2554 = vperm.xlu0 %4773, %v9193_v40   ;;  %1967 = vmatmul.f32.gmra.mxu0 %v1916_v16  ;;  %v1886_v16 = vadd.f32 %v1854_v1, %v1630_v29  ;;  %v1887_v44 = vadd.f32 %v1855_v17, %v1631_v61  ;;  %vm1040_vm12 = vcmp.eq.f32.partialorder %v6725_v55, %v9200_v26  ;;  %v7073_v5 = vpop.permute.xlu1 %2767  ;;  %v1377_v40 = vsel %vm1265_vm9, %v9199_v0, 0.0  ;;  %v9202_v10 = vld [vmem:[#allocation52_spill] sm:$0xff] }
 0x366   : > { %2032 = vmatmul.f32.gmra.mxu1 %v1917_v36  ;;  %vm1041_vm13 = vcmp.eq.f32.partialorder %v6727_v24, %v9200_v26  ;;  %v1152_v43 = vsel %vm1040_vm12, %v9202_v10, 0.0  ;;  %v9203_v17 = vfloor.f32 %v6223_v9  ;;  %v2317_v51 = vsub.f32 %v6119_v35, %v9206_v15  ;;  %v9208_v35 = vld [vmem:[#allocation41_spill] sm:$0xff]  ;;  %v9215_v15 = vld [vmem:[#allocation103_spill] sm:$0xff] }
 0x367   : > { %v7045_v14 = vpop.permute.xlu0 %1338  ;;  %v1918_v36 = vmul.f32 %v1886_v16, %v1406_v56  ;;  %v1919_v12 = vmul.f32 %v1887_v44, %v1407_v34  ;;  %v1153_v1 = vsel %vm1041_vm13, %v9202_v10, 0.0  ;;  %v1408_v29 = vadd.f32 %v1376_v33, %v1152_v43  ;;  %v9210_v10 = vld [vmem:[#allocation69_spill] sm:$0xff]  ;;  %v9211_v43 = vld [vmem:[#allocation99_spill] sm:$0xff] }
 0x368   : > { %v2316_v8 = vsub.f32 %v6223_v9, %v9203_v17  ;;  %v9207_v9 = vld [vmem:[#allocation119_spill] sm:$0xff]  ;;  %v1409_v61 = vadd.f32 %v1377_v40, %v1153_v1  ;;  %vm1042_vm0 = vcmp.eq.f32.partialorder %v6725_v55, %v9208_v35  ;;  %vm1043_vm1 = vcmp.eq.f32.partialorder %v6727_v24, %v9208_v35 }
 0x369   : > { %3060 = vperm.xlu2 %4772, %v2314_v41   ;;  %3055 = vperm.xlu1 %4771, %v2313_v21   ;;  %v9204_v41 = vld [vmem:[#allocation113_spill] sm:$0xff]  ;;  %v7101_v0 = vpop.permute.xlu2 %2787  ;;  %v1154_v33 = vsel %vm1042_vm0, %v6809_v11, 0.0  ;;  %vm1266_vm2 = vcmp.eq.f32.partialorder %v6725_v55, %v9210_v10  ;;  %vm1267_vm3 = vcmp.eq.f32.partialorder %v6727_v24, %v9210_v10  ;;  %vm1746_vm4 = vcmp.eq.f32.partialorder %v6739_v7, %v9211_v43 }
 0x36a   : > { %v1856_v30 = vsel %vm1744_vm10, %v9204_v41, 0.0  ;;  %v9205_v21 = vld [vmem:[#allocation65_spill] sm:$0xff]  ;;  %v1857_v34 = vsel %vm1745_vm11, %v9204_v41, 0.0  ;;  %v1155_v1 = vsel %vm1043_vm1, %v6809_v11, 0.0  ;;  %v9212_v17 = vceil.f32 %v6313_v62 }
 0x36b   : > { %vm1520_vm14 = vcmp.eq.f32.partialorder %v6739_v7, %v9205_v21  ;;  %vm1521_vm15 = vcmp.eq.f32.partialorder %v6741_v57, %v9205_v21  ;;  %vm1747_vm5 = vcmp.eq.f32.partialorder %v6741_v57, %v9211_v43  ;;  %vm1522_vm6 = vcmp.eq.f32.partialorder %v6739_v7, %v9215_v15 }
 0x36c   : > { %v1632_v16 = vsel %vm1520_vm14, %v9207_v9, 0.0  ;;  %v1633_v44 = vsel %vm1521_vm15, %v9207_v9, 0.0  ;;  %v1859_v62 = vsel %vm1747_vm5, %v6434_v4, 0.0  ;;  %vm1523_vm7 = vcmp.eq.f32.partialorder %v6741_v57, %v9215_v15  ;;  %v9216_v9 = vld [vmem:[#allocation108_spill] sm:$0xff] }
 0x36d   : > { %2569 = vperm.xlu0 %4773, %v9201_v18   ;;  %1970 = vmatmul.f32.gmra.mxu0 %v1918_v36  ;;  %v1888_v36 = vadd.f32 %v1856_v30, %v1632_v16  ;;  %v9209_v18 = vfloor.f32 %v6250_v39  ;;  %v9214_v30 = vfloor.f32 %v6138_v3  ;;  %v1634_v16 = vsel %vm1522_vm6, %v9216_v9, 0.0 }
 0x36e   : > { %2035 = vmatmul.f32.gmra.mxu1 %v1919_v12  ;;  %v1889_v12 = vadd.f32 %v1857_v34, %v1633_v44  ;;  %vm1044_vm10 = vcmp.eq.f32.partialorder %v6725_v55, %v6698_v13  ;;  %vm2072_vm11 = vcmask 64512   ;;  %vm1045_vm12 = vcmp.eq.f32.partialorder %v6727_v24, %v6698_v13 }
 0x36f   : > { %v7086_v56 = vpop.permute.xlu0 %1353  ;;  %v1920_v19 = vmul.f32 %v1888_v36, %v1408_v29  ;;  %v2319_v40 = vsub.f32 %v6250_v39, %v9209_v18  ;;  %v1858_v39 = vsel %vm1746_vm4, %v6434_v4, 0.0  ;;  %v2320_v21 = vsub.f32 %v6138_v3, %v9214_v30  ;;  %v9217_v36 = vld [vmem:[#allocation62_spill] sm:$0xff] }
 0x370   : > { %v1921_v26 = vmul.f32 %v1889_v12, %v1409_v61  ;;  %v1635_v61 = vsel %vm1523_vm7, %v9216_v9, 0.0  ;;  %v1890_v44 = vadd.f32 %v1858_v39, %v1634_v16  ;;  %vm1268_vm8 = vcmp.eq.f32.partialorder %v6725_v55, %v9217_v36  ;;  %v9218_v12 = vld [vmem:[#allocation116_spill] sm:$0xff]  ;;  %v9222_v39 = vld [vmem:[#allocation143_spill] sm:$0xff]  ;;  %v9224_v9 = vld [vmem:[#allocation86_spill] sm:$0xff] }
 0x371   : > { %3075 = vperm.xlu2 %4772, %v2317_v51   ;;  %3070 = vperm.xlu1 %4771, %v2316_v8   ;;  %v9213_v8 = vld [vmem:[#allocation78_spill] sm:$0xff]  ;;  %v7130_v51 = vpop.permute.xlu1 %2782  ;;  %v9219_v35 = vfloor.f32 %v9218_v12  ;;  %vm1269_vm9 = vcmp.eq.f32.partialorder %v6727_v24, %v9217_v36  ;;  %vm1270_vm1 = vcmp.eq.f32.partialorder %v6725_v55, %v6882_v37 }
 0x372   : > { %v1378_v41 = vsel %vm1266_vm2, %v9213_v8, 0.0  ;;  %v1379_v11 = vsel %vm1267_vm3, %v9213_v8, 0.0  ;;  %v7156_v8 = vpop.permute.xlu2 %2802  ;;  %vm1271_vm2 = vcmp.eq.f32.partialorder %v6727_v24, %v6882_v37 }
 0x373   : > { %v1410_v34 = vadd.f32 %v1378_v41, %v1154_v33  ;;  %v1411_v3 = vadd.f32 %v1379_v11, %v1155_v1  ;;  %v1891_v33 = vadd.f32 %v1859_v62, %v1635_v61  ;;  %v9220_v1 = vld [vmem:[#allocation96_spill] sm:$0xff]  ;;  %v1381_v41 = vsel %vm1269_vm9, %v7015_v42, 0.0 }
 0x374   : > { %vm1524_vm13 = vcmp.eq.f32.partialorder %v6739_v7, %v9220_v1  ;;  %vm1525_vm15 = vcmp.eq.f32.partialorder %v6741_v57, %v9220_v1  ;;  %v9231_v1 = vld [vmem:[#allocation54_spill] sm:$0xff] }
 0x375   : > { %2584 = vperm.xlu0 %4773, %v9212_v17   ;;  %1973 = vmatmul.f32.gmra.mxu0 %v1920_v19  ;;  %v2273_v19 = vsub.f32 %v9218_v12, %v9219_v35  ;;  %v1922_v18 = vmul.f32 %v1890_v44, %v1410_v34  ;;  %v1923_v43 = vmul.f32 %v1891_v33, %v1411_v3  ;;  %v9221_v17 = vld [vmem:[#allocation138_spill] sm:$0xff]  ;;  %v1636_v16 = vsel %vm1524_vm13, %v9224_v9, 0.0  ;;  %v9226_v12 = vld [vmem:[#allocation128_spill] sm:$0xff] }
 0x376   : > { %2038 = vmatmul.f32.gmra.mxu1 %v1921_v26  ;;  %vm1748_vm14 = vcmp.eq.f32.partialorder %v6739_v7, %v9221_v17  ;;  %vm1749_vm0 = vcmp.eq.f32.partialorder %v6741_v57, %v9221_v17  ;;  %v1637_v36 = vsel %vm1525_vm15, %v9224_v9, 0.0  ;;  %vm1750_vm3 = vcmp.eq.f32.partialorder %v6739_v7, %v9226_v12  ;;  %v9227_v35 = vld [vmem:[#allocation120_spill] sm:$0xff]  ;;  %v9234_v9 = vld [vmem:[#allocation123_spill] sm:$0xff] }
 0x377   : > { %v7132_v29 = vpop.permute.xlu0 %2332  ;;  %v1860_v30 = vsel %vm1748_vm14, %v9222_v39, 0.0  ;;  %v1861_v11 = vsel %vm1749_vm0, %v9222_v39, 0.0  ;;  %vm1751_vm4 = vcmp.eq.f32.partialorder %v6741_v57, %v9226_v12 }
 0x378   : > { %v1892_v44 = vadd.f32 %v1860_v30, %v1636_v16  ;;  %v1893_v13 = vadd.f32 %v1861_v11, %v1637_v36 }
 0x379   : > { %3090 = vperm.xlu2 %4772, %v2320_v21   ;;  %3085 = vperm.xlu1 %4771, %v2319_v40   ;;  %v1380_v40 = vsel %vm1268_vm8, %v7015_v42, 0.0  ;;  %v9223_v21 = vld [vmem:[#allocation7_spill] sm:$0xff]  ;;  %v7185_v61 = vpop.permute.xlu1 %2797 }
 0x37a   : > { %v1959_v4 = vpop.f32.mrf.mxu0  ;;  %v1156_v42 = vsel %vm1044_vm10, %v9223_v21, 0.0  ;;  %v1157_v34 = vsel %vm1045_vm12, %v9223_v21, 0.0  ;;  %v9233_v21 = vld [vmem:[#allocation68_spill] sm:$0xff] }
 0x37b   : > { %v2024_v26 = vpop.f32.mrf.mxu1  ;;  %v1412_v62 = vadd.f32 %v1380_v40, %v1156_v42  ;;  %v1413_v3 = vadd.f32 %v1381_v41, %v1157_v34  ;;  %v9229_v40 = vld [vmem:[#allocation90_spill] sm:$0xff]  ;;  %v9232_v41 = vld [vmem:[#allocation117_spill] sm:$0xff]  ;;  %vm1526_vm7 = vcmp.eq.f32.partialorder %v6739_v7, %v9233_v21  ;;  %v7213_v42 = vpop.permute.xlu2 %2833  ;;  %vm1527_vm8 = vcmp.eq.f32.partialorder %v6741_v57, %v9233_v21 }
 0x37c   : > { %v2025_v10 = vadd.f32 %v2024_v26, %v1959_v4  ;;  %v9225_v4 = vmov 0   ;;  %v1383_v37 = vsel %vm1271_vm2, %v9229_v40, 0.0  ;;  %v1862_v39 = vsel %vm1750_vm3, %v9232_v41, 0.0 }
 0x37d   : > { %2615 = vperm.xlu0 %4773, %v2273_v19   ;;  %1976 = vmatmul.f32.gmra.mxu0 %v1922_v18  ;;  %v9228_v19 = vfloor.f32 %v9227_v35  ;;  %v1924_v26 = vmul.f32 %v1892_v44, %v1412_v62  ;;  %v1925_v18 = vmul.f32 %v1893_v13, %v1413_v3  ;;  %v1863_v34 = vsel %vm1751_vm4, %v9232_v41, 0.0  ;;  %v9235_v13 = vld [vmem:[#allocation42_spill] sm:$0xff] }
 0x37e   : > { %2073 = vst.msk [vmem:[%s7164_s6] sm:$0xff] %vm2072_vm11, %v2025_v10  ;;  %2041 = vmatmul.f32.gmra.mxu1 %v1923_v43  ;;  %v1382_v10 = vsel %vm1270_vm1, %v9229_v40, 0.0  ;;  %v9230_v43 = vld [vmem:[#allocation51_spill] sm:$0xff]  ;;  %v1638_v16 = vsel %vm1526_vm7, %v9234_v9, 0.0  ;;  %v1639_v44 = vsel %vm1527_vm8, %v9234_v9, 0.0  ;;  %vm1048_vm9 = vcmp.eq.f32.partialorder %v6725_v55, %v9235_v13  ;;  %v9237_v40 = vld [vmem:[#allocation74_spill] sm:$0xff] }
 0x37f   : > { %v7173_v15 = vpop.permute.xlu0 %2357  ;;  %v2276_v33 = vsub.f32 %v9227_v35, %v9228_v19  ;;  %vm1046_vm5 = vcmp.eq.f32.partialorder %v6725_v55, %v9230_v43  ;;  %vm1047_vm6 = vcmp.eq.f32.partialorder %v6727_v24, %v9230_v43  ;;  %v1894_v36 = vadd.f32 %v1862_v39, %v1638_v16  ;;  %v9241_v39 = vld [vmem:[#allocation106_spill] sm:$0xff] }
 0x380   : > { %v1158_v17 = vsel %vm1046_vm5, %v9231_v1, 0.0  ;;  %v1159_v30 = vsel %vm1047_vm6, %v9231_v1, 0.0  ;;  %v9236_v19 = vfloor.f32 %v6357_v25  ;;  %vm1049_vm10 = vcmp.eq.f32.partialorder %v6727_v24, %v9235_v13  ;;  %v9240_v1 = vld [vmem:[#allocation153_spill] sm:$0xff] }
 0x381   : > { %4774 = vset.pattern.permute.xlu1 %v9225_v4  ;;  %4775 = vset.pattern.permute.xlu2 %v9225_v4  ;;  %v1414_v62 = vadd.f32 %v1382_v10, %v1158_v17  ;;  %v1415_v3 = vadd.f32 %v1383_v37, %v1159_v30  ;;  %v1895_v4 = vadd.f32 %v1863_v34, %v1639_v44  ;;  %v7227_v35 = vpop.permute.xlu1 %2828  ;;  %v9238_v10 = vld [vmem:[#allocation102_spill] sm:$0xff]  ;;  %v1161_v43 = vsel %vm1049_vm10, %v6823_v54, 0.0 }
 0x382   : > { %v2279_v12 = vsub.f32 %v6357_v25, %v9236_v19  ;;  %vm1272_vm12 = vcmp.eq.f32.partialorder %v6725_v55, %v9237_v40  ;;  %vm1752_vm13 = vcmp.eq.f32.partialorder %v6739_v7, %v9238_v10  ;;  %vm1273_vm14 = vcmp.eq.f32.partialorder %v6727_v24, %v9237_v40  ;;  %v9239_v25 = vld [vmem:[#allocation81_spill] sm:$0xff] }
 0x383   : > { %v1384_v37 = vsel %vm1272_vm12, %v9239_v25, 0.0  ;;  %vm1753_vm15 = vcmp.eq.f32.partialorder %v6741_v57, %v9238_v10  ;;  %v1864_v17 = vsel %vm1752_vm13, %v9240_v1, 0.0  ;;  %v1385_v41 = vsel %vm1273_vm14, %v9239_v25, 0.0  ;;  %v9246_v40 = vld [vmem:[#allocation141_spill] sm:$0xff] }
 0x384   : > { %vm1528_vm0 = vcmp.eq.f32.partialorder %v6739_v7, %v9241_v39  ;;  %vm1529_vm1 = vcmp.eq.f32.partialorder %v6741_v57, %v9241_v39  ;;  %v1417_v9 = vadd.f32 %v1385_v41, %v1161_v43  ;;  %vm1050_vm3 = vcmp.eq.f32.partialorder %v6725_v55, %v6715_v23 }
 0x385   : > { %2630 = vperm.xlu0 %4773, %v2276_v33   ;;  %1979 = vmatmul.f32.gmra.mxu0 %v1924_v26  ;;  %v1926_v33 = vmul.f32 %v1894_v36, %v1414_v62  ;;  %v1160_v26 = vsel %vm1048_vm9, %v6823_v54, 0.0  ;;  %v1865_v54 = vsel %vm1753_vm15, %v9240_v1, 0.0  ;;  %v9242_v62 = vld [vmem:[#allocation111_spill] sm:$0xff]  ;;  %v9244_v13 = vfloor.f32 %v6377_v27 }
 0x386   : > { %2044 = vmatmul.f32.gmra.mxu1 %v1925_v18  ;;  %v1927_v18 = vmul.f32 %v1895_v4, %v1415_v3  ;;  %v1416_v21 = vadd.f32 %v1384_v37, %v1160_v26  ;;  %v1640_v34 = vsel %vm1528_vm0, %v9242_v62, 0.0  ;;  %v1641_v16 = vsel %vm1529_vm1, %v9242_v62, 0.0  ;;  %v7256_v3 = vpop.permute.xlu2 %2848  ;;  %v9243_v4 = vld [vmem:[#allocation64_spill] sm:$0xff]  ;;  %v9248_v37 = vld [vmem:[#allocation31_spill] sm:$0xff] }
 0x387   : > { %v7215_v11 = vpop.permute.xlu0 %2372  ;;  %v1896_v44 = vadd.f32 %v1864_v17, %v1640_v34  ;;  %v1897_v36 = vadd.f32 %v1865_v54, %v1641_v16  ;;  %vm1274_vm2 = vcmp.eq.f32.partialorder %v6725_v55, %v9243_v4  ;;  %v2282_v19 = vsub.f32 %v6377_v27, %v9244_v13  ;;  %v9247_v27 = vld [vmem:[#allocation146_spill] sm:$0xff]  ;;  %v9249_v54 = vld [vmem:[#allocation89_spill] sm:$0xff] }
 0x388   : > { %vm1275_vm4 = vcmp.eq.f32.partialorder %v6727_v24, %v9243_v4  ;;  %vm1051_vm5 = vcmp.eq.f32.partialorder %v6727_v24, %v6715_v23  ;;  %vm1754_vm7 = vcmp.eq.f32.partialorder %v6739_v7, %v9246_v40  ;;  %vm1755_vm9 = vcmp.eq.f32.partialorder %v6741_v57, %v9246_v40 }
 0x389   : > { %v1929_v26 = vmul.f32 %v1897_v36, %v1417_v9  ;;  %v1387_v10 = vsel %vm1275_vm4, %v7045_v14, 0.0  ;;  %v7275_v43 = vpop.permute.xlu1 %2843  ;;  %v1866_v25 = vsel %vm1754_vm7, %v9247_v27, 0.0  ;;  %v1162_v1 = vsel %vm1050_vm3, %v9248_v37, 0.0 }
 0x38a   : > { %v1163_v39 = vsel %vm1051_vm5, %v9248_v37, 0.0  ;;  %vm1276_vm10 = vcmp.eq.f32.partialorder %v6725_v55, %v6891_v47  ;;  %vm1277_vm12 = vcmp.eq.f32.partialorder %v6727_v24, %v6891_v47  ;;  %v9251_v23 = vfloor.f32 %v6395_v58 }
 0x38b   : > { %v1419_v62 = vadd.f32 %v1387_v10, %v1163_v39  ;;  %v9257_v39 = vld [vmem:[#allocation126_spill] sm:$0xff] }
 0x38c   : > { %v2285_v4 = vsub.f32 %v6395_v58, %v9251_v23  ;;  %v9255_v58 = vld [vmem:[#allocation121_spill] sm:$0xff]  ;;  %v9259_v23 = vfloor.f32 %v6413_v45 }
 0x38d   : > { %2645 = vperm.xlu0 %4773, %v2279_v12   ;;  %1982 = vmatmul.f32.gmra.mxu0 %v1926_v33  ;;  %v1928_v12 = vmul.f32 %v1896_v44, %v1416_v21  ;;  %v1386_v33 = vsel %vm1274_vm2, %v7045_v14, 0.0  ;;  %v1867_v14 = vsel %vm1755_vm9, %v9247_v27, 0.0  ;;  %v9250_v44 = vld [vmem:[#allocation131_spill] sm:$0xff] }
 0x38e   : > { %2047 = vmatmul.f32.gmra.mxu1 %v1927_v18  ;;  %v9245_v18 = vld [vmem:[#allocation98_spill] sm:$0xff]  ;;  %v1418_v41 = vadd.f32 %v1386_v33, %v1162_v1  ;;  %vm1756_vm13 = vcmp.eq.f32.partialorder %v6739_v7, %v9250_v44  ;;  %v7301_v36 = vpop.permute.xlu2 %2863  ;;  %vm1757_vm14 = vcmp.eq.f32.partialorder %v6741_v57, %v9250_v44 }
 0x38f   : > { %v7250_v30 = vpop.permute.xlu0 %2387  ;;  %vm1530_vm6 = vcmp.eq.f32.partialorder %v6739_v7, %v9245_v18  ;;  %vm1531_vm8 = vcmp.eq.f32.partialorder %v6741_v57, %v9245_v18  ;;  %v9254_v18 = vld [vmem:[#allocation57_spill] sm:$0xff]  ;;  %v1868_v10 = vsel %vm1756_vm13, %v9255_v58, 0.0  ;;  %vm1056_vm13 = vcmp.eq.f32.partialorder %v6725_v55, %v6734_v38 }
 0x390   : > { %v1642_v21 = vsel %vm1530_vm6, %v9249_v54, 0.0  ;;  %v1643_v9 = vsel %vm1531_vm8, %v9249_v54, 0.0 }
 0x391   : > { %v1898_v34 = vadd.f32 %v1866_v25, %v1642_v21  ;;  %v1899_v16 = vadd.f32 %v1867_v14, %v1643_v9  ;;  %v9256_v25 = vld [vmem:[#allocation70_spill] sm:$0xff]  ;;  %v7319_v37 = vpop.permute.xlu1 %2858 }
 0x392   : > { %vm1532_vm1 = vcmp.eq.f32.partialorder %v6739_v7, %v9256_v25  ;;  %vm1533_vm2 = vcmp.eq.f32.partialorder %v6741_v57, %v9256_v25 }
 0x393   : > { %v1930_v13 = vmul.f32 %v1898_v34, %v1418_v41  ;;  %v1869_v41 = vsel %vm1757_vm14, %v9255_v58, 0.0  ;;  %v1644_v54 = vsel %vm1532_vm1, %v9257_v39, 0.0 }
 0x394   : > { %v1900_v34 = vadd.f32 %v1868_v10, %v1644_v54  ;;  %v9263_v10 = vld [vmem:[#allocation109_spill] sm:$0xff] }
 0x395   : > { %2660 = vperm.xlu0 %4773, %v2282_v19   ;;  %1985 = vmatmul.f32.gmra.mxu0 %v1928_v12  ;;  %v1931_v19 = vmul.f32 %v1899_v16, %v1419_v62  ;;  %v9252_v12 = vld [vmem:[#allocation93_spill] sm:$0xff]  ;;  %v1645_v62 = vsel %vm1533_vm2, %v9257_v39, 0.0  ;;  %v9258_v16 = vld [vmem:[#allocation44_spill] sm:$0xff]  ;;  %vm1534_vm9 = vcmp.eq.f32.partialorder %v6739_v7, %v9263_v10 }
 0x396   : > { %2050 = vmatmul.f32.gmra.mxu1 %v1929_v26  ;;  %v1388_v33 = vsel %vm1276_vm10, %v9252_v12, 0.0  ;;  %v9253_v26 = vld [vmem:[#allocation53_spill] sm:$0xff]  ;;  %v1389_v47 = vsel %vm1277_vm12, %v9252_v12, 0.0  ;;  %v1901_v9 = vadd.f32 %v1869_v41, %v1645_v62  ;;  %vm1054_vm3 = vcmp.eq.f32.partialorder %v6725_v55, %v9258_v16  ;;  %v9260_v12 = vld [vmem:[#allocation79_spill] sm:$0xff] }
 0x397   : > { %v7287_v17 = vpop.permute.xlu0 %2402  ;;  %vm1052_vm15 = vcmp.eq.f32.partialorder %v6725_v55, %v9253_v26  ;;  %vm1053_vm0 = vcmp.eq.f32.partialorder %v6727_v24, %v9253_v26  ;;  %vm1055_vm4 = vcmp.eq.f32.partialorder %v6727_v24, %v9258_v16  ;;  %v1166_v44 = vsel %vm1054_vm3, %v6835_v28, 0.0 }
 0x398   : > { %v1164_v40 = vsel %vm1052_vm15, %v9254_v18, 0.0  ;;  %v1165_v27 = vsel %vm1053_vm0, %v9254_v18, 0.0  ;;  %vm1278_vm5 = vcmp.eq.f32.partialorder %v6725_v55, %v9260_v12  ;;  %v1167_v26 = vsel %vm1055_vm4, %v6835_v28, 0.0 }
 0x399   : > { %v1420_v14 = vadd.f32 %v1388_v33, %v1164_v40  ;;  %v1421_v21 = vadd.f32 %v1389_v47, %v1165_v27  ;;  %v9261_v33 = vld [vmem:[#allocation104_spill] sm:$0xff]  ;;  %v7344_v47 = vpop.permute.xlu2 %2878  ;;  %vm1279_vm7 = vcmp.eq.f32.partialorder %v6727_v24, %v9260_v12  ;;  %vm1535_vm10 = vcmp.eq.f32.partialorder %v6741_v57, %v9263_v10 }
 0x39a   : > { %vm1758_vm6 = vcmp.eq.f32.partialorder %v6739_v7, %v9261_v33  ;;  %vm1759_vm8 = vcmp.eq.f32.partialorder %v6741_v57, %v9261_v33  ;;  %vm1057_vm15 = vcmp.eq.f32.partialorder %v6727_v24, %v6734_v38  ;;  %v9269_v33 = vld [vmem:[#allocation63_spill] sm:$0xff]  ;;  %v9270_v10 = vld [vmem:[#allocation92_spill] sm:$0xff]  ;;  %vm1282_vm4 = vcmp.eq.f32.partialorder %v6725_v55, %v6902_v59 }
 0x39b   : > { %v1870_v40 = vsel %vm1758_vm6, %v6460_v50, 0.0  ;;  %v1871_v28 = vsel %vm1759_vm8, %v6460_v50, 0.0 }
 0x39d   : > { %2675 = vperm.xlu0 %4773, %v2285_v4   ;;  %1988 = vmatmul.f32.gmra.mxu0 %v1930_v13  ;;  %v2288_v4 = vsub.f32 %v6413_v45, %v9259_v23  ;;  %v1932_v13 = vmul.f32 %v1900_v34, %v1420_v14  ;;  %v9262_v45 = vld [vmem:[#allocation84_spill] sm:$0xff]  ;;  %v9264_v14 = vld [vmem:[#allocation114_spill] sm:$0xff] }
 0x39e   : > { %2053 = vmatmul.f32.gmra.mxu1 %v1931_v19  ;;  %v1933_v19 = vmul.f32 %v1901_v9, %v1421_v21  ;;  %v1390_v18 = vsel %vm1278_vm5, %v9262_v45, 0.0  ;;  %v1391_v58 = vsel %vm1279_vm7, %v9262_v45, 0.0  ;;  %v1646_v41 = vsel %vm1534_vm9, %v9264_v14, 0.0  ;;  %v7362_v21 = vpop.permute.xlu1 %2873  ;;  %v9265_v9 = vld [vmem:[#allocation66_spill] sm:$0xff] }
 0x39f   : > { %v7321_v1 = vpop.permute.xlu0 %2433  ;;  %v1422_v25 = vadd.f32 %v1390_v18, %v1166_v44  ;;  %v1423_v39 = vadd.f32 %v1391_v58, %v1167_v26  ;;  %v1647_v54 = vsel %vm1535_vm10, %v9264_v14, 0.0  ;;  %v1902_v62 = vadd.f32 %v1870_v40, %v1646_v41 }
 0x3a0   : > { %v1903_v34 = vadd.f32 %v1871_v28, %v1647_v54  ;;  %vm1280_vm12 = vcmp.eq.f32.partialorder %v6725_v55, %v9265_v9  ;;  %vm1281_vm14 = vcmp.eq.f32.partialorder %v6727_v24, %v9265_v9  ;;  %v1168_v26 = vsel %vm1056_vm13, %v9269_v33, 0.0  ;;  %v9271_v54 = vld [vmem:[#allocation134_spill] sm:$0xff]  ;;  %v9272_v9 = vld [vmem:[#allocation95_spill] sm:$0xff] }
 0x3a1   : > { %v1934_v50 = vmul.f32 %v1902_v62, %v1422_v25  ;;  %v1392_v16 = vsel %vm1280_vm12, %v7086_v56, 0.0  ;;  %v1393_v44 = vsel %vm1281_vm14, %v7086_v56, 0.0  ;;  %v7385_v18 = vpop.permute.xlu2 %2893  ;;  %v1169_v56 = vsel %vm1057_vm15, %v9269_v33, 0.0 }
 0x3a2   : > { %v1935_v23 = vmul.f32 %v1903_v34, %v1423_v39  ;;  %v1424_v58 = vadd.f32 %v1392_v16, %v1168_v26  ;;  %v1425_v25 = vadd.f32 %v1393_v44, %v1169_v56  ;;  %vm1283_vm5 = vcmp.eq.f32.partialorder %v6727_v24, %v6902_v59  ;;  %v9273_v16 = vld [vmem:[#allocation55_spill] sm:$0xff]  ;;  %v9274_v59 = vld [vmem:[#allocation30_spill] sm:$0xff] }
 0x3a3   : > { %vm1762_vm6 = vcmp.eq.f32.partialorder %v6739_v7, %v9271_v54  ;;  %vm1763_vm7 = vcmp.eq.f32.partialorder %v6741_v57, %v9271_v54  ;;  %vm1058_vm8 = vcmp.eq.f32.partialorder %v6725_v55, %v9273_v16  ;;  %vm1059_vm9 = vcmp.eq.f32.partialorder %v6727_v24, %v9273_v16 }
 0x3a5   : > { %2690 = vperm.xlu0 %4773, %v2288_v4   ;;  %1991 = vmatmul.f32.gmra.mxu0 %v1932_v13  ;;  %v9266_v4 = vld [vmem:[#allocation100_spill] sm:$0xff] }
 0x3a6   : > { %2056 = vmatmul.f32.gmra.mxu1 %v1933_v19  ;;  %vm1536_vm0 = vcmp.eq.f32.partialorder %v6739_v7, %v9266_v4  ;;  %v9267_v13 = vld [vmem:[#allocation144_spill] sm:$0xff]  ;;  %vm1537_vm2 = vcmp.eq.f32.partialorder %v6741_v57, %v9266_v4  ;;  %v7401_v62 = vpop.permute.xlu1 %2888  ;;  %v1170_v4 = vsel %vm1058_vm8, %v9274_v59, 0.0 }
 0x3a7   : > { %v7356_v27 = vpop.permute.xlu0 %2448  ;;  %vm1760_vm1 = vcmp.eq.f32.partialorder %v6739_v7, %v9267_v13  ;;  %vm1761_vm3 = vcmp.eq.f32.partialorder %v6741_v57, %v9267_v13  ;;  %v9268_v19 = vld [vmem:[#allocation148_spill] sm:$0xff]  ;;  %v1648_v28 = vsel %vm1536_vm0, %v9270_v10, 0.0  ;;  %v1649_v41 = vsel %vm1537_vm2, %v9270_v10, 0.0 }
 0x3a8   : > { %v1872_v12 = vsel %vm1760_vm1, %v9268_v19, 0.0  ;;  %v1873_v45 = vsel %vm1761_vm3, %v9268_v19, 0.0  ;;  %v9275_v13 = vld [vmem:[#allocation124_spill] sm:$0xff]  ;;  %v1171_v19 = vsel %vm1059_vm9, %v9274_v59, 0.0  ;;  %v9281_v59 = vld [vmem:[#allocation87_spill] sm:$0xff] }
 0x3a9   : > { %v1904_v14 = vadd.f32 %v1872_v12, %v1648_v28  ;;  %v1905_v39 = vadd.f32 %v1873_v45, %v1649_v41  ;;  %v1874_v44 = vsel %vm1762_vm6, %v9275_v13, 0.0  ;;  %v9276_v12 = vld [vmem:[#allocation75_spill] sm:$0xff]  ;;  %v1875_v45 = vsel %vm1763_vm7, %v9275_v13, 0.0 }
 0x3aa   : > { %vm1538_vm10 = vcmp.eq.f32.partialorder %v6739_v7, %v9276_v12  ;;  %vm1539_vm12 = vcmp.eq.f32.partialorder %v6741_v57, %v9276_v12 }
 0x3ab   : > { %v1936_v38 = vmul.f32 %v1904_v14, %v1424_v58  ;;  %v1937_v34 = vmul.f32 %v1905_v39, %v1425_v25  ;;  %v9277_v58 = vld [vmem:[#allocation129_spill] sm:$0xff]  ;;  %v7423_v25 = vpop.permute.xlu2 %2924  ;;  %v9278_v39 = vld [vmem:[#allocation47_spill] sm:$0xff] }
 0x3ac   : > { %v1650_v56 = vsel %vm1538_vm10, %v9277_v58, 0.0  ;;  %v1651_v28 = vsel %vm1539_vm12, %v9277_v58, 0.0  ;;  %vm1060_vm13 = vcmp.eq.f32.partialorder %v6725_v55, %v9278_v39  ;;  %vm1061_vm14 = vcmp.eq.f32.partialorder %v6727_v24, %v9278_v39  ;;  %v2095_v39 = vld [vmem:[%s8542_s2 + $0x30] sm:$0xff] }
 0x3ad   : > { %1994 = vmatmul.f32.gmra.mxu0 %v1934_v50  ;;  %v1394_v50 = vsel %vm1282_vm4, %v9272_v9, 0.0  ;;  %v1906_v14 = vadd.f32 %v1874_v44, %v1650_v56  ;;  %v1907_v41 = vadd.f32 %v1875_v45, %v1651_v28  ;;  %v1173_v16 = vsel %vm1061_vm14, %v6849_v20, 0.0  ;;  %v9282_v44 = vld [vmem:[#allocation112_spill] sm:$0xff] }
 0x3ae   : > { %2059 = vmatmul.f32.gmra.mxu1 %v1935_v23  ;;  %v1395_v23 = vsel %vm1283_vm5, %v9272_v9, 0.0  ;;  %v1426_v26 = vadd.f32 %v1394_v50, %v1170_v4  ;;  %v9279_v9 = vld [vmem:[#allocation82_spill] sm:$0xff]  ;;  %v9280_v50 = vld [vmem:[#allocation107_spill] sm:$0xff]  ;;  %vm1540_vm3 = vcmp.eq.f32.partialorder %v6739_v7, %v9282_v44  ;;  %vm1541_vm4 = vcmp.eq.f32.partialorder %v6741_v57, %v9282_v44 }
 0x3af   : > { %v7387_v40 = vpop.permute.xlu0 %2463  ;;  %v1427_v10 = vadd.f32 %v1395_v23, %v1171_v19  ;;  %vm1284_vm15 = vcmp.eq.f32.partialorder %v6725_v55, %v9279_v9  ;;  %vm1764_vm0 = vcmp.eq.f32.partialorder %v6739_v7, %v9280_v50  ;;  %v7435_v23 = vpop.permute.xlu1 %2919  ;;  %vm1285_vm1 = vcmp.eq.f32.partialorder %v6727_v24, %v9279_v9  ;;  %v9283_v24 = vld [vmem:[#allocation118_spill] sm:$0xff] }
 0x3b0   : > { %v1938_v54 = vmul.f32 %v1906_v14, %v1426_v26  ;;  %v1396_v4 = vsel %vm1284_vm15, %v9281_v59, 0.0  ;;  %vm1765_vm2 = vcmp.eq.f32.partialorder %v6741_v57, %v9280_v50  ;;  %v1876_v13 = vsel %vm1764_vm0, %v6472_v2, 0.0  ;;  %v2092_v50 = vld [vmem:[%s8542_s2 + $0x18] sm:$0xff]  ;;  %v2090_v44 = vld [vmem:[%s8542_s2 + $0x8] sm:$0xff] }
 0x3b1   : > { %v1397_v55 = vsel %vm1285_vm1, %v9281_v59, 0.0  ;;  %v1652_v26 = vsel %vm1540_vm3, %v9283_v24, 0.0  ;;  %v1653_v58 = vsel %vm1541_vm4, %v9283_v24, 0.0  ;;  %vm3141_vm10 = vcmask 523264  }
 0x3b2   : > { %v1429_v45 = vadd.f32 %v1397_v55, %v1173_v16  ;;  %v1908_v56 = vadd.f32 %v1876_v13, %v1652_v26 }
 0x3b3   : > { %v7453_v28 = vpop.permute.xlu2 %2939 }
 0x3b5   : > { %1997 = vmatmul.f32.gmra.mxu0 %v1936_v38  ;;  %v1172_v38 = vsel %vm1060_vm13, %v6849_v20, 0.0  ;;  %v1877_v20 = vsel %vm1765_vm2, %v6472_v2, 0.0  ;;  %v2096_v2 = vld [vmem:[%s8542_s2 + $0x38] sm:$0xff] }
 0x3b6   : > { %2062 = vmatmul.f32.gmra.mxu1 %v1937_v34  ;;  %v1939_v34 = vmul.f32 %v1907_v41, %v1427_v10  ;;  %v1428_v12 = vadd.f32 %v1396_v4, %v1172_v38  ;;  %v1909_v10 = vadd.f32 %v1877_v20, %v1653_v58  ;;  %3198 = vmatpush.msra.mxu2 %v2096_v2  ;;  %v2094_v38 = vld [vmem:[%s8542_s2 + $0x28] sm:$0xff]  ;;  %v2091_v4 = vld [vmem:[%s8542_s2 + $0x10] sm:$0xff]  ;;  %v2089_v20 = vld [vmem:[%s8542_s2] sm:$0xff] }
 0x3b7   : > { %v7416_v33 = vpop.permute.xlu0 %2478  ;;  %v7458_v7 = vpop.permute.xlu1 %2934 }
 0x3b8   : > { %v1940_v14 = vmul.f32 %v1908_v56, %v1428_v12  ;;  %v1941_v41 = vmul.f32 %v1909_v10, %v1429_v45  ;;  %3199 = vmatpush.msra.mxu2 %v2095_v39  ;;  %v2321_v10 = vmul.f32 0.125, %v6709_v49 }
 0x3ba   : > { %3200 = vmatpush.msra.mxu2 %v2094_v38  ;;  %v7504_v39 = vfloor.f32 %v2321_v10  ;;  %v9285_v10 = vld [vmem:[#allocation151_spill] sm:$0xff] }
 0x3bc   : > { %vm2405_vm7 = vcmp.eq.f32.partialorder %v7504_v39, %v9285_v10  ;;  %vm2406_vm12 = vcmp.eq.f32.partialorder %v7504_v39, %v7132_v29 }
 0x3bd   : > { %2000 = vmatmul.f32.gmra.mxu0 %v1938_v54  ;;  %v7465_v54 = vpop.permute.xlu2 %2954 }
 0x3be   : > { %2065 = vmatmul.f32.gmra.mxu1 %v1939_v34  ;;  %v2093_v34 = vld [vmem:[%s8542_s2 + $0x20] sm:$0xff] }
 0x3bf   : > { %v7447_v19 = vpop.permute.xlu0 %2493  ;;  %v7478_v16 = vpop.permute.xlu1 %2949  ;;  %3201 = vmatpush.msra.mxu2 %v2093_v34 }
 0x3c1   : > { %3202 = vmatpush.msra.mxu2 %v2092_v50 }
 0x3c3   : > { %3203 = vmatpush.msra.mxu2 %v2091_v4 }
 0x3c5   : > { %2003 = vmatmul.f32.gmra.mxu0 %v1940_v14  ;;  %v7491_v12 = vpop.permute.xlu2 %2969  ;;  %3204 = vmatpush.msra.mxu2 %v2090_v44 }
 0x3c6   : > { %2068 = vmatmul.f32.gmra.mxu1 %v1941_v41 }
 0x3c7   : > { %v7460_v57 = vpop.permute.xlu0 %2524  ;;  %3205 = vmatpush.msra.mxu2 %v2089_v20  ;;  %v7495_v45 = vpop.permute.xlu1 %2964 }
 0x3c8   : > { %vm2598_vm9 = vcmp.eq.f32.partialorder %v7504_v39, %v7460_v57 }
 0x3cd   : > { %v7502_v41 = vpop.permute.xlu2 %2984 }
 0x3cf   : > { %v7473_v9 = vpop.permute.xlu0 %2539  ;;  %v7506_v50 = vpop.permute.xlu1 %2979 }
 0x3d2   : > { %v1962_v59 = vpop.f32.mrf.mxu0 }
 0x3d3   : > { %v2027_v13 = vpop.f32.mrf.mxu1 }
 0x3d4   : > { %v2028_v55 = vadd.f32 %v2027_v13, %v1962_v59  ;;  %v2323_v59 = vmul.f32 8.0, %v7504_v39 }
 0x3d5   : > { %v3016_v20 = vpop.permute.xlu2 %3015 }
 0x3d6   : > { %2074 = vst.msk [vmem:[%s7164_s6 + $0x8] sm:$0xff] %vm2072_vm11, %v2028_v55  ;;  %v9284_v55 = vld [vmem:[#allocation16_spill] sm:$0xff] }
 0x3d7   : > { %v7493_v24 = vpop.permute.xlu0 %2554  ;;  %v7514_v44 = vsub.f32 %v9284_v55, %v2323_v59  ;;  %v9287_v59 = vld [vmem:[#allocation174_spill] sm:$0xff] }
 0x3d9   : > { %vm2805_vm5 = vcmp.eq.f32.partialorder %v7514_v44, %v6931_v53  ;;  %vm2997_vm6 = vcmp.eq.f32.partialorder %v7514_v44, %v7435_v23  ;;  %vm2998_vm13 = vcmp.eq.f32.partialorder %v7514_v44, %v7423_v25  ;;  %vm2806_vm14 = vcmp.eq.f32.partialorder %v7514_v44, %v6906_v48 }
 0x3da   : > { %v1965_v26 = vpop.f32.mrf.mxu0  ;;  %v2902_v25 = vsel %vm2806_vm14, %v7227_v35, 0.0 }
 0x3db   : > { %v2030_v58 = vpop.f32.mrf.mxu1 }
 0x3dc   : > { %v2031_v56 = vadd.f32 %v2030_v58, %v1965_v26 }
 0x3de   : > { %2075 = vst.msk [vmem:[%s7164_s6 + $0x10] sm:$0xff] %vm2072_vm11, %v2031_v56  ;;  %v3093_v56 = vsel %vm2997_vm6, %v3016_v20, 0.0  ;;  %vm3000_vm6 = vcmp.eq.f32.partialorder %v7514_v44, %v7458_v7 }
 0x3df   : > { %v7500_v14 = vpop.permute.xlu0 %2569 }
 0x3e2   : > { %v1968_v2 = vpop.f32.mrf.mxu0 }
 0x3e3   : > { %v2033_v38 = vpop.f32.mrf.mxu1 }
 0x3e4   : > { %v2034_v34 = vadd.f32 %v2033_v38, %v1968_v2  ;;  %v9286_v2 = vld [vmem:[#allocation180_spill] sm:$0xff]  ;;  %v7526_v38 = vpop.permute.xlu1 %2994 }
 0x3e5   : > { %vm2597_vm8 = vcmp.eq.f32.partialorder %v7504_v39, %v9286_v2  ;;  %v2694_v2 = vsel %vm2598_vm9, %v6845_v31, 0.0  ;;  %v9291_v31 = vld [vmem:[#allocation155_spill] sm:$0xff] }
 0x3e6   : > { %2076 = vst.msk [vmem:[%s7164_s6 + $0x18] sm:$0xff] %vm2072_vm11, %v2034_v34  ;;  %vm2999_vm15 = vcmp.eq.f32.partialorder %v7514_v44, %v9291_v31  ;;  %v9296_v31 = vld [vmem:[#allocation154_spill] sm:$0xff] }
 0x3e7   : > { %v7511_v4 = vpop.permute.xlu0 %2584  ;;  %vm2408_vm4 = vcmp.eq.f32.partialorder %v7504_v39, %v9296_v31 }
 0x3ea   : > { %v1971_v13 = vpop.f32.mrf.mxu0 }
 0x3eb   : > { %v2036_v26 = vpop.f32.mrf.mxu1 }
 0x3ec   : > { %v2037_v58 = vadd.f32 %v2036_v26, %v1971_v13  ;;  %v2501_v13 = vsel %vm2405_vm7, %v9287_v59, 0.0  ;;  %v9288_v26 = vld [vmem:[#allocation139_spill] sm:$0xff]  ;;  %vm2601_vm7 = vcmp.eq.f32.partialorder %v7504_v39, %v7473_v9 }
 0x3ed   : > { %v2901_v55 = vsel %vm2805_vm5, %v9288_v26, 0.0  ;;  %vm2808_vm5 = vcmp.eq.f32.partialorder %v7514_v44, %v6983_v22 }
 0x3ee   : > { %2077 = vst.msk [vmem:[%s7164_s6 + $0x20] sm:$0xff] %vm2072_vm11, %v2037_v58  ;;  %v3109_v49 = vadd.f32 %v3093_v56, %v2901_v55  ;;  %v9289_v55 = vld [vmem:[#allocation167_spill] sm:$0xff] }
 0x3ef   : > { %v2616_v34 = vpop.permute.xlu0 %2615  ;;  %v2502_v56 = vsel %vm2406_vm12, %v9289_v55, 0.0  ;;  %vm2809_vm12 = vcmp.eq.f32.partialorder %v7514_v44, %v6959_v46 }
 0x3f0   : > { %v2693_v53 = vsel %vm2597_vm8, %v2616_v34, 0.0  ;;  %v9290_v34 = vld [vmem:[#allocation168_spill] sm:$0xff]  ;;  %v2710_v29 = vadd.f32 %v2694_v2, %v2502_v56  ;;  %v9294_v2 = vld [vmem:[#allocation185_spill] sm:$0xff]  ;;  %vm3001_vm8 = vcmp.eq.f32.partialorder %v7514_v44, %v7453_v28  ;;  %v2905_v9 = vsel %vm2809_vm12, %v7275_v43, 0.0 }
 0x3f1   : > { %v2709_v23 = vadd.f32 %v2693_v53, %v2501_v13  ;;  %v3094_v57 = vsel %vm2998_vm13, %v9290_v34, 0.0  ;;  %vm2599_vm2 = vcmp.eq.f32.partialorder %v7504_v39, %v9294_v2 }
 0x3f2   : > { %v1974_v20 = vpop.f32.mrf.mxu0  ;;  %v3110_v13 = vadd.f32 %v3094_v57, %v2902_v25  ;;  %v2695_v56 = vsel %vm2599_vm2, %v6841_v52, 0.0  ;;  %v9295_v25 = vld [vmem:[#allocation17_spill] sm:$0xff]  ;;  %v9297_v52 = vld [vmem:[#allocation176_spill] sm:$0xff]  ;;  %vm2411_vm2 = vcmp.eq.f32.partialorder %v7504_v39, %v7173_v15 }
 0x3f3   : > { %v2039_v58 = vpop.f32.mrf.mxu1  ;;  %v3125_v10 = vmul.f32 %v3109_v49, %v2709_v23  ;;  %v3026_v49 = vpop.permute.xlu1 %3025  ;;  %vm2600_vm3 = vcmp.eq.f32.partialorder %v7504_v39, %v9295_v25 }
 0x3f4   : > { %v2040_v59 = vadd.f32 %v2039_v58, %v1974_v20  ;;  %v3126_v23 = vmul.f32 %v3110_v13, %v2710_v29  ;;  %v3095_v20 = vsel %vm2999_vm15, %v3026_v49, 0.0  ;;  %v3031_v13 = vpop.permute.xlu2 %3030  ;;  %vm2810_vm15 = vcmp.eq.f32.partialorder %v7514_v44, %v7025_v6 }
 0x3f5   : > { %4679 = vmatmul.msk.f32.vlgmr.msra.gmra.mxu2 %vm3141_vm10, %v3125_v10  ;;  %v9292_v10 = vld [vmem:[#allocation127_spill] sm:$0xff]  ;;  %v2906_v46 = vsel %vm2810_vm15, %v7256_v3, 0.0 }
 0x3f6   : > { %2078 = vst.msk [vmem:[%s7164_s6 + $0x28] sm:$0xff] %vm2072_vm11, %v2040_v59  ;;  %vm2807_vm0 = vcmp.eq.f32.partialorder %v7514_v44, %v9292_v10  ;;  %v9293_v59 = vld [vmem:[#allocation161_spill] sm:$0xff] }
 0x3f7   : > { %vm2407_vm1 = vcmp.eq.f32.partialorder %v7504_v39, %v9293_v59  ;;  %v2903_v48 = vsel %vm2807_vm0, %v7213_v42, 0.0  ;;  %v2631_v57 = vpop.permute.xlu0 %2630 }
 0x3f8   : > { %v2503_v35 = vsel %vm2407_vm1, %v7321_v1, 0.0  ;;  %v3111_v55 = vadd.f32 %v3095_v20, %v2903_v48 }
 0x3f9   : > { %v2711_v34 = vadd.f32 %v2695_v56, %v2503_v35  ;;  %v2697_v35 = vsel %vm2601_vm7, %v6860_v63, 0.0  ;;  %v9300_v56 = vld [vmem:[#allocation170_spill] sm:$0xff] }
 0x3fa   : > { %v1977_v26 = vpop.f32.mrf.mxu0 }
 0x3fb   : > { %v2042_v53 = vpop.f32.mrf.mxu1  ;;  %v3127_v42 = vmul.f32 %v3111_v55, %v2711_v34  ;;  %v9299_v55 = vld [vmem:[#allocation164_spill] sm:$0xff]  ;;  %v3041_v25 = vpop.permute.xlu1 %3040 }
 0x3fc   : > { %v2043_v58 = vadd.f32 %v2042_v53, %v1977_v26  ;;  %v2696_v26 = vsel %vm2600_vm3, %v2631_v57, 0.0  ;;  %v2504_v53 = vsel %vm2408_vm4, %v9297_v52, 0.0  ;;  %vm2409_vm9 = vcmp.eq.f32.partialorder %v7504_v39, %v9299_v55  ;;  %v9301_v57 = vld [vmem:[#allocation171_spill] sm:$0xff]  ;;  %v9303_v52 = vld [vmem:[#allocation156_spill] sm:$0xff]  ;;  %v3046_v6 = vpop.permute.xlu2 %3045 }
 0x3fd   : > { %4680 = vmatmul.msk.f32.gmra.mxu2 %vm3141_vm10, %v3126_v23  ;;  %v3096_v23 = vsel %vm3000_vm6, %v3031_v13, 0.0  ;;  %v2712_v20 = vadd.f32 %v2696_v26, %v2504_v53  ;;  %v2505_v34 = vsel %vm2409_vm9, %v9300_v56, 0.0  ;;  %vm2410_vm14 = vcmp.eq.f32.partialorder %v7504_v39, %v9303_v52  ;;  %v9304_v53 = vld [vmem:[#allocation186_spill] sm:$0xff] }
 0x3fe   : > { %2079 = vst.msk [vmem:[%s7164_s6 + $0x30] sm:$0xff] %vm2072_vm11, %v2043_v58  ;;  %v9298_v58 = vld [vmem:[#allocation142_spill] sm:$0xff]  ;;  %v2713_v28 = vadd.f32 %v2697_v35, %v2505_v34  ;;  %v2506_v43 = vsel %vm2410_vm14, %v7356_v27, 0.0  ;;  %vm2602_vm0 = vcmp.eq.f32.partialorder %v7504_v39, %v9304_v53  ;;  %vm2811_vm3 = vcmp.eq.f32.partialorder %v7514_v44, %v7013_v60  ;;  %v9308_v34 = vld [vmem:[#allocation145_spill] sm:$0xff]  ;;  %v9314_v53 = vld [vmem:[#allocation159_spill] sm:$0xff] }
 0x3ff   : > { %v2904_v10 = vsel %vm2808_vm5, %v9298_v58, 0.0  ;;  %vm3003_vm4 = vcmp.eq.f32.partialorder %v7514_v44, %v7478_v16  ;;  %vm2604_vm5 = vcmp.eq.f32.partialorder %v7504_v39, %v7493_v24  ;;  %vm3004_vm6 = vcmp.eq.f32.partialorder %v7514_v44, %v7465_v54  ;;  %v9313_v24 = vld [vmem:[#allocation130_spill] sm:$0xff] }
 0x400   : > { %v3112_v59 = vadd.f32 %v3096_v23, %v2904_v10  ;;  %v3099_v56 = vsel %vm3003_vm4, %v3046_v6, 0.0  ;;  %vm3005_vm9 = vcmp.eq.f32.partialorder %v7514_v44, %v9314_v53  ;;  %vm3007_vm4 = vcmp.eq.f32.partialorder %v7514_v44, %v7491_v12 }
 0x402   : > { %v1980_v29 = vpop.f32.mrf.mxu0  ;;  %v3128_v7 = vmul.f32 %v3112_v59, %v2712_v20  ;;  %v9305_v20 = vld [vmem:[#allocation193_spill] sm:$0xff]  ;;  %v2646_v59 = vpop.permute.xlu0 %2645 }
 0x403   : > { %v2045_v49 = vpop.f32.mrf.mxu1  ;;  %v2698_v58 = vsel %vm2602_vm0, %v9305_v20, 0.0  ;;  %vm2414_vm0 = vcmp.eq.f32.partialorder %v7504_v39, %v7215_v11 }
 0x404   : > { %v2046_v1 = vadd.f32 %v2045_v49, %v1980_v29  ;;  %v3097_v29 = vsel %vm3001_vm8, %v9301_v57, 0.0  ;;  %v9302_v49 = vld [vmem:[#allocation157_spill] sm:$0xff]  ;;  %v2714_v10 = vadd.f32 %v2698_v58, %v2506_v43  ;;  %v2907_v57 = vsel %vm2811_vm3, %v9308_v34, 0.0  ;;  %v9319_v34 = vld [vmem:[#allocation179_spill] sm:$0xff] }
 0x405   : > { %4681 = vmatmul.msk.f32.gmra.mxu2 %vm3141_vm10, %v3127_v42  ;;  %v3113_v63 = vadd.f32 %v3097_v29, %v2905_v9  ;;  %vm3002_vm13 = vcmp.eq.f32.partialorder %v7514_v44, %v9302_v49  ;;  %v3115_v29 = vadd.f32 %v3099_v56, %v2907_v57  ;;  %v9309_v9 = vld [vmem:[#allocation195_spill] sm:$0xff]  ;;  %v9311_v49 = vld [vmem:[#allocation173_spill] sm:$0xff]  ;;  %vm2812_vm8 = vcmp.eq.f32.partialorder %v7514_v44, %v9313_v24 }
 0x406   : > { %2080 = vst.msk [vmem:[%s7164_s6 + $0x38] sm:$0xff] %vm2072_vm11, %v2046_v1  ;;  %v3098_v1 = vsel %vm3002_vm13, %v3041_v25, 0.0  ;;  %vm2813_vm13 = vcmp.eq.f32.partialorder %v7514_v44, %v7073_v5  ;;  %v3061_v5 = vpop.permute.xlu2 %3060  ;;  %v2510_v57 = vsel %vm2414_vm0, %v9319_v34, 0.0  ;;  %vm2607_vm3 = vcmp.eq.f32.partialorder %v7504_v39, %v7500_v14  ;;  %v9325_v14 = vld [vmem:[#allocation133_spill] sm:$0xff]  ;;  %v9334_v34 = vld [vmem:[#allocation172_spill] sm:$0xff] }
 0x407   : > { %v3129_v26 = vmul.f32 %v3113_v63, %v2713_v28  ;;  %v3114_v23 = vadd.f32 %v3098_v1, %v2906_v46  ;;  %v2700_v63 = vsel %vm2604_vm5, %v9309_v9, 0.0  ;;  %v3056_v46 = vpop.permute.xlu1 %3055  ;;  %vm2610_vm0 = vcmp.eq.f32.partialorder %v7504_v39, %v7511_v4 }
 0x408   : > { %v3101_v58 = vsel %vm3005_vm9, %v3056_v46, 0.0  ;;  %vm2816_vm9 = vcmp.eq.f32.partialorder %v7514_v44, %v7130_v51 }
 0x409   : > { %v3130_v27 = vmul.f32 %v3114_v23, %v2714_v10 }
 0x40a   : > { %v1983_v48 = vpop.f32.mrf.mxu0 }
 0x40b   : > { %v2048_v22 = vpop.f32.mrf.mxu1 }
 0x40c   : > { %v2049_v2 = vadd.f32 %v2048_v22, %v1983_v48  ;;  %v9306_v22 = vld [vmem:[#allocation184_spill] sm:$0xff] }
 0x40d   : > { %4682 = vmatmul.msk.f32.gmra.mxu2 %vm3141_vm10, %v3128_v7  ;;  %vm2603_vm1 = vcmp.eq.f32.partialorder %v7504_v39, %v9306_v22  ;;  %v9316_v22 = vld [vmem:[#allocation188_spill] sm:$0xff] }
 0x40e   : > { %2081 = vst.msk [vmem:[%s7164_s6 + $0x40] sm:$0xff] %vm2072_vm11, %v2049_v2  ;;  %v2699_v7 = vsel %vm2603_vm1, %v2646_v59, 0.0  ;;  %v9307_v2 = vld [vmem:[#allocation177_spill] sm:$0xff]  ;;  %v9315_v59 = vld [vmem:[#allocation158_spill] sm:$0xff]  ;;  %vm2605_vm14 = vcmp.eq.f32.partialorder %v7504_v39, %v9316_v22  ;;  %vm2814_vm1 = vcmp.eq.f32.partialorder %v7514_v44, %v7056_v32  ;;  %v9329_v22 = vld [vmem:[#allocation196_spill] sm:$0xff]  ;;  %v3076_v51 = vpop.permute.xlu2 %3075 }
 0x40f   : > { %v2507_v55 = vsel %vm2411_vm2, %v9307_v2, 0.0  ;;  %vm2413_vm12 = vcmp.eq.f32.partialorder %v7504_v39, %v9315_v59  ;;  %vm3006_vm2 = vcmp.eq.f32.partialorder %v7514_v44, %v7495_v45 }
 0x410   : > { %v2715_v15 = vadd.f32 %v2699_v7, %v2507_v55  ;;  %v9318_v55 = vld [vmem:[#allocation187_spill] sm:$0xff] }
 0x411   : > { %vm2606_vm15 = vcmp.eq.f32.partialorder %v7504_v39, %v9318_v55 }
 0x412   : > { %v1986_v13 = vpop.f32.mrf.mxu0  ;;  %v3131_v16 = vmul.f32 %v3115_v29, %v2715_v15  ;;  %v3102_v29 = vsel %vm3006_vm2, %v3061_v5, 0.0  ;;  %vm2418_vm2 = vcmp.eq.f32.partialorder %v7504_v39, %v9334_v34 }
 0x413   : > { %v2051_v42 = vpop.f32.mrf.mxu1 }
 0x414   : > { %v2052_v31 = vadd.f32 %v2051_v42, %v1986_v13  ;;  %v9310_v13 = vld [vmem:[#allocation166_spill] sm:$0xff] }
 0x415   : > { %4683 = vmatmul.msk.f32.gmra.mxu2 %vm3141_vm10, %v3129_v26  ;;  %vm2412_vm7 = vcmp.eq.f32.partialorder %v7504_v39, %v9310_v13  ;;  %v9312_v26 = vld [vmem:[#allocation6_spill] sm:$0xff] }
 0x416   : > { %2082 = vst.msk [vmem:[%s7164_s6 + $0x48] sm:$0xff] %vm2072_vm11, %v2052_v31  ;;  %v2508_v42 = vsel %vm2412_vm7, %v9311_v49, 0.0  ;;  %v3100_v1 = vsel %vm3004_vm6, %v9312_v26, 0.0  ;;  %v2908_v31 = vsel %vm2812_vm8, %v7319_v37, 0.0  ;;  %v2909_v37 = vsel %vm2813_vm13, %v7301_v36, 0.0  ;;  %v9322_v49 = vld [vmem:[#allocation169_spill] sm:$0xff] }
 0x417   : > { %v2716_v54 = vadd.f32 %v2700_v63, %v2508_v42  ;;  %v3116_v52 = vadd.f32 %v3100_v1, %v2908_v31  ;;  %v3117_v6 = vadd.f32 %v3101_v58, %v2909_v37  ;;  %v9321_v63 = vld [vmem:[#allocation197_spill] sm:$0xff]  ;;  %vm2415_vm5 = vcmp.eq.f32.partialorder %v7504_v39, %v9322_v49  ;;  %v9323_v42 = vld [vmem:[#allocation175_spill] sm:$0xff]  ;;  %v9324_v1 = vld [vmem:[#allocation8_spill] sm:$0xff] }
 0x418   : > { %v2511_v26 = vsel %vm2415_vm5, %v9323_v42, 0.0  ;;  %v3103_v24 = vsel %vm3007_vm4, %v9324_v1, 0.0  ;;  %vm2815_vm6 = vcmp.eq.f32.partialorder %v7514_v44, %v9325_v14  ;;  %v9328_v37 = vld [vmem:[#allocation190_spill] sm:$0xff]  ;;  %v9342_v14 = vld [vmem:[#allocation191_spill] sm:$0xff] }
 0x419   : > { %v3132_v20 = vmul.f32 %v3116_v52, %v2716_v54  ;;  %v2911_v54 = vsel %vm2815_vm6, %v7362_v21, 0.0  ;;  %v3071_v52 = vpop.permute.xlu1 %3070  ;;  %v2912_v21 = vsel %vm2816_vm9, %v7344_v47, 0.0  ;;  %vm2819_vm6 = vcmp.eq.f32.partialorder %v7514_v44, %v7185_v61  ;;  %v9341_v42 = vld [vmem:[#allocation198_spill] sm:$0xff]  ;;  %v3091_v61 = vpop.permute.xlu2 %3090 }
 0x41a   : > { %v1989_v48 = vpop.f32.mrf.mxu0  ;;  %v3119_v31 = vadd.f32 %v3103_v24, %v2911_v54  ;;  %vm2420_vm9 = vcmp.eq.f32.partialorder %v7504_v39, %v7287_v17 }
 0x41b   : > { %v2054_v3 = vpop.f32.mrf.mxu1 }
 0x41c   : > { %v2055_v35 = vadd.f32 %v2054_v3, %v1989_v48  ;;  %v2509_v48 = vsel %vm2413_vm12, %v7387_v40, 0.0  ;;  %v9317_v3 = vld [vmem:[#allocation194_spill] sm:$0xff]  ;;  %vm2608_vm12 = vcmp.eq.f32.partialorder %v7504_v39, %v9328_v37 }
 0x41d   : > { %4684 = vmatmul.msk.f32.gmra.mxu2 %vm3141_vm10, %v3130_v27  ;;  %v2701_v27 = vsel %vm2605_vm14, %v9317_v3, 0.0  ;;  %vm2417_vm14 = vcmp.eq.f32.partialorder %v7504_v39, %v7250_v30 }
 0x41e   : > { %2083 = vst.msk [vmem:[%s7164_s6 + $0x50] sm:$0xff] %vm2072_vm11, %v2055_v35  ;;  %v2717_v7 = vadd.f32 %v2701_v27, %v2509_v48  ;;  %v2661_v35 = vpop.permute.xlu0 %2660 }
 0x41f   : > { %v2702_v56 = vsel %vm2606_vm15, %v2661_v35, 0.0  ;;  %vm3009_vm15 = vcmp.eq.f32.partialorder %v7514_v44, %v7506_v50  ;;  %v9335_v50 = vld [vmem:[#allocation178_spill] sm:$0xff] }
 0x420   : > { %v3133_v40 = vmul.f32 %v3117_v6, %v2717_v7  ;;  %v2718_v11 = vadd.f32 %v2702_v56, %v2510_v57  ;;  %v2704_v6 = vsel %vm2608_vm12, %v9329_v22, 0.0  ;;  %v9330_v7 = vld [vmem:[#allocation189_spill] sm:$0xff]  ;;  %v3105_v55 = vsel %vm3009_vm15, %v3076_v51, 0.0  ;;  %v9346_v51 = vld [vmem:[#allocation14_spill] sm:$0xff] }
 0x421   : > { %vm2609_vm13 = vcmp.eq.f32.partialorder %v7504_v39, %v9330_v7  ;;  %v2514_v57 = vsel %vm2418_vm2, %v9335_v50, 0.0  ;;  %vm2820_vm12 = vcmp.eq.f32.partialorder %v7514_v44, %v7156_v8  ;;  %v9349_v50 = vld [vmem:[#allocation21_spill] sm:$0xff] }
 0x422   : > { %v1992_v28 = vpop.f32.mrf.mxu0 }
 0x423   : > { %v2057_v60 = vpop.f32.mrf.mxu1 }
 0x424   : > { %v2058_v25 = vadd.f32 %v2057_v60, %v1992_v28  ;;  %v9320_v28 = vld [vmem:[#allocation147_spill] sm:$0xff] }
 0x425   : > { %4685 = vmatmul.msk.f32.gmra.mxu2 %vm3141_vm10, %v3131_v16  ;;  %v2910_v60 = vsel %vm2814_vm1, %v9320_v28, 0.0  ;;  %vm3010_vm1 = vcmp.eq.f32.partialorder %v7514_v44, %v7502_v41  ;;  %v9337_v28 = vld [vmem:[#allocation136_spill] sm:$0xff]  ;;  %v3086_v41 = vpop.permute.xlu1 %3085 }
 0x426   : > { %2084 = vst.msk [vmem:[%s7164_s6 + $0x58] sm:$0xff] %vm2072_vm11, %v2058_v25  ;;  %v3118_v16 = vadd.f32 %v3102_v29, %v2910_v60  ;;  %v2703_v25 = vsel %vm2607_vm3, %v9321_v63, 0.0  ;;  %v2676_v27 = vpop.permute.xlu0 %2675  ;;  %v9336_v29 = vld [vmem:[#allocation26_spill] sm:$0xff]  ;;  %vm2818_vm3 = vcmp.eq.f32.partialorder %v7514_v44, %v9337_v28  ;;  %v9339_v63 = vld [vmem:[#allocation163_spill] sm:$0xff] }
 0x427   : > { %v2719_v12 = vadd.f32 %v2703_v25, %v2511_v26  ;;  %v2705_v35 = vsel %vm2609_vm13, %v2676_v27, 0.0  ;;  %v2914_v4 = vsel %vm2818_vm3, %v7401_v62, 0.0  ;;  %vm2419_vm5 = vcmp.eq.f32.partialorder %v7504_v39, %v9339_v63  ;;  %v9340_v62 = vld [vmem:[#allocation192_spill] sm:$0xff] }
 0x428   : > { %v3134_v45 = vmul.f32 %v3118_v16, %v2718_v11  ;;  %v3106_v11 = vsel %vm3010_vm1, %v9336_v29, 0.0  ;;  %v2915_v25 = vsel %vm2819_vm6, %v7385_v18, 0.0  ;;  %vm3012_vm13 = vcmp.eq.f32.partialorder %v7514_v44, %v7526_v38  ;;  %v9343_v18 = vld [vmem:[#allocation183_spill] sm:$0xff] }
 0x429   : > { %v3122_v16 = vadd.f32 %v3106_v11, %v2914_v4  ;;  %v9350_v11 = vld [vmem:[#allocation10_spill] sm:$0xff] }
 0x42a   : > { %v1995_v43 = vpop.f32.mrf.mxu0  ;;  %v3340_v28 = vmul.f32 0.125, %v9350_v11 }
 0x42b   : > { %v2060_v23 = vpop.f32.mrf.mxu1 }
 0x42c   : > { %v2061_v10 = vadd.f32 %v2060_v23, %v1995_v43  ;;  %v9326_v43 = vld [vmem:[#allocation162_spill] sm:$0xff]  ;;  %v3135_v23 = vmul.f32 %v3119_v31, %v2719_v12  ;;  %v3108_v31 = vsel %vm3012_vm13, %v3091_v61, 0.0 }
 0x42d   : > { %4686 = vmatmul.msk.f32.gmra.mxu2 %vm3141_vm10, %v3132_v20  ;;  %vm3008_vm7 = vcmp.eq.f32.partialorder %v7514_v44, %v9326_v43 }
 0x42e   : > { %2085 = vst.msk [vmem:[%s7164_s6 + $0x60] sm:$0xff] %vm2072_vm11, %v2061_v10  ;;  %v3104_v20 = vsel %vm3008_vm7, %v3071_v52, 0.0  ;;  %v9327_v10 = vld [vmem:[#allocation160_spill] sm:$0xff]  ;;  %vm2611_vm7 = vcmp.eq.f32.partialorder %v7504_v39, %v9340_v62  ;;  %v2691_v24 = vpop.permute.xlu0 %2690 }
 0x42f   : > { %vm2416_vm8 = vcmp.eq.f32.partialorder %v7504_v39, %v9327_v10  ;;  %v3120_v48 = vadd.f32 %v3104_v20, %v2912_v21  ;;  %v2707_v26 = vsel %vm2611_vm7, %v9341_v42, 0.0  ;;  %v9352_v62 = vld [vmem:[#allocation24_spill] sm:$0xff] }
 0x430   : > { %v2512_v59 = vsel %vm2416_vm8, %v7416_v33, 0.0  ;;  %v9331_v33 = vld [vmem:[#allocation181_spill] sm:$0xff]  ;;  %vm2612_vm8 = vcmp.eq.f32.partialorder %v7504_v39, %v9342_v14 }
 0x431   : > { %v2720_v3 = vadd.f32 %v2704_v6, %v2512_v59  ;;  %v2708_v54 = vsel %vm2612_vm8, %v2691_v24, 0.0  ;;  %v9345_v6 = vld [vmem:[#allocation18_spill] sm:$0xff] }
 0x432   : > { %v1998_v2 = vpop.f32.mrf.mxu0 }
 0x433   : > { %v2063_v36 = vpop.f32.mrf.mxu1  ;;  %v3136_v47 = vmul.f32 %v3120_v48, %v2720_v3  ;;  %v3338_v3 = vmul.f32 0.125, %v9345_v6 }
 0x434   : > { %v2064_v15 = vadd.f32 %v2063_v36, %v1998_v2  ;;  %v2513_v2 = vsel %vm2417_vm14, %v9331_v33, 0.0  ;;  %v9332_v36 = vld [vmem:[#allocation150_spill] sm:$0xff]  ;;  %v9347_v33 = vld [vmem:[#allocation19_spill] sm:$0xff] }
 0x435   : > { %4687 = vmatmul.msk.f32.gmra.mxu2 %vm3141_vm10, %v3133_v40  ;;  %v2721_v5 = vadd.f32 %v2705_v35, %v2513_v2  ;;  %v3354_v27 = vmax.f32 %v3338_v3, 0.0  ;;  %v3341_v2 = vmul.f32 0.125, %v9347_v33  ;;  %v9358_v3 = vld [vmem:[#allocation29_spill] sm:$0xff] }
 0x436   : > { %2086 = vst.msk [vmem:[%s7164_s6 + $0x68] sm:$0xff] %vm2072_vm11, %v2064_v15 }
 0x437   : > { %v7749_v35 = vmin.f32 %v3354_v27, 3.0  ;;  %v3352_v27 = vmul.f32 0.125, %v9358_v3 }
 0x43a   : > { %v2001_v9 = vpop.f32.mrf.mxu0 }
 0x43b   : > { %v2066_v32 = vpop.f32.mrf.mxu1 }
 0x43c   : > { %v2067_v13 = vadd.f32 %v2066_v32, %v2001_v9  ;;  %v9338_v9 = vld [vmem:[#allocation165_spill] sm:$0xff] }
 0x43d   : > { %4688 = vmatmul.msk.f32.gmra.mxu2 %vm3141_vm10, %v3134_v45  ;;  %vm3011_vm4 = vcmp.eq.f32.partialorder %v7514_v44, %v9338_v9  ;;  %v3356_v9 = vmax.f32 %v3340_v28, 0.0 }
 0x43e   : > { %2087 = vst.msk [vmem:[%s7164_s6 + $0x70] sm:$0xff] %vm2072_vm11, %v2067_v13  ;;  %v3107_v45 = vsel %vm3011_vm4, %v3086_v41, 0.0  ;;  %v2515_v13 = vsel %vm2419_vm5, %v7447_v19, 0.0  ;;  %v2516_v19 = vsel %vm2420_vm9, %v9343_v18, 0.0 }
 0x43f   : > { %v3123_v49 = vadd.f32 %v3107_v45, %v2915_v25  ;;  %v2723_v1 = vadd.f32 %v2707_v26, %v2515_v13  ;;  %v2724_v52 = vadd.f32 %v2708_v54, %v2516_v19  ;;  %v9351_v25 = vld [vmem:[#allocation20_spill] sm:$0xff]  ;;  %v9353_v26 = vld [vmem:[#allocation9_spill] sm:$0xff]  ;;  %v7781_v24 = vmin.f32 %v3356_v9, 3.0 }
 0x440   : > { %v3344_v13 = vmul.f32 0.125, %v9351_v25 }
 0x441   : > { %v3139_v12 = vmul.f32 %v3123_v49, %v2723_v1  ;;  %v3346_v49 = vmul.f32 0.125, %v9352_v62  ;;  %v3345_v1 = vmul.f32 0.125, %v9353_v26  ;;  %v3436_v19 = vfloor.f32 %v7781_v24 }
 0x442   : > { %v2004_v46 = vpop.f32.mrf.mxu0  ;;  %v3360_v14 = vmax.f32 %v3344_v13, 0.0 }
 0x443   : > { %v2069_v53 = vpop.f32.mrf.mxu1  ;;  %v3362_v61 = vmax.f32 %v3346_v49, 0.0  ;;  %v3361_v18 = vmax.f32 %v3345_v1, 0.0  ;;  %v3450_v49 = vceil.f32 %v7749_v35 }
 0x444   : > { %v2070_v58 = vadd.f32 %v2069_v53, %v2004_v46  ;;  %v9344_v46 = vld [vmem:[#allocation152_spill] sm:$0xff] }
 0x445   : > { %4689 = vmatmul.msk.f32.gmra.mxu2 %vm3141_vm10, %v3135_v23  ;;  %v2916_v43 = vsel %vm2820_vm12, %v9344_v46, 0.0  ;;  %v9354_v46 = vld [vmem:[#allocation23_spill] sm:$0xff]  ;;  %v3498_v1 = vsub.f32 %v3450_v49, %v7749_v35 }
 0x446   : > { %2088 = vst.msk [vmem:[%s7164_s6 + $0x78] sm:$0xff] %vm2072_vm11, %v2070_v58  ;;  %vm2817_vm11 = vcmp.eq.f32.partialorder %v7514_v44, %v7101_v0  ;;  %v9333_v0 = vld [vmem:[#allocation199_spill] sm:$0xff]  ;;  %v3124_v53 = vadd.f32 %v3108_v31, %v2916_v43  ;;  %v7794_v31 = vmin.f32 %v3360_v14, 3.0  ;;  %v3347_v43 = vmul.f32 0.125, %v9354_v46 }
 0x447   : > { %v2913_v40 = vsel %vm2817_vm11, %v9332_v36, 0.0  ;;  %v2706_v15 = vsel %vm2610_vm0, %v9333_v0, 0.0  ;;  %v3357_v36 = vmax.f32 %v3341_v2, 0.0  ;;  %v9348_v0 = vld [vmem:[#allocation15_spill] sm:$0xff] }
 0x448   : > { %v3121_v56 = vadd.f32 %v3105_v55, %v2913_v40  ;;  %v2722_v60 = vadd.f32 %v2706_v15, %v2514_v57  ;;  %v3140_v23 = vmul.f32 %v3124_v53, %v2724_v52  ;;  %v3434_v40 = vfloor.f32 %v7749_v35  ;;  %v9355_v53 = vld [vmem:[#allocation5_spill] sm:$0xff] }
 0x449   : > { %v3342_v15 = vmul.f32 0.125, %v9348_v0  ;;  %v7761_v34 = vmin.f32 %v3357_v36, 3.0  ;;  %v3343_v57 = vmul.f32 0.125, %v9349_v50  ;;  %v7796_v52 = vmin.f32 %v3362_v61, 3.0 }
 0x44a   : > { %v3137_v30 = vmul.f32 %v3121_v56, %v2721_v5  ;;  %v3138_v32 = vmul.f32 %v3122_v16, %v2722_v60 }
 0x44b   : > { %v3358_v60 = vmax.f32 %v3342_v15, 0.0  ;;  %v3359_v4 = vmax.f32 %v3343_v57, 0.0  ;;  %v3437_v16 = vfloor.f32 %v7761_v34  ;;  %v9360_v57 = vld [vmem:[#allocation28_spill] sm:$0xff]  ;;  %v3453_v46 = vceil.f32 %v7761_v34 }
 0x44d   : > { %4690 = vmatmul.msk.f32.gmra.mxu2 %vm3141_vm10, %v3136_v47  ;;  %v3339_v47 = vmul.f32 0.125, %v9346_v51  ;;  %v7774_v45 = vmin.f32 %v3358_v60, 3.0  ;;  %v7776_v63 = vmin.f32 %v3359_v4, 3.0 }
 0x44f   : > { %v3355_v5 = vmax.f32 %v3339_v47, 0.0  ;;  %v3438_v54 = vfloor.f32 %v7774_v45  ;;  %v9359_v47 = vld [vmem:[#allocation32_spill] sm:$0xff]  ;;  %v3454_v61 = vceil.f32 %v7774_v45 }
 0x450   : > { %v3351_v33 = vmul.f32 0.125, %v9359_v47 }
 0x455   : > { %4691 = vmatmul.msk.f32.gmra.mxu2 %vm3141_vm10, %v3137_v30  ;;  %v7758_v30 = vmin.f32 %v3355_v5, 3.0 }
 0x457   : > { %v3435_v41 = vfloor.f32 %v7758_v30  ;;  %v3451_v62 = vceil.f32 %v7758_v30 }
 0x45d   : > { %4692 = vmatmul.msk.f32.gmra.mxu2 %vm3141_vm10, %v3138_v32 }
 0x465   : > { %4693 = vmatmul.msk.f32.gmra.mxu2 %vm3141_vm10, %v3139_v12  ;;  %v3439_v12 = vfloor.f32 %v7776_v63 }
 0x46d   : > { %4694 = vmatmul.msk.f32.gmra.mxu2 %vm3141_vm10, %v3140_v23  ;;  %vm3319_vm10 = vcmask 195648   ;;  %v3349_v23 = vmul.f32 0.125, %v9355_v53 }
 0x478   : > { %v3207_v17 = vpop.f32.mrf.mxu2 }
 0x479   : > { %3271 = vrot.lane.b32.xlu0 %v3207_v17, %s4879_s8 }
 0x480   : > { %v3210_v8 = vpop.f32.mrf.mxu2 }
 0x481   : > { %3273 = vrot.lane.b32.xlu1 %v3210_v8, %s4879_s8  ;;  %v7800_v8 = vmin.f32 %v3361_v18, 3.0  ;;  %v3452_v18 = vceil.f32 %v7781_v24 }
 0x483   : > { %v3500_v53 = vsub.f32 %v3452_v18, %v7781_v24 }
 0x488   : > { %v3213_v39 = vpop.f32.mrf.mxu2 }
 0x489   : > { %3275 = vrot.lane.b32.xlu2 %v3213_v39, %s4879_s8  ;;  %v9356_v39 = vld [vmem:[#allocation11_spill] sm:$0xff] }
 0x490   : > { %v3216_v44 = vpop.f32.mrf.mxu2 }
 0x491   : > { %3277 = vrot.lane.b32.xlu0 %v3216_v44, %s4879_s8  ;;  %v3348_v44 = vmul.f32 0.125, %v9356_v39  ;;  %v3457_v39 = vceil.f32 %v7800_v8 }
 0x498   : > { %v3219_v38 = vpop.f32.mrf.mxu2 }
 0x499   : > { %3279 = vrot.lane.b32.xlu1 %v3219_v38, %s4879_s8  ;;  %v3363_v38 = vmax.f32 %v3347_v43, 0.0  ;;  %v3502_v43 = vsub.f32 %v3454_v61, %v7774_v45 }
 0x4a0   : > { %v3222_v20 = vpop.f32.mrf.mxu2 }
 0x4a1   : > { %3281 = vrot.lane.b32.xlu2 %v3222_v20, %s4879_s8  ;;  %v3365_v20 = vmax.f32 %v3349_v23, 0.0  ;;  %v3501_v23 = vsub.f32 %v3453_v46, %v7761_v34 }
 0x4a8   : > { %v3225_v58 = vpop.f32.mrf.mxu2 }
 0x4a9   : > { %3283 = vrot.lane.b32.xlu0 %v3225_v58, %s4879_s8  ;;  %v3442_v58 = vfloor.f32 %v7796_v52 }
 0x4b0   : > { %v3228_v10 = vpop.f32.mrf.mxu2 }
 0x4b1   : > { %3285 = vrot.lane.b32.xlu1 %v3228_v10, %s4879_s8  ;;  %v3440_v10 = vfloor.f32 %v7794_v31 }
 0x4b8   : > { %v3231_v21 = vpop.f32.mrf.mxu2 }
 0x4b9   : > { %3287 = vrot.lane.b32.xlu2 %v3231_v21, %s4879_s8  ;;  %v3364_v21 = vmax.f32 %v3348_v44, 0.0  ;;  %v3455_v44 = vceil.f32 %v7776_v63 }
 0x4bb   : > { %v7820_v51 = vmin.f32 %v3364_v21, 3.0  ;;  %v3503_v21 = vsub.f32 %v3455_v44, %v7776_v63 }
 0x4bd   : > { %v3444_v0 = vfloor.f32 %v7820_v51  ;;  %v3460_v3 = vceil.f32 %v7820_v51 }
 0x4bf   : > { %v3508_v47 = vsub.f32 %v3460_v3, %v7820_v51 }
 0x4c0   : > { %v3234_v59 = vpop.f32.mrf.mxu2 }
 0x4c1   : > { %3289 = vrot.lane.b32.xlu0 %v3234_v59, %s4879_s8  ;;  %v3441_v59 = vfloor.f32 %v7800_v8 }
 0x4c8   : > { %v3237_v37 = vpop.f32.mrf.mxu2 }
 0x4c9   : > { %3291 = vrot.lane.b32.xlu1 %v3237_v37, %s4879_s8  ;;  %v7814_v37 = vmin.f32 %v3363_v38, 3.0  ;;  %v3456_v38 = vceil.f32 %v7794_v31 }
 0x4cb   : > { %v3443_v36 = vfloor.f32 %v7814_v37 }
 0x4d0   : > { %v3240_v48 = vpop.f32.mrf.mxu2 }
 0x4d1   : > { %3293 = vrot.lane.b32.xlu2 %v3240_v48, %s4879_s8  ;;  %v7816_v48 = vmin.f32 %v3365_v20, 3.0  ;;  %v3505_v20 = vsub.f32 %v3457_v39, %v7800_v8 }
 0x4d3   : > { %v3445_v5 = vfloor.f32 %v7816_v48 }
 0x4d8   : > { %v3243_v22 = vpop.f32.mrf.mxu2 }
 0x4d9   : > { %3295 = vrot.lane.b32.xlu0 %v3243_v22, %s4879_s8  ;;  %v9357_v22 = vld [vmem:[#allocation25_spill] sm:$0xff] }
 0x4da   : > { %v3350_v6 = vmul.f32 0.125, %v9357_v22  ;;  %v3504_v22 = vsub.f32 %v3456_v38, %v7794_v31 }
 0x4dc   : > { %v3366_v2 = vmax.f32 %v3350_v6, 0.0 }
 0x4de   : > { %v7834_v15 = vmin.f32 %v3366_v2, 3.0 }
 0x4e0   : > { %v3246_v7 = vpop.f32.mrf.mxu2  ;;  %v3446_v9 = vfloor.f32 %v7834_v15 }
 0x4e1   : > { %3297 = vrot.lane.b32.xlu1 %v3246_v7, %s4879_s8 }
 0x4e3   : > { %v3276_v55 = vpop.permute.xlu2 %3275 }
 0x4e4   : > { %3322 = vst.msk [vmem:[%s7164_s6 + $0x10] sm:$0xff] %vm3319_vm10, %v3276_v55  ;;  %v3368_v55 = vmax.f32 %v3352_v27, 0.0  ;;  %v3458_v27 = vceil.f32 %v7796_v52 }
 0x4e6   : > { %v7836_v50 = vmin.f32 %v3368_v55, 3.0 }
 0x4e8   : > { %v3249_v56 = vpop.f32.mrf.mxu2  ;;  %v3448_v4 = vfloor.f32 %v7836_v50 }
 0x4e9   : > { %3568 = vperm.xlu1 %4774, %v3434_v40   ;;  %3299 = vrot.lane.b32.xlu2 %v3249_v56, %s4879_s8  ;;  %v3367_v56 = vmax.f32 %v3351_v33, 0.0  ;;  %v3506_v33 = vsub.f32 %v3458_v27, %v7796_v52 }
 0x4eb   : > { %v3272_v29 = vpop.permute.xlu0 %3271  ;;  %v7839_v28 = vmin.f32 %v3367_v56, 3.0 }
 0x4ec   : > { %3320 = vst.msk [vmem:[%s7164_s6] sm:$0xff] %vm3319_vm10, %v3272_v29  ;;  %v3353_v29 = vmul.f32 0.125, %v9360_v57  ;;  %v3461_v57 = vceil.f32 %v7816_v48 }
 0x4ed   : > { %v3463_v56 = vceil.f32 %v7839_v28 }
 0x4ee   : > { %v3369_v60 = vmax.f32 %v3353_v29, 0.0  ;;  %v3462_v29 = vceil.f32 %v7834_v15 }
 0x4f0   : > { %v3252_v32 = vpop.f32.mrf.mxu2  ;;  %v7852_v25 = vmin.f32 %v3369_v60, 3.0  ;;  %v3509_v60 = vsub.f32 %v3461_v57, %v7816_v48 }
 0x4f1   : > { %3583 = vperm.xlu1 %4774, %v3437_v16   ;;  %3573 = vperm.xlu2 %4775, %v3435_v41  }
 0x4f2   : > { %3301 = vrot.lane.b32.xlu0 %v3252_v32, %s4879_s8  ;;  %v3447_v32 = vfloor.f32 %v7839_v28  ;;  %v3449_v26 = vfloor.f32 %v7852_v25 }
 0x4f3   : > { %v3274_v42 = vpop.permute.xlu1 %3273 }
 0x4f4   : > { %3321 = vst.msk [vmem:[%s7164_s6 + $0x8] sm:$0xff] %vm3319_vm10, %v3274_v42  ;;  %v3499_v42 = vsub.f32 %v3451_v62, %v7758_v30 }
 0x4f9   : > { %3593 = vperm.xlu1 %4774, %v3439_v12   ;;  %3588 = vperm.xlu2 %4775, %v3438_v54  }
 0x4fa   : > { %3578 = vperm.xlu0 %4773, %v3436_v19  }
 0x4fb   : > { %v3282_v17 = vpop.permute.xlu2 %3281 }
 0x4fc   : > { %3325 = vst.msk [vmem:[%s7164_s6 + $0x28] sm:$0xff] %vm3319_vm10, %v3282_v17 }
 0x501   : > { %3608 = vperm.xlu1 %4774, %v3442_v58   ;;  %3598 = vperm.xlu2 %4775, %v3440_v10  }
 0x502   : > { %3603 = vperm.xlu0 %4773, %v3441_v59  }
 0x503   : > { %v3278_v7 = vpop.permute.xlu0 %3277 }
 0x504   : > { %3323 = vst.msk [vmem:[%s7164_s6 + $0x18] sm:$0xff] %vm3319_vm10, %v3278_v7  ;;  %v3459_v7 = vceil.f32 %v7814_v37 }
 0x506   : > { %v3507_v2 = vsub.f32 %v3459_v7, %v7814_v37 }
 0x509   : > { %3623 = vperm.xlu1 %4774, %v3445_v5   ;;  %3613 = vperm.xlu2 %4775, %v3443_v36  }
 0x50a   : > { %3618 = vperm.xlu0 %4773, %v3444_v0  }
 0x50b   : > { %v3280_v11 = vpop.permute.xlu1 %3279 }
 0x50c   : > { %3324 = vst.msk [vmem:[%s7164_s6 + $0x20] sm:$0xff] %vm3319_vm10, %v3280_v11  ;;  %v3511_v11 = vsub.f32 %v3463_v56, %v7839_v28 }
 0x511   : > { %3638 = vperm.xlu1 %4774, %v3448_v4   ;;  %3628 = vperm.xlu2 %4775, %v3446_v9  }
 0x512   : > { %3633 = vperm.xlu0 %4773, %v3447_v32  }
 0x513   : > { %v3288_v13 = vpop.permute.xlu2 %3287 }
 0x514   : > { %3328 = vst.msk [vmem:[%s7164_s6 + $0x40] sm:$0xff] %vm3319_vm10, %v3288_v13  ;;  %v3510_v13 = vsub.f32 %v3462_v29, %v7834_v15 }
 0x519   : > { %3669 = vperm.xlu1 %4774, %v3499_v42   ;;  %3643 = vperm.xlu2 %4775, %v3449_v26  }
 0x51a   : > { %3664 = vperm.xlu0 %4773, %v3498_v1   ;;  %v3464_v1 = vceil.f32 %v7836_v50 }
 0x51b   : > { %v3284_v14 = vpop.permute.xlu0 %3283 }
 0x51c   : > { %3326 = vst.msk [vmem:[%s7164_s6 + $0x30] sm:$0xff] %vm3319_vm10, %v3284_v14  ;;  %v3465_v14 = vceil.f32 %v7852_v25 }
 0x521   : > { %3684 = vperm.xlu1 %4774, %v3502_v43   ;;  %3674 = vperm.xlu2 %4775, %v3500_v53   ;;  %v3512_v43 = vsub.f32 %v3464_v1, %v7836_v50  ;;  %v3513_v53 = vsub.f32 %v3465_v14, %v7852_v25 }
 0x522   : > { %3679 = vperm.xlu0 %4773, %v3501_v23  }
 0x523   : > { %v3286_v17 = vpop.permute.xlu1 %3285 }
 0x524   : > { %3327 = vst.msk [vmem:[%s7164_s6 + $0x38] sm:$0xff] %vm3319_vm10, %v3286_v17 }
 0x529   : > { %3699 = vperm.xlu1 %4774, %v3505_v20   ;;  %3689 = vperm.xlu2 %4775, %v3503_v21  }
 0x52a   : > { %3694 = vperm.xlu0 %4773, %v3504_v22  }
 0x52b   : > { %v3294_v6 = vpop.permute.xlu2 %3293 }
 0x52c   : > { %3331 = vst.msk [vmem:[%s7164_s6 + $0x58] sm:$0xff] %vm3319_vm10, %v3294_v6  ;;  %v3516_v6 = vsub.f32 %v7781_v24, %v3436_v19  ;;  %v3519_v24 = vsub.f32 %v7776_v63, %v3439_v12 }
 0x531   : > { %3714 = vperm.xlu1 %4774, %v3508_v47   ;;  %3704 = vperm.xlu2 %4775, %v3506_v33  }
 0x532   : > { %3709 = vperm.xlu0 %4773, %v3507_v2   ;;  %v9361_v2 = vld [vmem:[#allocation182_spill] sm:$0xff] }
 0x533   : > { %v3290_v55 = vpop.permute.xlu0 %3289 }
 0x534   : > { %3329 = vst.msk [vmem:[%s7164_s6 + $0x48] sm:$0xff] %vm3319_vm10, %v3290_v55  ;;  %v3562_v55 = vmul.f32 0.25, %v9361_v2 }
 0x539   : > { %3729 = vperm.xlu1 %4774, %v3511_v11   ;;  %3719 = vperm.xlu2 %4775, %v3509_v60   ;;  %v3528_v60 = vsub.f32 %v7836_v50, %v3448_v4 }
 0x53a   : > { %3724 = vperm.xlu0 %4773, %v3510_v13   ;;  %v3526_v13 = vsub.f32 %v7834_v15, %v3446_v9 }
 0x53b   : > { %v3292_v42 = vpop.permute.xlu1 %3291 }
 0x53c   : > { %3330 = vst.msk [vmem:[%s7164_s6 + $0x50] sm:$0xff] %vm3319_vm10, %v3292_v42 }
 0x541   : > { %3760 = vperm.xlu1 %4774, %v3450_v49   ;;  %3734 = vperm.xlu2 %4775, %v3512_v43   ;;  %v9364_v43 = vld [vmem:[#allocation56_spill] sm:$0xff] }
 0x542   : > { %3739 = vperm.xlu0 %4773, %v3513_v53   ;;  %v3388_v53 = vmul.f32 0.125, %v9364_v43 }
 0x543   : > { %v3300_v23 = vpop.permute.xlu2 %3299 }
 0x544   : > { %3334 = vst.msk [vmem:[%s7164_s6 + $0x70] sm:$0xff] %vm3319_vm10, %v3300_v23 }
 0x549   : > { %3775 = vperm.xlu1 %4774, %v3453_v46   ;;  %3765 = vperm.xlu2 %4775, %v3451_v62  }
 0x54a   : > { %3770 = vperm.xlu0 %4773, %v3452_v18  }
 0x54b   : > { %v3296_v17 = vpop.permute.xlu0 %3295  ;;  %v7907_v20 = vpop.permute.xlu2 %3573 }
 0x54c   : > { %3332 = vst.msk [vmem:[%s7164_s6 + $0x60] sm:$0xff] %vm3319_vm10, %v3296_v17 }
 0x551   : > { %3790 = vperm.xlu1 %4774, %v3456_v38   ;;  %3780 = vperm.xlu2 %4775, %v3454_v61  }
 0x552   : > { %3785 = vperm.xlu0 %4773, %v3455_v44  }
 0x553   : > { %v7911_v49 = vpop.permute.xlu2 %3588  ;;  %v3298_v21 = vpop.permute.xlu1 %3297 }
 0x554   : > { %3333 = vst.msk [vmem:[%s7164_s6 + $0x68] sm:$0xff] %vm3319_vm10, %v3298_v21 }
 0x559   : > { %3805 = vperm.xlu1 %4774, %v3459_v7   ;;  %3795 = vperm.xlu2 %4775, %v3457_v39  }
 0x55a   : > { %3800 = vperm.xlu0 %4773, %v3458_v27   ;;  %v3515_v27 = vsub.f32 %v7758_v30, %v3435_v41  ;;  %v7950_v30 = vfloor.f32 %v3562_v55 }
 0x55b   : > { %v7915_v46 = vpop.permute.xlu2 %3598  ;;  %v7917_v62 = vpop.permute.xlu1 %3568 }
 0x55c   : > { %vm3647_vm15 = vcmp.eq.f32.partialorder %v7950_v30, %v7907_v20  ;;  %vm3646_vm1 = vcmp.eq.f32.partialorder %v7950_v30, %v7917_v62  ;;  %vm3650_vm2 = vcmp.eq.f32.partialorder %v7950_v30, %v7911_v49  ;;  %v3404_v49 = vmax.f32 %v3388_v53, 0.0 }
 0x55d   : > { %v3529_v62 = vsub.f32 %v7852_v25, %v3449_v26  ;;  %vm3652_vm7 = vcmp.eq.f32.partialorder %v7950_v30, %v7915_v46  ;;  %v9369_v46 = vld [vmem:[#allocation71_spill] sm:$0xff] }
 0x561   : > { %3820 = vperm.xlu1 %4774, %v3462_v29   ;;  %3810 = vperm.xlu2 %4775, %v3460_v3   ;;  %v3514_v3 = vsub.f32 %v7749_v35, %v3434_v40  ;;  %v3517_v35 = vsub.f32 %v7761_v34, %v3437_v16  ;;  %v3518_v40 = vsub.f32 %v7774_v45, %v3438_v54 }
 0x562   : > { %3815 = vperm.xlu0 %4773, %v3461_v57   ;;  %v3522_v34 = vsub.f32 %v7796_v52, %v3442_v58  ;;  %v3520_v16 = vsub.f32 %v7794_v31, %v3440_v10  ;;  %v3521_v45 = vsub.f32 %v7800_v8, %v3441_v59  ;;  %v3525_v52 = vsub.f32 %v7816_v48, %v3445_v5  ;;  %v9362_v59 = vld [vmem:[#allocation40_spill] sm:$0xff] }
 0x563   : > { %v7919_v18 = vpop.permute.xlu2 %3613  ;;  %v7921_v61 = vpop.permute.xlu1 %3583  ;;  %v3523_v31 = vsub.f32 %v7814_v37, %v3443_v36  ;;  %v3524_v8 = vsub.f32 %v7820_v51, %v3444_v0  ;;  %v3387_v48 = vmul.f32 0.125, %v9362_v59  ;;  %v9363_v51 = vld [vmem:[#allocation34_spill] sm:$0xff] }
 0x564   : > { %v3302_v44 = vpop.permute.xlu0 %3301  ;;  %v3386_v0 = vmul.f32 0.125, %v9363_v51  ;;  %vm3649_vm4 = vcmp.eq.f32.partialorder %v7950_v30, %v7921_v61  ;;  %v9366_v61 = vmov 1   ;;  %vm3655_vm9 = vcmp.eq.f32.partialorder %v7950_v30, %v7919_v18  ;;  %v9373_v51 = vld [vmem:[#allocation37_spill] sm:$0xff]  ;;  %v9374_v18 = vld [vmem:[#allocation72_spill] sm:$0xff] }
 0x565   : > { %3335 = vst.msk [vmem:[%s7164_s6 + $0x78] sm:$0xff] %vm3319_vm10, %v3302_v44  ;;  %v3403_v42 = vmax.f32 %v3387_v48, 0.0  ;;  %v9375_v43 = vfloor.f32 %v9374_v18 }
 0x567   : > { %v8006_v23 = vmin.f32 %v3403_v42, 3.0 }
 0x569   : > { %3835 = vperm.xlu1 %4774, %v3465_v14   ;;  %3825 = vperm.xlu2 %4775, %v3463_v56   ;;  %v3402_v14 = vmax.f32 %v3386_v0, 0.0  ;;  %v3467_v44 = vfloor.f32 %v8006_v23 }
 0x56a   : > { %3830 = vperm.xlu0 %4773, %v3464_v1   ;;  %v3527_v1 = vsub.f32 %v7839_v28, %v3447_v32  ;;  %v9365_v32 = vld [vmem:[#allocation33_spill] sm:$0xff] }
 0x56b   : > { %v7925_v38 = vpop.permute.xlu2 %3628  ;;  %v3594_v39 = vpop.permute.xlu1 %3593  ;;  %v3391_v17 = vmul.f32 0.125, %v9365_v32  ;;  %v8015_v20 = vmin.f32 %v3402_v14, 3.0 }
 0x56c   : > { %v3579_v22 = vpop.permute.xlu0 %3578  ;;  %vm3651_vm11 = vcmp.eq.f32.partialorder %v7950_v30, %v3594_v39  ;;  %vm3658_vm13 = vcmp.eq.f32.partialorder %v7950_v30, %v7925_v38 }
 0x56d   : > { %vm3648_vm14 = vcmp.eq.f32.partialorder %v7950_v30, %v3579_v22  ;;  %v3407_v39 = vmax.f32 %v3391_v17, 0.0  ;;  %v3466_v22 = vfloor.f32 %v8015_v20 }
 0x571   : > { %3866 = vperm.xlu1 %4774, %v3516_v6   ;;  %3856 = vperm.xlu2 %4775, %v3514_v3   ;;  %v8028_v6 = vmin.f32 %v3404_v49, 3.0  ;;  %v9367_v3 = vld [vmem:[#allocation59_spill] sm:$0xff]  ;;  %v9377_v49 = vld [vmem:[#allocation60_spill] sm:$0xff] }
 0x572   : > { %3861 = vperm.xlu0 %4773, %v3515_v27   ;;  %v3392_v27 = vmul.f32 0.125, %v9367_v3 }
 0x573   : > { %v7936_v7 = vpop.permute.xlu2 %3643  ;;  %v3609_v47 = vpop.permute.xlu1 %3608 }
 0x574   : > { %v7938_v33 = vpop.permute.xlu0 %3603  ;;  %vm3654_vm0 = vcmp.eq.f32.partialorder %v7950_v30, %v3609_v47  ;;  %vm3661_vm10 = vcmp.eq.f32.partialorder %v7950_v30, %v7936_v7 }
 0x575   : > { %vm3653_vm5 = vcmp.eq.f32.partialorder %v7950_v30, %v7938_v33  ;;  %v9368_v33 = vld [vmem:[#allocation35_spill] sm:$0xff] }
 0x579   : > { %3881 = vperm.xlu1 %4774, %v3519_v24   ;;  %3871 = vperm.xlu2 %4775, %v3517_v35   ;;  %v8042_v24 = vmin.f32 %v3407_v39, 3.0  ;;  %v3394_v35 = vmul.f32 0.125, %v9368_v33 }
 0x57a   : > { %3876 = vperm.xlu0 %4773, %v3518_v40  }
 0x57b   : > { %v3675_v41 = vpop.permute.xlu2 %3674  ;;  %v3624_v19 = vpop.permute.xlu1 %3623 }
 0x57c   : > { %v7953_v56 = vsel %vm3648_vm14, %v3675_v41, 0.0  ;;  %v7955_v63 = vpop.permute.xlu0 %3618  ;;  %vm3657_vm3 = vcmp.eq.f32.partialorder %v7950_v30, %v3624_v19  ;;  %v3408_v41 = vmax.f32 %v3392_v27, 0.0  ;;  %v3468_v19 = vfloor.f32 %v8028_v6 }
 0x57d   : > { %vm3656_vm8 = vcmp.eq.f32.partialorder %v7950_v30, %v7955_v63  ;;  %v3397_v63 = vmul.f32 0.125, %v9373_v51 }
 0x581   : > { %3896 = vperm.xlu1 %4774, %v3522_v34   ;;  %3886 = vperm.xlu2 %4775, %v3520_v16   ;;  %v3410_v34 = vmax.f32 %v3394_v35, 0.0  ;;  %v3471_v16 = vfloor.f32 %v8042_v24 }
 0x582   : > { %3891 = vperm.xlu0 %4773, %v3521_v45   ;;  %v9370_v45 = vfloor.f32 %v9369_v46 }
 0x583   : > { %v3690_v12 = vpop.permute.xlu2 %3689  ;;  %v3639_v54 = vpop.permute.xlu1 %3638 }
 0x584   : > { %v7967_v57 = vsel %vm3651_vm11, %v3690_v12, 0.0  ;;  %v7969_v29 = vpop.permute.xlu0 %3633  ;;  %vm3660_vm6 = vcmp.eq.f32.partialorder %v7950_v30, %v3639_v54  ;;  %v9371_v12 = vld [vmem:[#allocation43_spill] sm:$0xff] }
 0x585   : > { %v3393_v54 = vmul.f32 0.125, %v9371_v12  ;;  %vm3659_vm12 = vcmp.eq.f32.partialorder %v7950_v30, %v7969_v29 }
 0x589   : > { %3911 = vperm.xlu1 %4774, %v3525_v52   ;;  %3901 = vperm.xlu2 %4775, %v3523_v31  }
 0x58a   : > { %3906 = vperm.xlu0 %4773, %v3524_v8   ;;  %v8061_v8 = vmin.f32 %v3408_v41, 3.0 }
 0x58b   : > { %v3705_v58 = vpop.permute.xlu2 %3704  ;;  %v3670_v10 = vpop.permute.xlu1 %3669 }
 0x58c   : > { %v7986_v37 = vsel %vm3654_vm0, %v3705_v58, 0.0  ;;  %v3665_v5 = vpop.permute.xlu0 %3664  ;;  %v7988_v36 = vsel %vm3647_vm15, %v3670_v10, 0.0  ;;  %v9372_v58 = vld [vmem:[#allocation27_spill] sm:$0xff]  ;;  %v3472_v42 = vfloor.f32 %v8061_v8 }
 0x58d   : > { %v7991_v11 = vsel %vm3646_vm1, %v3665_v5, 0.0  ;;  %v3395_v10 = vmul.f32 0.125, %v9372_v58  ;;  %v8068_v5 = vmin.f32 %v3410_v34, 3.0 }
 0x58f   : > { %v3474_v14 = vfloor.f32 %v8068_v5 }
 0x591   : > { %3926 = vperm.xlu1 %4774, %v3528_v60   ;;  %3916 = vperm.xlu2 %4775, %v3526_v13   ;;  %v3409_v60 = vmax.f32 %v3393_v54, 0.0  ;;  %v3411_v13 = vmax.f32 %v3395_v10, 0.0  ;;  %v9380_v10 = vld [vmem:[#allocation61_spill] sm:$0xff] }
 0x592   : > { %3921 = vperm.xlu0 %4773, %v3527_v1   ;;  %v3413_v1 = vmax.f32 %v3397_v63, 0.0 }
 0x593   : > { %v3720_v50 = vpop.permute.xlu2 %3719  ;;  %v3685_v4 = vpop.permute.xlu1 %3684  ;;  %v8079_v53 = vmin.f32 %v3409_v60, 3.0  ;;  %v8088_v17 = vmin.f32 %v3411_v13, 3.0 }
 0x594   : > { %v8010_v15 = vsel %vm3657_vm3, %v3720_v50, 0.0  ;;  %v3680_v28 = vpop.permute.xlu0 %3679  ;;  %v8012_v9 = vsel %vm3650_vm2, %v3685_v4, 0.0  ;;  %v9376_v50 = vld [vmem:[#allocation46_spill] sm:$0xff] }
 0x595   : > { %v8017_v21 = vsel %vm3649_vm4, %v3680_v28, 0.0  ;;  %v3396_v4 = vmul.f32 0.125, %v9376_v50  ;;  %v3475_v33 = vfloor.f32 %v8088_v17  ;;  %v3473_v35 = vfloor.f32 %v8079_v53 }
 0x597   : > { %v3412_v27 = vmax.f32 %v3396_v4, 0.0 }
 0x599   : > { %4777 = vset.pattern.permute.xlu1 %v9366_v61  ;;  %3931 = vperm.xlu2 %4775, %v3529_v62   ;;  %v3398_v62 = vmul.f32 0.125, %v9377_v49  ;;  %v8107_v38 = vmin.f32 %v3412_v27, 3.0 }
 0x59a   : > { %4776 = vset.pattern.permute.xlu0 %v9366_v61  ;;  %3973 = vperm.xlu1 %4777, %v3467_v44  }
 0x59b   : > { %3968 = vperm.xlu0 %4776, %v3466_v22   ;;  %v3735_v25 = vpop.permute.xlu2 %3734  ;;  %v3700_v26 = vpop.permute.xlu1 %3699  ;;  %v3476_v50 = vfloor.f32 %v8107_v38 }
 0x59c   : > { %v8038_v47 = vsel %vm3660_vm6, %v3735_v25, 0.0  ;;  %v3695_v2 = vpop.permute.xlu0 %3694  ;;  %v8040_v55 = vsel %vm3653_vm5, %v3700_v26, 0.0  ;;  %v8095_v25 = vmin.f32 %v3413_v1, 3.0  ;;  %v9378_v26 = vld [vmem:[#allocation39_spill] sm:$0xff] }
 0x59d   : > { %v8045_v40 = vsel %vm3652_vm7, %v3695_v2, 0.0  ;;  %v3400_v29 = vmul.f32 0.125, %v9378_v26  ;;  %v3414_v2 = vmax.f32 %v3398_v62, 0.0  ;;  %v3482_v26 = vceil.f32 %v8015_v20 }
 0x59e   : > { %v3477_v34 = vfloor.f32 %v8095_v25 }
 0x59f   : > { %v3416_v41 = vmax.f32 %v3400_v29, 0.0  ;;  %v8113_v54 = vmin.f32 %v3414_v2, 3.0  ;;  %v3530_v2 = vsub.f32 %v3482_v26, %v8015_v20 }
 0x5a1   : > { %4778 = vset.pattern.permute.xlu2 %v9366_v61  ;;  %v8119_v63 = vmin.f32 %v3416_v41, 3.0 }
 0x5a2   : > { %3983 = vperm.xlu1 %4777, %v9370_v45   ;;  %3978 = vperm.xlu2 %4778, %v3468_v19  }
 0x5a3   : > { %3993 = vperm.xlu0 %4776, %v3471_v16   ;;  %v8059_v52 = vpop.permute.xlu2 %3765  ;;  %v3715_v31 = vpop.permute.xlu1 %3714  ;;  %v8824_v4 = vfloor.f32 %v8119_v63 }
 0x5a4   : > { %v3710_v59 = vpop.permute.xlu0 %3709  ;;  %v8066_v48 = vsel %vm3656_vm8, %v3715_v31, 0.0  ;;  %v9379_v31 = vld [vmem:[#allocation49_spill] sm:$0xff]  ;;  %vm3839_vm2 = vcmp.eq.f32.partialorder %v7950_v30, %v8059_v52 }
 0x5a5   : > { %v8071_v0 = vsel %vm3655_vm9, %v3710_v59, 0.0  ;;  %v3399_v58 = vmul.f32 0.125, %v9379_v31  ;;  %v3401_v59 = vmul.f32 0.125, %v9380_v10  ;;  %v3483_v10 = vceil.f32 %v8006_v23 }
 0x5a7   : > { %v3415_v13 = vmax.f32 %v3399_v58, 0.0  ;;  %v3417_v1 = vmax.f32 %v3401_v59, 0.0  ;;  %v3546_v59 = vsub.f32 %v8015_v20, %v3466_v22  ;;  %v3547_v20 = vsub.f32 %v8006_v23, %v3467_v44 }
 0x5a9   : > { %v8134_v49 = vmin.f32 %v3415_v13, 3.0  ;;  %v8136_v62 = vmin.f32 %v3417_v1, 3.0 }
 0x5aa   : > { %3998 = vperm.xlu1 %4777, %v3472_v42   ;;  %3988 = vperm.xlu2 %4778, %v9375_v43   ;;  %v3478_v43 = vfloor.f32 %v8113_v54 }
 0x5ab   : > { %4008 = vperm.xlu0 %4776, %v3474_v14   ;;  %v8086_v28 = vpop.permute.xlu2 %3780  ;;  %v3730_v32 = vpop.permute.xlu1 %3729  ;;  %v8823_v29 = vfloor.f32 %v8136_v62  ;;  %v8825_v27 = vfloor.f32 %v8134_v49 }
 0x5ac   : > { %v3725_v39 = vpop.permute.xlu0 %3724  ;;  %v8093_v61 = vsel %vm3659_vm12, %v3730_v32, 0.0  ;;  %vm3842_vm5 = vcmp.eq.f32.partialorder %v7950_v30, %v8086_v28 }
 0x5ad   : > { %v8098_v3 = vsel %vm3658_vm13, %v3725_v39, 0.0 }
 0x5b2   : > { %4013 = vperm.xlu1 %4777, %v3475_v33   ;;  %4003 = vperm.xlu2 %4778, %v3473_v35  }
 0x5b3   : > { %4023 = vperm.xlu0 %4776, %v3477_v34   ;;  %v8111_v45 = vpop.permute.xlu2 %3795  ;;  %v3761_v12 = vpop.permute.xlu1 %3760 }
 0x5b4   : > { %v3740_v51 = vpop.permute.xlu0 %3739  ;;  %vm3838_vm14 = vcmp.eq.f32.partialorder %v7950_v30, %v3761_v12  ;;  %vm3845_vm8 = vcmp.eq.f32.partialorder %v7950_v30, %v8111_v45 }
 0x5b5   : > { %v8121_v60 = vsel %vm3661_vm10, %v3740_v51, 0.0  ;;  %v3531_v51 = vsub.f32 %v3483_v10, %v8006_v23  ;;  %v3548_v23 = vsub.f32 %v8028_v6, %v3468_v19 }
 0x5ba   : > { %4028 = vperm.xlu1 %4777, %v3478_v43   ;;  %4018 = vperm.xlu2 %4778, %v3476_v50  }
 0x5bb   : > { %4038 = vperm.xlu0 %4776, %v8824_v4   ;;  %v8132_v7 = vpop.permute.xlu2 %3810  ;;  %v3776_v32 = vpop.permute.xlu1 %3775 }
 0x5bc   : > { %v3771_v39 = vpop.permute.xlu0 %3770  ;;  %vm3841_vm11 = vcmp.eq.f32.partialorder %v7950_v30, %v3776_v32  ;;  %vm3848_vm12 = vcmp.eq.f32.partialorder %v7950_v30, %v8132_v7 }
 0x5bd   : > { %vm3840_vm0 = vcmp.eq.f32.partialorder %v7950_v30, %v3771_v39  ;;  %v3487_v39 = vceil.f32 %v8042_v24 }
 0x5c2   : > { %4043 = vperm.xlu1 %4777, %v8823_v29   ;;  %4033 = vperm.xlu2 %4778, %v8825_v27   ;;  %v3484_v27 = vceil.f32 %v8028_v6 }
 0x5c3   : > { %4064 = vperm.xlu0 %4776, %v3530_v2   ;;  %v8146_v41 = vpop.permute.xlu2 %3825  ;;  %v3791_v31 = vpop.permute.xlu1 %3790 }
 0x5c4   : > { %v8148_v58 = vpop.permute.xlu0 %3785  ;;  %v3532_v22 = vsub.f32 %v3484_v27, %v8028_v6  ;;  %vm3844_vm15 = vcmp.eq.f32.partialorder %v7950_v30, %v3791_v31  ;;  %v9381_v6 = vld [vmem:[#allocation76_spill] sm:$0xff]  ;;  %vm3851_vm10 = vcmp.eq.f32.partialorder %v7950_v30, %v8146_v41 }
 0x5c5   : > { %vm3843_vm3 = vcmp.eq.f32.partialorder %v7950_v30, %v8148_v58  ;;  %v3488_v58 = vceil.f32 %v8061_v8 }
 0x5c7   : > { %v3536_v28 = vsub.f32 %v3488_v58, %v8061_v8 }
 0x5ca   : > { %4256 = vperm.xlu1 %4777, %v3546_v59   ;;  %4160 = vperm.xlu2 %4778, %v3482_v26  }
 0x5cb   : > { %4069 = vperm.xlu0 %4776, %v3531_v51   ;;  %v3857_v13 = vpop.permute.xlu2 %3856  ;;  %v3806_v1 = vpop.permute.xlu1 %3805 }
 0x5cc   : > { %v3934_v2 = vsel %vm3838_vm14, %v3857_v13, 0.0  ;;  %v8156_v29 = vpop.permute.xlu0 %3800  ;;  %v3485_v13 = vceil.f32 %v9369_v46  ;;  %vm3847_vm1 = vcmp.eq.f32.partialorder %v7950_v30, %v3806_v1 }
 0x5cd   : > { %v8159_v4 = vadd.f32 %v3934_v2, %v7991_v11  ;;  %vm3846_vm6 = vcmp.eq.f32.partialorder %v7950_v30, %v8156_v29  ;;  %v3489_v29 = vceil.f32 %v8079_v53 }
 0x5ce   : > { %v3533_v44 = vsub.f32 %v3485_v13, %v9369_v46 }
 0x5cf   : > { %v3537_v45 = vsub.f32 %v3489_v29, %v8079_v53 }
 0x5d2   : > { %4261 = vperm.xlu1 %4777, %v3547_v20   ;;  %4165 = vperm.xlu2 %4778, %v3483_v10  }
 0x5d3   : > { %4074 = vperm.xlu0 %4776, %v3532_v22   ;;  %v3872_v12 = vpop.permute.xlu2 %3871  ;;  %v3821_v26 = vpop.permute.xlu1 %3820  ;;  %v3486_v22 = vceil.f32 %v9374_v18 }
 0x5d4   : > { %v3937_v59 = vsel %vm3841_vm11, %v3872_v12, 0.0  ;;  %v8167_v51 = vpop.permute.xlu0 %3815  ;;  %vm3850_vm4 = vcmp.eq.f32.partialorder %v7950_v30, %v3821_v26 }
 0x5d5   : > { %v8170_v11 = vadd.f32 %v3937_v59, %v8017_v21  ;;  %v3534_v12 = vsub.f32 %v3486_v22, %v9374_v18  ;;  %vm3849_vm9 = vcmp.eq.f32.partialorder %v7950_v30, %v8167_v51  ;;  %v3553_v51 = vsub.f32 %v8079_v53, %v3473_v35 }
 0x5d6   : > { %v3491_v53 = vceil.f32 %v8088_v17 }
 0x5da   : > { %4266 = vperm.xlu1 %4777, %v3548_v23   ;;  %4170 = vperm.xlu2 %4778, %v3484_v27  }
 0x5db   : > { %4079 = vperm.xlu0 %4776, %v3533_v44   ;;  %v3887_v32 = vpop.permute.xlu2 %3886  ;;  %v3836_v10 = vpop.permute.xlu1 %3835  ;;  %v9382_v44 = vld [vmem:[#allocation77_spill] sm:$0xff] }
 0x5dc   : > { %v3940_v2 = vsel %vm3844_vm15, %v3887_v32, 0.0  ;;  %v8178_v20 = vpop.permute.xlu0 %3830  ;;  %vm3853_vm7 = vcmp.eq.f32.partialorder %v7950_v30, %v3836_v10  ;;  %vm4382_vm15 = vcmask 130048  }
 0x5dd   : > { %v8181_v21 = vadd.f32 %v3940_v2, %v8045_v40  ;;  %vm3852_vm13 = vcmp.eq.f32.partialorder %v7950_v30, %v8178_v20  ;;  %v3554_v20 = vsub.f32 %v8068_v5, %v3474_v14 }
 0x5e2   : > { %4271 = vperm.xlu1 %4777, %v9381_v6   ;;  %4175 = vperm.xlu2 %4778, %v3485_v13   ;;  %v3535_v13 = vsub.f32 %v3487_v39, %v8042_v24  ;;  %v3551_v6 = vsub.f32 %v8042_v24, %v3471_v16 }
 0x5e3   : > { %4084 = vperm.xlu0 %4776, %v3534_v12   ;;  %v3902_v19 = vpop.permute.xlu2 %3901  ;;  %v3867_v46 = vpop.permute.xlu1 %3866 }
 0x5e4   : > { %v3943_v27 = vsel %vm3847_vm1, %v3902_v19, 0.0  ;;  %v3862_v40 = vpop.permute.xlu0 %3861  ;;  %v3936_v31 = vsel %vm3840_vm0, %v3867_v46, 0.0 }
 0x5e5   : > { %v8191_v59 = vadd.f32 %v3943_v27, %v8071_v0  ;;  %v3935_v18 = vsel %vm3839_vm2, %v3862_v40, 0.0  ;;  %v8194_v23 = vadd.f32 %v3936_v31, %v7953_v56  ;;  %v3552_v40 = vsub.f32 %v8061_v8, %v3472_v42 }
 0x5e6   : > { %v8198_v1 = vadd.f32 %v3935_v18, %v7988_v36  ;;  %v3490_v8 = vceil.f32 %v8068_v5 }
 0x5ea   : > { %4276 = vperm.xlu1 %4777, %v9382_v44   ;;  %4180 = vperm.xlu2 %4778, %v3486_v22  }
 0x5eb   : > { %4089 = vperm.xlu0 %4776, %v3535_v13   ;;  %v3917_v52 = vpop.permute.xlu2 %3916  ;;  %v3882_v0 = vpop.permute.xlu1 %3881  ;;  %v3538_v13 = vsub.f32 %v3490_v8, %v8068_v5 }
 0x5ec   : > { %v3946_v56 = vsel %vm3850_vm4, %v3917_v52, 0.0  ;;  %v3877_v32 = vpop.permute.xlu0 %3876  ;;  %v3939_v36 = vsel %vm3843_vm3, %v3882_v0, 0.0 }
 0x5ed   : > { %v8208_v2 = vadd.f32 %v3946_v56, %v8098_v3  ;;  %v3938_v12 = vsel %vm3842_vm5, %v3877_v32, 0.0  ;;  %v8211_v22 = vadd.f32 %v3939_v36, %v7967_v57  ;;  %v3539_v56 = vsub.f32 %v3491_v53, %v8088_v17 }
 0x5ee   : > { %v8215_v26 = vadd.f32 %v3938_v12, %v8012_v9  ;;  %v3492_v36 = vceil.f32 %v8107_v38 }
 0x5f0   : > { %v3540_v12 = vsub.f32 %v3492_v36, %v8107_v38 }
 0x5f2   : > { %4281 = vperm.xlu1 %4777, %v3551_v6   ;;  %4185 = vperm.xlu2 %4778, %v3487_v39   ;;  %v3493_v6 = vceil.f32 %v8095_v25 }
 0x5f3   : > { %4094 = vperm.xlu0 %4776, %v3536_v28   ;;  %v3932_v57 = vpop.permute.xlu2 %3931  ;;  %v3897_v3 = vpop.permute.xlu1 %3896  ;;  %v3556_v28 = vsub.f32 %v8107_v38, %v3476_v50  ;;  %v3337_v38 = vld [vmem:[%s8543_s3 + $0x8] sm:$0xff]  ;;  %v3336_v50 = vld [vmem:[%s8543_s3] sm:$0xff] }
 0x5f4   : > { %v3949_v9 = vsel %vm3853_vm7, %v3932_v57, 0.0  ;;  %v3892_v19 = vpop.permute.xlu0 %3891  ;;  %v3942_v46 = vsel %vm3846_vm6, %v3897_v3, 0.0  ;;  %v3541_v57 = vsub.f32 %v3493_v6, %v8095_v25  ;;  %4445 = vmatpush.msra.mxu3 %v3337_v38 }
 0x5f5   : > { %v8227_v24 = vadd.f32 %v3949_v9, %v8121_v60  ;;  %v3941_v16 = vsel %vm3845_vm8, %v3892_v19, 0.0  ;;  %v8230_v27 = vadd.f32 %v3942_v46, %v7986_v37  ;;  %v3494_v9 = vceil.f32 %v8113_v54 }
 0x5f6   : > { %v8234_v10 = vadd.f32 %v3941_v16, %v8040_v55  ;;  %v3557_v19 = vsub.f32 %v8095_v25, %v3477_v34  ;;  %4446 = vmatpush.msra.mxu3 %v3336_v50  ;;  %v3495_v25 = vceil.f32 %v8134_v49  ;;  %v3558_v34 = vsub.f32 %v8113_v54, %v3478_v43 }
 0x5f7   : > { %v3542_v46 = vsub.f32 %v3494_v9, %v8113_v54 }
 0x5fa   : > { %4286 = vperm.xlu1 %4777, %v3552_v40   ;;  %4190 = vperm.xlu2 %4778, %v3488_v58  }
 0x5fb   : > { %4099 = vperm.xlu0 %4776, %v3537_v45   ;;  %v3912_v60 = vpop.permute.xlu1 %3911  ;;  %v3543_v45 = vsub.f32 %v3495_v25, %v8134_v49 }
 0x5fc   : > { %v3907_v37 = vpop.permute.xlu0 %3906  ;;  %v3945_v31 = vsel %vm3849_vm9, %v3912_v60, 0.0  ;;  %v8244_v55 = vpop.permute.xlu2 %3978 }
 0x5fd   : > { %v3944_v18 = vsel %vm3848_vm12, %v3907_v37, 0.0  ;;  %v8247_v39 = vadd.f32 %v3945_v31, %v8010_v15 }
 0x5fe   : > { %v8251_v42 = vadd.f32 %v3944_v18, %v8066_v48  ;;  %v3496_v18 = vceil.f32 %v8119_v63 }
 0x602   : > { %4291 = vperm.xlu1 %4777, %v3553_v51   ;;  %4195 = vperm.xlu2 %4778, %v3489_v29  }
 0x603   : > { %4104 = vperm.xlu0 %4776, %v3538_v13   ;;  %v3927_v7 = vpop.permute.xlu1 %3926  ;;  %v3544_v13 = vsub.f32 %v3496_v18, %v8119_v63 }
 0x604   : > { %v3922_v15 = vpop.permute.xlu0 %3921  ;;  %v3948_v44 = vsel %vm3852_vm13, %v3927_v7, 0.0  ;;  %v8261_v48 = vpop.permute.xlu2 %3988 }
 0x605   : > { %v3947_v52 = vsel %vm3851_vm10, %v3922_v15, 0.0  ;;  %v8264_v0 = vadd.f32 %v3948_v44, %v8038_v47  ;;  %v3497_v15 = vceil.f32 %v8136_v62  ;;  %v3564_v44 = vmul.f32 4.0, %v7950_v30 }
 0x606   : > { %v8268_v35 = vadd.f32 %v3947_v52, %v8093_v61  ;;  %v3555_v61 = vsub.f32 %v8088_v17, %v3475_v33  ;;  %v9384_v52 = vfloor.f32 %v8119_v63 }
 0x60a   : > { %4296 = vperm.xlu1 %4777, %v3554_v20   ;;  %4200 = vperm.xlu2 %4778, %v3490_v8   ;;  %v9383_v8 = vfloor.f32 %v8134_v49  ;;  %v3545_v20 = vsub.f32 %v3497_v15, %v8136_v62 }
 0x60b   : > { %4109 = vperm.xlu0 %4776, %v3539_v56  }
 0x60c   : > { %v8274_v41 = vpop.permute.xlu2 %4003  ;;  %v8276_v32 = vpop.permute.xlu1 %3973  ;;  %v3559_v51 = vsub.f32 %v8134_v49, %v9383_v8  ;;  %v9385_v49 = vld [vmem:[#allocation16_spill] sm:$0xff] }
 0x60d   : > { %v8278_v47 = vpop.permute.xlu0 %3968  ;;  %v8340_v56 = vsub.f32 %v9385_v49, %v3564_v44 }
 0x60f   : > { %vm4046_vm14 = vcmp.eq.f32.partialorder %v8340_v56, %v8278_v47  ;;  %vm4047_vm0 = vcmp.eq.f32.partialorder %v8340_v56, %v8276_v32  ;;  %vm4048_vm2 = vcmp.eq.f32.partialorder %v8340_v56, %v8244_v55  ;;  %vm4050_vm6 = vcmp.eq.f32.partialorder %v8340_v56, %v8261_v48 }
 0x610   : > { %vm4053_vm10 = vcmp.eq.f32.partialorder %v8340_v56, %v8274_v41 }
 0x612   : > { %4301 = vperm.xlu1 %4777, %v3555_v61   ;;  %4205 = vperm.xlu2 %4778, %v3491_v53   ;;  %v3560_v53 = vsub.f32 %v8119_v63, %v9384_v52 }
 0x613   : > { %4114 = vperm.xlu0 %4776, %v3540_v12  }
 0x614   : > { %v8285_v5 = vpop.permute.xlu2 %4018  ;;  %v8287_v14 = vpop.permute.xlu1 %3983 }
 0x615   : > { %v8289_v58 = vpop.permute.xlu0 %3993  ;;  %vm4049_vm4 = vcmp.eq.f32.partialorder %v8340_v56, %v8287_v14 }
 0x616   : > { %vm4051_vm8 = vcmp.eq.f32.partialorder %v8340_v56, %v8289_v58 }
 0x61a   : > { %4306 = vperm.xlu1 %4777, %v3556_v28   ;;  %4210 = vperm.xlu2 %4778, %v3492_v36  }
 0x61b   : > { %4119 = vperm.xlu0 %4776, %v3541_v57   ;;  %v9386_v57 = vfloor.f32 %v8136_v62 }
 0x61c   : > { %v8296_v17 = vpop.permute.xlu2 %4033  ;;  %v8298_v33 = vpop.permute.xlu1 %3998 }
 0x61d   : > { %v8300_v3 = vpop.permute.xlu0 %4008  ;;  %vm4052_vm12 = vcmp.eq.f32.partialorder %v8340_v56, %v8298_v33 }
 0x622   : > { %4311 = vperm.xlu1 %4777, %v3557_v19   ;;  %4215 = vperm.xlu2 %4778, %v3493_v6  }
 0x623   : > { %4124 = vperm.xlu0 %4776, %v3542_v46  }
 0x624   : > { %v4161_v16 = vpop.permute.xlu2 %4160  ;;  %v8313_v29 = vpop.permute.xlu1 %4013 }
 0x625   : > { %v8315_v40 = vpop.permute.xlu0 %4023  ;;  %vm4238_vm11 = vcmp.eq.f32.partialorder %v8340_v56, %v4161_v16 }
 0x62a   : > { %4316 = vperm.xlu1 %4777, %v3558_v34   ;;  %4220 = vperm.xlu2 %4778, %v3494_v9   ;;  %v3561_v9 = vsub.f32 %v8136_v62, %v9386_v57 }
 0x62b   : > { %4129 = vperm.xlu0 %4776, %v3543_v45  }
 0x62c   : > { %v4166_v60 = vpop.permute.xlu2 %4165  ;;  %v8322_v37 = vpop.permute.xlu1 %4028 }
 0x62d   : > { %v8324_v31 = vpop.permute.xlu0 %4038  ;;  %vm4239_vm1 = vcmp.eq.f32.partialorder %v8340_v56, %v4166_v60 }
 0x632   : > { %4321 = vperm.xlu1 %4777, %v3559_v51   ;;  %4225 = vperm.xlu2 %4778, %v3495_v25  }
 0x633   : > { %4134 = vperm.xlu0 %4776, %v3544_v13  }
 0x634   : > { %v4171_v54 = vpop.permute.xlu2 %4170  ;;  %v8331_v43 = vpop.permute.xlu1 %4043 }
 0x635   : > { %v4065_v7 = vpop.permute.xlu0 %4064  ;;  %vm4240_vm3 = vcmp.eq.f32.partialorder %v8340_v56, %v4171_v54 }
 0x636   : > { %v4142_v30 = vsel %vm4046_vm14, %v4065_v7, 0.0 }
 0x63a   : > { %4326 = vperm.xlu1 %4777, %v3560_v53   ;;  %4230 = vperm.xlu2 %4778, %v3496_v18  }
 0x63b   : > { %4139 = vperm.xlu0 %4776, %v3545_v20  }
 0x63c   : > { %v4176_v36 = vpop.permute.xlu2 %4175  ;;  %v4257_v61 = vpop.permute.xlu1 %4256 }
 0x63d   : > { %v4070_v12 = vpop.permute.xlu0 %4069  ;;  %v4334_v6 = vsel %vm4238_vm11, %v4257_v61, 0.0  ;;  %vm4241_vm5 = vcmp.eq.f32.partialorder %v8340_v56, %v4176_v36  ;;  %vm4054_vm11 = vcmp.eq.f32.partialorder %v8340_v56, %v8300_v3 }
 0x63e   : > { %v4350_v28 = vadd.f32 %v4334_v6, %v4142_v30  ;;  %v4143_v38 = vsel %vm4047_vm0, %v4070_v12, 0.0 }
 0x640   : > { %v4366_v63 = vmul.f32 %v4350_v28, %v8159_v4 }
 0x642   : > { %4235 = vperm.xlu2 %4778, %v3497_v15   ;;  %4331 = vperm.xlu1 %4777, %v3561_v9  }
 0x643   : > { %4695 = vmatmul.msk.f32.vlgmr.msra.gmra.mxu3 %vm4382_vm15, %v4366_v63 }
 0x644   : > { %v4181_v47 = vpop.permute.xlu2 %4180  ;;  %v4262_v19 = vpop.permute.xlu1 %4261 }
 0x645   : > { %v4075_v50 = vpop.permute.xlu0 %4074  ;;  %v4335_v46 = vsel %vm4239_vm1, %v4262_v19, 0.0  ;;  %vm4242_vm7 = vcmp.eq.f32.partialorder %v8340_v56, %v4181_v47  ;;  %vm4055_vm1 = vcmp.eq.f32.partialorder %v8340_v56, %v8313_v29 }
 0x646   : > { %v4351_v4 = vadd.f32 %v4335_v46, %v4143_v38  ;;  %v4144_v25 = vsel %vm4048_vm2, %v4075_v50, 0.0 }
 0x648   : > { %v4367_v16 = vmul.f32 %v4351_v4, %v8198_v1 }
 0x64b   : > { %4696 = vmatmul.msk.f32.gmra.mxu3 %vm4382_vm15, %v4367_v16 }
 0x64c   : > { %v4267_v62 = vpop.permute.xlu1 %4266  ;;  %v4186_v32 = vpop.permute.xlu2 %4185 }
 0x64d   : > { %v4080_v34 = vpop.permute.xlu0 %4079  ;;  %v4336_v45 = vsel %vm4240_vm3, %v4267_v62, 0.0  ;;  %vm4243_vm9 = vcmp.eq.f32.partialorder %v8340_v56, %v4186_v32  ;;  %vm4056_vm3 = vcmp.eq.f32.partialorder %v8340_v56, %v8285_v5 }
 0x64e   : > { %v4352_v60 = vadd.f32 %v4336_v45, %v4144_v25  ;;  %v4145_v8 = vsel %vm4049_vm4, %v4080_v34, 0.0 }
 0x650   : > { %v4368_v18 = vmul.f32 %v4352_v60, %v8194_v23 }
 0x653   : > { %4697 = vmatmul.msk.f32.gmra.mxu3 %vm4382_vm15, %v4368_v18 }
 0x654   : > { %v4272_v1 = vpop.permute.xlu1 %4271  ;;  %v4191_v54 = vpop.permute.xlu2 %4190 }
 0x655   : > { %v4085_v55 = vpop.permute.xlu0 %4084  ;;  %v4337_v51 = vsel %vm4241_vm5, %v4272_v1, 0.0  ;;  %vm4244_vm13 = vcmp.eq.f32.partialorder %v8340_v56, %v4191_v54  ;;  %vm4057_vm5 = vcmp.eq.f32.partialorder %v8340_v56, %v8315_v40 }
 0x656   : > { %v4353_v13 = vadd.f32 %v4337_v51, %v4145_v8  ;;  %v4146_v15 = vsel %vm4050_vm6, %v4085_v55, 0.0 }
 0x658   : > { %v4369_v7 = vmul.f32 %v4353_v13, %v8170_v11 }
 0x65b   : > { %4698 = vmatmul.msk.f32.gmra.mxu3 %vm4382_vm15, %v4369_v7 }
 0x65c   : > { %v4277_v23 = vpop.permute.xlu1 %4276  ;;  %v4196_v20 = vpop.permute.xlu2 %4195 }
 0x65d   : > { %v4090_v14 = vpop.permute.xlu0 %4089  ;;  %v4338_v44 = vsel %vm4242_vm7, %v4277_v23, 0.0  ;;  %vm4245_vm14 = vcmp.eq.f32.partialorder %v8340_v56, %v4196_v20  ;;  %vm4058_vm7 = vcmp.eq.f32.partialorder %v8340_v56, %v8322_v37 }
 0x65e   : > { %v4354_v52 = vadd.f32 %v4338_v44, %v4146_v15  ;;  %v4147_v49 = vsel %vm4051_vm8, %v4090_v14, 0.0 }
 0x660   : > { %v4370_v53 = vmul.f32 %v4354_v52, %v8215_v26 }
 0x663   : > { %4699 = vmatmul.msk.f32.gmra.mxu3 %vm4382_vm15, %v4370_v53 }
 0x664   : > { %v4282_v11 = vpop.permute.xlu1 %4281  ;;  %v4201_v12 = vpop.permute.xlu2 %4200 }
 0x665   : > { %v4095_v48 = vpop.permute.xlu0 %4094  ;;  %v4339_v36 = vsel %vm4243_vm9, %v4282_v11, 0.0  ;;  %vm4246_vm0 = vcmp.eq.f32.partialorder %v8340_v56, %v4201_v12  ;;  %vm4059_vm9 = vcmp.eq.f32.partialorder %v8340_v56, %v8296_v17 }
 0x666   : > { %v4355_v61 = vadd.f32 %v4339_v36, %v4147_v49  ;;  %v4148_v6 = vsel %vm4052_vm12, %v4095_v48, 0.0 }
 0x668   : > { %v4371_v30 = vmul.f32 %v4355_v61, %v8211_v22 }
 0x66b   : > { %4700 = vmatmul.msk.f32.gmra.mxu3 %vm4382_vm15, %v4371_v30 }
 0x66c   : > { %v4287_v26 = vpop.permute.xlu1 %4286  ;;  %v4206_v9 = vpop.permute.xlu2 %4205 }
 0x66d   : > { %v4100_v58 = vpop.permute.xlu0 %4099  ;;  %v4340_v28 = vsel %vm4244_vm13, %v4287_v26, 0.0  ;;  %vm4247_vm2 = vcmp.eq.f32.partialorder %v8340_v56, %v4206_v9  ;;  %vm4060_vm13 = vcmp.eq.f32.partialorder %v8340_v56, %v8324_v31 }
 0x66e   : > { %v4356_v63 = vadd.f32 %v4340_v28, %v4148_v6  ;;  %v4149_v47 = vsel %vm4053_vm10, %v4100_v58, 0.0 }
 0x670   : > { %v4372_v57 = vmul.f32 %v4356_v63, %v8181_v21 }
 0x673   : > { %4701 = vmatmul.msk.f32.gmra.mxu3 %vm4382_vm15, %v4372_v57 }
 0x674   : > { %v4292_v22 = vpop.permute.xlu1 %4291  ;;  %v4211_v62 = vpop.permute.xlu2 %4210 }
 0x675   : > { %v4105_v33 = vpop.permute.xlu0 %4104  ;;  %v4341_v19 = vsel %vm4245_vm14, %v4292_v22, 0.0  ;;  %vm4248_vm4 = vcmp.eq.f32.partialorder %v8340_v56, %v4211_v62  ;;  %vm4061_vm14 = vcmp.eq.f32.partialorder %v8340_v56, %v8331_v43 }
 0x676   : > { %v4357_v38 = vadd.f32 %v4341_v19, %v4149_v47  ;;  %v4150_v46 = vsel %vm4054_vm11, %v4105_v33, 0.0 }
 0x678   : > { %v4373_v50 = vmul.f32 %v4357_v38, %v8234_v10 }
 0x67b   : > { %4702 = vmatmul.msk.f32.gmra.mxu3 %vm4382_vm15, %v4373_v50 }
 0x67c   : > { %v4297_v21 = vpop.permute.xlu1 %4296  ;;  %v4216_v18 = vpop.permute.xlu2 %4215 }
 0x67d   : > { %v4110_v41 = vpop.permute.xlu0 %4109  ;;  %v4342_v4 = vsel %vm4246_vm0, %v4297_v21, 0.0  ;;  %vm4249_vm6 = vcmp.eq.f32.partialorder %v8340_v56, %v4216_v18  ;;  %vm4577_vm0 = vcmask 1047872  }
 0x67e   : > { %v4358_v16 = vadd.f32 %v4342_v4, %v4150_v46  ;;  %v4151_v32 = vsel %vm4055_vm1, %v4110_v41, 0.0  ;;  %v4881_v41 = vmov 0.0  }
 0x680   : > { %v4374_v25 = vmul.f32 %v4358_v16, %v8230_v27 }
 0x683   : > { %4703 = vmatmul.msk.f32.gmra.mxu3 %vm4382_vm15, %v4374_v25 }
 0x684   : > { %v4302_v10 = vpop.permute.xlu1 %4301  ;;  %v4221_v13 = vpop.permute.xlu2 %4220 }
 0x685   : > { %v4115_v3 = vpop.permute.xlu0 %4114  ;;  %v4343_v34 = vsel %vm4247_vm2, %v4302_v10, 0.0  ;;  %vm4250_vm8 = vcmp.eq.f32.partialorder %v8340_v56, %v4221_v13 }
 0x686   : > { %v4359_v45 = vadd.f32 %v4343_v34, %v4151_v32  ;;  %v4152_v1 = vsel %vm4056_vm3, %v4115_v3, 0.0 }
 0x688   : > { %v4375_v60 = vmul.f32 %v4359_v45, %v8191_v59 }
 0x68b   : > { %4704 = vmatmul.msk.f32.gmra.mxu3 %vm4382_vm15, %v4375_v60 }
 0x68c   : > { %v4307_v27 = vpop.permute.xlu1 %4306  ;;  %v4226_v14 = vpop.permute.xlu2 %4225 }
 0x68d   : > { %v4120_v29 = vpop.permute.xlu0 %4119  ;;  %v4344_v8 = vsel %vm4248_vm4, %v4307_v27, 0.0  ;;  %vm4251_vm12 = vcmp.eq.f32.partialorder %v8340_v56, %v4226_v14 }
 0x68e   : > { %v4360_v55 = vadd.f32 %v4344_v8, %v4152_v1  ;;  %v4153_v54 = vsel %vm4057_vm5, %v4120_v29, 0.0 }
 0x690   : > { %v4376_v51 = vmul.f32 %v4360_v55, %v8251_v42 }
 0x693   : > { %4705 = vmatmul.msk.f32.gmra.mxu3 %vm4382_vm15, %v4376_v51 }
 0x694   : > { %v4312_v59 = vpop.permute.xlu1 %4311  ;;  %v4231_v48 = vpop.permute.xlu2 %4230 }
 0x695   : > { %v4125_v5 = vpop.permute.xlu0 %4124  ;;  %v4345_v7 = vsel %vm4249_vm6, %v4312_v59, 0.0  ;;  %vm4252_vm10 = vcmp.eq.f32.partialorder %v8340_v56, %v4231_v48 }
 0x696   : > { %v4361_v23 = vadd.f32 %v4345_v7, %v4153_v54  ;;  %v4154_v44 = vsel %vm4058_vm7, %v4125_v5, 0.0 }
 0x698   : > { %v4377_v15 = vmul.f32 %v4361_v23, %v8247_v39 }
 0x69b   : > { %4706 = vmatmul.msk.f32.gmra.mxu3 %vm4382_vm15, %v4377_v15 }
 0x69c   : > { %v4317_v42 = vpop.permute.xlu1 %4316  ;;  %v4236_v6 = vpop.permute.xlu2 %4235 }
 0x69d   : > { %v4346_v40 = vsel %vm4250_vm8, %v4317_v42, 0.0  ;;  %v4130_v52 = vpop.permute.xlu0 %4129  ;;  %vm4253_vm11 = vcmp.eq.f32.partialorder %v8340_v56, %v4236_v6 }
 0x69e   : > { %v4362_v53 = vadd.f32 %v4346_v40, %v4154_v44  ;;  %v4155_v11 = vsel %vm4059_vm9, %v4130_v52, 0.0 }
 0x6a0   : > { %v4378_v20 = vmul.f32 %v4362_v53, %v8208_v2 }
 0x6a3   : > { %4707 = vmatmul.msk.f32.gmra.mxu3 %vm4382_vm15, %v4378_v20 }
 0x6a4   : > { %v4322_v39 = vpop.permute.xlu1 %4321 }
 0x6a5   : > { %v4347_v37 = vsel %vm4251_vm12, %v4322_v39, 0.0  ;;  %v4135_v36 = vpop.permute.xlu0 %4134 }
 0x6a6   : > { %v4363_v49 = vadd.f32 %v4347_v37, %v4155_v11  ;;  %v4156_v30 = vsel %vm4060_vm13, %v4135_v36, 0.0 }
 0x6a8   : > { %v4379_v61 = vmul.f32 %v4363_v49, %v8268_v35 }
 0x6ab   : > { %4708 = vmatmul.msk.f32.gmra.mxu3 %vm4382_vm15, %v4379_v61 }
 0x6ac   : > { %v4327_v2 = vpop.permute.xlu1 %4326 }
 0x6ad   : > { %v4348_v17 = vsel %vm4252_vm10, %v4327_v2, 0.0  ;;  %v4140_v58 = vpop.permute.xlu0 %4139 }
 0x6ae   : > { %v4364_v12 = vadd.f32 %v4348_v17, %v4156_v30  ;;  %v4157_v28 = vsel %vm4061_vm14, %v4140_v58, 0.0 }
 0x6b0   : > { %v4380_v26 = vmul.f32 %v4364_v12, %v8264_v0 }
 0x6b3   : > { %4709 = vmatmul.msk.f32.gmra.mxu3 %vm4382_vm15, %v4380_v26 }
 0x6b4   : > { %v4332_v35 = vpop.permute.xlu1 %4331 }
 0x6b5   : > { %v4349_v31 = vsel %vm4253_vm11, %v4332_v35, 0.0 }
 0x6b6   : > { %v4365_v63 = vadd.f32 %v4349_v31, %v4157_v28 }
 0x6b8   : > { %v4381_v57 = vmul.f32 %v4365_v63, %v8227_v24 }
 0x6bb   : > { %4710 = vmatmul.msk.f32.gmra.mxu3 %vm4382_vm15, %v4381_v57  ;;  %vm4560_vm15 = vcmask 326848  }
 0x6c6   : > { %v4448_v22 = vpop.f32.mrf.mxu3 }
 0x6c7   : > { %4512 = vrot.lane.b32.xlu2 %v4448_v22, %s4880_s13 }
 0x6ce   : > { %v4451_v0 = vpop.f32.mrf.mxu3 }
 0x6cf   : > { %4514 = vrot.lane.b32.xlu0 %v4451_v0, %s4880_s13 }
 0x6d6   : > { %v4454_v9 = vpop.f32.mrf.mxu3 }
 0x6d7   : > { %4516 = vrot.lane.b32.xlu1 %v4454_v9, %s4880_s13 }
 0x6de   : > { %v4457_v43 = vpop.f32.mrf.mxu3 }
 0x6df   : > { %4518 = vrot.lane.b32.xlu2 %v4457_v43, %s4880_s13 }
 0x6e6   : > { %v4460_v56 = vpop.f32.mrf.mxu3 }
 0x6e7   : > { %4520 = vrot.lane.b32.xlu0 %v4460_v56, %s4880_s13 }
 0x6ee   : > { %v4463_v47 = vpop.f32.mrf.mxu3 }
 0x6ef   : > { %4522 = vrot.lane.b32.xlu1 %v4463_v47, %s4880_s13 }
 0x6f6   : > { %v4466_v24 = vpop.f32.mrf.mxu3 }
 0x6f7   : > { %4524 = vrot.lane.b32.xlu2 %v4466_v24, %s4880_s13 }
 0x6fe   : > { %v4469_v33 = vpop.f32.mrf.mxu3 }
 0x6ff   : > { %4526 = vrot.lane.b32.xlu0 %v4469_v33, %s4880_s13 }
 0x706   : > { %v4472_v19 = vpop.f32.mrf.mxu3 }
 0x707   : > { %4528 = vrot.lane.b32.xlu1 %v4472_v19, %s4880_s13 }
 0x70e   : > { %v4475_v38 = vpop.f32.mrf.mxu3 }
 0x70f   : > { %4530 = vrot.lane.b32.xlu2 %v4475_v38, %s4880_s13 }
 0x716   : > { %v4478_v50 = vpop.f32.mrf.mxu3 }
 0x717   : > { %4532 = vrot.lane.b32.xlu0 %v4478_v50, %s4880_s13 }
 0x71e   : > { %v4481_v21 = vpop.f32.mrf.mxu3 }
 0x71f   : > { %4534 = vrot.lane.b32.xlu1 %v4481_v21, %s4880_s13 }
 0x721   : > { %v4513_v46 = vpop.permute.xlu2 %4512 }
 0x722   : > { %4561 = vst.msk [vmem:[%s7164_s6] sm:$0xff] %vm4560_vm15, %v4513_v46 }
 0x723   : > { %4578 = vst.msk [vmem:[%s7164_s6] sm:$0xff] %vm4577_vm0, %v4881_v41 }
 0x726   : > { %v4484_v4 = vpop.f32.mrf.mxu3 }
 0x727   : > { %4536 = vrot.lane.b32.xlu2 %v4484_v4, %s4880_s13 }
 0x72e   : > { %v4487_v16 = vpop.f32.mrf.mxu3 }
 0x72f   : > { %4538 = vrot.lane.b32.xlu0 %v4487_v16, %s4880_s13 }
 0x736   : > { %v4490_v62 = vpop.f32.mrf.mxu3 }
 0x737   : > { %4540 = vrot.lane.b32.xlu1 %v4490_v62, %s4880_s13 }
 0x739   : > { %v4519_v25 = vpop.permute.xlu2 %4518 }
 0x73a   : > { %4564 = vst.msk [vmem:[%s7164_s6 + $0x18] sm:$0xff] %vm4560_vm15, %v4519_v25 }
 0x73b   : > { %4581 = vst.msk [vmem:[%s7164_s6 + $0x18] sm:$0xff] %vm4577_vm0, %v4881_v41 }
 0x73e   : > { %v4493_v10 = vpop.f32.mrf.mxu3 }
 0x73f   : > { %4542 = vrot.lane.b32.xlu2 %v4493_v10, %s4880_s13 }
 0x741   : > { %v4515_v32 = vpop.permute.xlu0 %4514 }
 0x742   : > { %4562 = vst.msk [vmem:[%s7164_s6 + $0x8] sm:$0xff] %vm4560_vm15, %v4515_v32 }
 0x743   : > { %4579 = vst.msk [vmem:[%s7164_s6 + $0x8] sm:$0xff] %vm4577_vm0, %v4881_v41 }
 0x749   : > { %v4517_v3 = vpop.permute.xlu1 %4516 }
 0x74a   : > { %4563 = vst.msk [vmem:[%s7164_s6 + $0x10] sm:$0xff] %vm4560_vm15, %v4517_v3 }
 0x74b   : > { %4580 = vst.msk [vmem:[%s7164_s6 + $0x10] sm:$0xff] %vm4577_vm0, %v4881_v41 }
 0x751   : > { %v4525_v34 = vpop.permute.xlu2 %4524 }
 0x752   : > { %4567 = vst.msk [vmem:[%s7164_s6 + $0x30] sm:$0xff] %vm4560_vm15, %v4525_v34 }
 0x753   : > { %4584 = vst.msk [vmem:[%s7164_s6 + $0x30] sm:$0xff] %vm4577_vm0, %v4881_v41 }
 0x759   : > { %v4521_v45 = vpop.permute.xlu0 %4520 }
 0x75a   : > { %4565 = vst.msk [vmem:[%s7164_s6 + $0x20] sm:$0xff] %vm4560_vm15, %v4521_v45 }
 0x75b   : > { %4582 = vst.msk [vmem:[%s7164_s6 + $0x20] sm:$0xff] %vm4577_vm0, %v4881_v41 }
 0x761   : > { %v4523_v60 = vpop.permute.xlu1 %4522 }
 0x762   : > { %4566 = vst.msk [vmem:[%s7164_s6 + $0x28] sm:$0xff] %vm4560_vm15, %v4523_v60 }
 0x763   : > { %4583 = vst.msk [vmem:[%s7164_s6 + $0x28] sm:$0xff] %vm4577_vm0, %v4881_v41 }
 0x769   : > { %v4531_v18 = vpop.permute.xlu2 %4530 }
 0x76a   : > { %4570 = vst.msk [vmem:[%s7164_s6 + $0x48] sm:$0xff] %vm4560_vm15, %v4531_v18 }
 0x76b   : > { %4587 = vst.msk [vmem:[%s7164_s6 + $0x48] sm:$0xff] %vm4577_vm0, %v4881_v41 }
 0x771   : > { %v4527_v27 = vpop.permute.xlu0 %4526 }
 0x772   : > { %4568 = vst.msk [vmem:[%s7164_s6 + $0x38] sm:$0xff] %vm4560_vm15, %v4527_v27 }
 0x773   : > { %4585 = vst.msk [vmem:[%s7164_s6 + $0x38] sm:$0xff] %vm4577_vm0, %v4881_v41 }
 0x779   : > { %v4529_v1 = vpop.permute.xlu1 %4528 }
 0x77a   : > { %4569 = vst.msk [vmem:[%s7164_s6 + $0x40] sm:$0xff] %vm4560_vm15, %v4529_v1 }
 0x77b   : > { %4586 = vst.msk [vmem:[%s7164_s6 + $0x40] sm:$0xff] %vm4577_vm0, %v4881_v41 }
 0x781   : > { %v4537_v29 = vpop.permute.xlu2 %4536 }
 0x782   : > { %4573 = vst.msk [vmem:[%s7164_s6 + $0x60] sm:$0xff] %vm4560_vm15, %v4537_v29 }
 0x783   : > { %4590 = vst.msk [vmem:[%s7164_s6 + $0x60] sm:$0xff] %vm4577_vm0, %v4881_v41 }
 0x789   : > { %v4533_v8 = vpop.permute.xlu0 %4532 }
 0x78a   : > { %4571 = vst.msk [vmem:[%s7164_s6 + $0x50] sm:$0xff] %vm4560_vm15, %v4533_v8 }
 0x78b   : > { %4588 = vst.msk [vmem:[%s7164_s6 + $0x50] sm:$0xff] %vm4577_vm0, %v4881_v41 }
 0x791   : > { %v4535_v55 = vpop.permute.xlu1 %4534 }
 0x792   : > { %4572 = vst.msk [vmem:[%s7164_s6 + $0x58] sm:$0xff] %vm4560_vm15, %v4535_v55 }
 0x793   : > { %4589 = vst.msk [vmem:[%s7164_s6 + $0x58] sm:$0xff] %vm4577_vm0, %v4881_v41 }
 0x799   : > { %v4543_v51 = vpop.permute.xlu2 %4542 }
 0x79a   : > { %4576 = vst.msk [vmem:[%s7164_s6 + $0x78] sm:$0xff] %vm4560_vm15, %v4543_v51 }
 0x79b   : > { %4593 = vst.msk [vmem:[%s7164_s6 + $0x78] sm:$0xff] %vm4577_vm0, %v4881_v41 }
 0x7a1   : > { %v4539_v13 = vpop.permute.xlu0 %4538 }
 0x7a2   : > { %4574 = vst.msk [vmem:[%s7164_s6 + $0x68] sm:$0xff] %vm4560_vm15, %v4539_v13 }
 0x7a3   : > { %4591 = vst.msk [vmem:[%s7164_s6 + $0x68] sm:$0xff] %vm4577_vm0, %v4881_v41 }
 0x7a9   : > { %v4541_v59 = vpop.permute.xlu1 %4540 }
 0x7aa   : > { %4575 = vst.msk [vmem:[%s7164_s6 + $0x70] sm:$0xff] %vm4560_vm15, %v4541_v59 }
 0x7ab   : > { %4592 = vst.msk [vmem:[%s7164_s6 + $0x70] sm:$0xff] %vm4577_vm0, %v4881_v41 }
 0x7ac   : > { %4838 = shalt.err (!%p4835_p3)
}
 0x7ad   : > { %s4882_s30 = smov 128  }
 0x7ae   : > { %4717 = dma.vmem_to_hbm [thread:$0]  (%p4946_p5), %s4608_s27, 2048, %s4610_s28, %s4595_s19, %s4882_s30, %s4882_s30, %s4879_s8  }
 0x7af PF: > { %p4723_p4 = scmp.ge.s32.totalorder %s4873_s18, 2  ;;  %s4624_s6 = sand.u32 1, %s4861_s15  }
 0x7b0   : > { %s4625_s13 = scalar_lea.sflag [#allocation3], %s4624_s6 }
 0x7b1   : > { %p4720_p7 = pnand %p4723_p4, %p4950_p6 }
 0x7b3   : > { %p4721_p8 = pneg %p4720_p7 }
 0x7b5   : > { %4856 = dma.done.wait (%p4721_p8), %s4625_s13, 2048  }
 0x7b6   : > { %4858 = vsyncadd (%p4721_p8), %s4625_s13, 4294965248  ;;  %p14_p9 = scmp.ge.s32.totalorder %s4933_s21, 4   ;;  %s9387_s15 = smov %s4865_s16 }
 0x7b7   : > { %s9388_s16 = smov %s4869_s17  ;;  %s9389_s17 = smov %s4944_s24 }
 0x7b8   : > { %s9390_s18 = smov %s4933_s21  ;;  %16 = sbr.rel (!%p14_p9) target bundleno = 3 (0x3), region = 71 }
 0x7bd   :  { %4631 = vsyncpa [#allocation3], 1 }
 0x7be   :  { %4633 = vsyncpa [#allocation3 + $0x1], 1 }

</bundles_post_ra>
